<compile_context>
chip_gen: v7x
topology: tpu7x:2x2x1
jax: 0.10.0
libtpu: 0.0.40
codegen_flags: <defaults>
</compile_context>

<pallas_src>
import functools

import jax
import jax.numpy as jnp
import numpy as np
from jax import lax
from jax.experimental import pallas as pl
from jax.experimental.pallas import tpu as pltpu

# ---- FramesConvolution3D defaults ----
LATENT_DIM = 16
INPUT_CHANNELS = 4
LATENT_LENGTH = 2
NUM_LAYERS = 3
INITIAL_DIM = 64
NUM_DOWNSAMPLES = int(np.log2(INITIAL_DIM / LATENT_DIM))    # 2

K3 = 3
TAPS = K3 ** 3                                              # 27
BN_EPS = 1e-5
N_PAD = 128                                                 # lane-dense output width


def _build_layer_cfg():
    """Replicates the layer construction in FramesConvolution3D.__init__."""
    cfg = []
    cin, cout = INPUT_CHANNELS, 16
    for _ in range(NUM_DOWNSAMPLES):
        cfg.append(dict(cin=cin, cout=cout, stride=2, relu=True, bn=True))
        cin = cout
        cout *= 2
    for _ in range(NUM_LAYERS - NUM_DOWNSAMPLES):
        cfg.append(dict(cin=cin, cout=cin, stride=1, relu=True, bn=True))
    cfg.append(dict(cin=cin, cout=LATENT_LENGTH, stride=1, relu=False, bn=False))
    return tuple(cfg)


LAYER_CFG = _build_layer_cfg()


def _round_up(x, m):
    return ((x + m - 1) // m) * m


def _conv_out(n, stride):
    return (n + 2 - K3) // stride + 1      # kernel=3, padding=1


# --------------------------- Pallas kernel ----------------------------------
def matmul_bias_act_kernel(x_ref, w_ref, b_ref, o_ref, *, apply_relu):
    """(tm, K) bf16 @ (K, 128) bf16 -> f32 accumulate, + bias, optional ReLU."""
    acc = jnp.dot(x_ref[...], w_ref[...], preferred_element_type=jnp.float32)
    acc = acc + b_ref[...]
    if apply_relu:
        acc = jnp.maximum(acc, 0.0)
    o_ref[...] = acc.astype(o_ref.dtype)


def conv3d_layer_pallas(h, w_mat, b_row, *, cout, stride, relu, out_dtype):
    """One Conv3d(k=3, p=1, stride) + (folded eval BN) + optional ReLU.

    h:      (B, D, H, W, Cin) bfloat16 (channels-last)
    w_mat:  (round_up(27*Cin, 128), 128) bfloat16 -- tap-major folded weights
    b_row:  (1, 128) float32 -- folded bias (zero in padded lanes)
    returns (B, Do, Ho, Wo, cout) in out_dtype
    """
    B, D, H, W, cin = h.shape
    Do, Ho, Wo = _conv_out(D, stride), _conv_out(H, stride), _conv_out(W, stride)

    # ---- im2col (pure data movement, done in XLA outside the kernel) ----
    # TODO(synk): an in-kernel tap gather would avoid materialising the
    # (M, 27*Cin) patch matrix in HBM, but the strided 3-D windows have no
    # clean rectangular BlockSpec, so the gather stays in the XLA wrapper.
    hp = jnp.pad(h, ((0, 0), (1, 1), (1, 1), (1, 1), (0, 0)))    # conv padding=1
    cols = []
    for kd in range(K3):
        for kh in range(K3):
            for kw in range(K3):
                cols.append(hp[:, kd:kd + stride * (Do - 1) + 1:stride,
                                kh:kh + stride * (Ho - 1) + 1:stride,
                                kw:kw + stride * (Wo - 1) + 1:stride, :])
    patches = jnp.stack(cols, axis=-2)                  # (B,Do,Ho,Wo,27,Cin)

    M = B * Do * Ho * Wo
    K = TAPS * cin
    K_pad, n_pad = w_mat.shape

    # Large row tiles: per-grid-step overhead (~0.35us) dominates otherwise.
    # Worst-case block = 1024 x 896 x bf16 ~= 1.75 MiB -> fits default scoped
    # VMEM (double-buffered) on v5e/v6e/v7x.
    tm_cap = 2048 if K_pad <= 256 else 1024
    tm = min(tm_cap, _round_up(M, 128))
    Mp = _round_up(M, tm)

    patches = patches.reshape(M, K).astype(jnp.bfloat16)
    patches = jnp.pad(patches, ((0, Mp - M), (0, K_pad - K)))     # zero-pad: exact

    kernel = functools.partial(matmul_bias_act_kernel, apply_relu=relu)
    out_bytes = Mp * n_pad * jnp.dtype(out_dtype).itemsize
    cost = pl.CostEstimate(
        flops=2 * Mp * K_pad * n_pad,
        transcendentals=0,
        bytes_accessed=(Mp * K_pad * 2 + K_pad * n_pad * 2 + n_pad * 4
                        + out_bytes))

    out = pl.pallas_call(
        kernel,
        out_shape=jax.ShapeDtypeStruct((Mp, n_pad), out_dtype),
        grid=(Mp // tm,),
        in_specs=[
            pl.BlockSpec((tm, K_pad), lambda i: (i, 0)),      # patches: streamed
            pl.BlockSpec((K_pad, n_pad), lambda i: (0, 0)),   # weights: resident
            pl.BlockSpec((1, n_pad), lambda i: (0, 0)),       # bias: resident
        ],
        out_specs=pl.BlockSpec((tm, n_pad), lambda i: (i, 0)),
        compiler_params=pltpu.CompilerParams(
            dimension_semantics=("parallel",)),
        cost_estimate=cost,
    )(patches, w_mat, b_row)

    return out[:M, :cout].reshape(B, Do, Ho, Wo, cout)


@jax.jit
def frames_convolution3d_forward(x, params):
    """x: (B, 4, D, D, D) float32 -> (B, latent_length, D/4, D/4, D/4) float32."""
    h = jnp.moveaxis(x, 1, -1).astype(jnp.bfloat16)   # channels-last, bf16 once
    n_layers = len(LAYER_CFG)
    for idx, (cfg, layer) in enumerate(zip(LAYER_CFG, params)):
        out_dtype = jnp.float32 if idx == n_layers - 1 else jnp.bfloat16
        h = conv3d_layer_pallas(h, layer["w_mat"], layer["b_row"],
                                cout=cfg["cout"], stride=cfg["stride"],
                                relu=cfg["relu"], out_dtype=out_dtype)
    return jnp.moveaxis(h, -1, 1)                     # back to NCDHW, float32


# --------------------------- parameters -------------------------------------
def init_params(key):
    """Synthetic conv weights (He-style init so activations stay O(1) across
    layers, keeping the numerical check well conditioned), with eval-mode
    BatchNorm3d folded into each preceding conv. Weights stored in bfloat16."""
    # TODO(synk): training-mode BatchNorm3d (batch statistics) is not implemented.
    s = 1.0 / np.sqrt(1.0 + BN_EPS)
    keys = jax.random.split(key, len(LAYER_CFG))
    params = []
    for k, cfg in zip(keys, LAYER_CFG):
        cin, cout = cfg["cin"], cfg["cout"]
        kw, kb = jax.random.split(k)
        fan_in = cin * TAPS
        w = jax.random.normal(kw, (cout, cin, K3, K3, K3), jnp.float32)
        w = w * np.sqrt(2.0 / fan_in)
        b = 0.05 * jax.random.normal(kb, (cout,), jnp.float32)
        if cfg["bn"]:
            w, b = w * s, b * s                      # fold eval-mode BN scale
        w_bf = w.astype(jnp.bfloat16)                # bf16 weights
        # (Cout,Cin,3,3,3) -> (3,3,3,Cin,Cout) -> (27*Cin, Cout): tap-major rows
        w_mat = jnp.transpose(w_bf, (2, 3, 4, 1, 0)).reshape(TAPS * cin, cout)
        K_pad = _round_up(TAPS * cin, 128)
        w_mat = jnp.pad(w_mat, ((0, K_pad - TAPS * cin), (0, N_PAD - cout)))
        b_row = jnp.pad(b, (0, N_PAD - cout)).reshape(1, N_PAD)
        params.append(dict(w_mat=w_mat, b_row=b_row, w_conv=w_bf, b=b))
    return params


# --------------------------- pure-JAX reference ------------------------------
def reference(x, params):
    """Same forward pass via lax.conv_general_dilated (independent code path),
    using the identical bf16-quantized weights and bf16 activations."""
    h = x.astype(jnp.float32)
    for cfg, layer in zip(LAYER_CFG, params):
        y = lax.conv_general_dilated(
            h.astype(jnp.bfloat16), layer["w_conv"],
            window_strides=(cfg["stride"],) * 3,
            padding=((1, 1),) * 3,
            dimension_numbers=("NCDHW", "OIDHW", "NCDHW"),
            preferred_element_type=jnp.float32)
        y = y + layer["b"][None, :, None, None, None]
        h = jnp.maximum(y, 0.0) if cfg["relu"] else y
    return h


if __name__ == "__main__":
    key = jax.random.PRNGKey(0)
    k_x, k_p = jax.random.split(key)

    B, D = 2, 16                    # small spatial size; the conv stack accepts any D
    x = jax.random.normal(k_x, (B, INPUT_CHANNELS, D, D, D), dtype=jnp.float32)
    params = init_params(k_p)

    out = jax.block_until_ready(frames_convolution3d_forward(x, params))
    Do = D // (2 ** NUM_DOWNSAMPLES)
    assert out.shape == (B, LATENT_LENGTH, Do, Do, Do), out.shape
    assert out.dtype == jnp.float32, out.dtype

    ref = jax.block_until_ready(reference(x, params))
    np.testing.assert_allclose(np.asarray(out), np.asarray(ref),
                               rtol=2e-2, atol=2e-3)

    print("KERNEL_OK")
</pallas_src>

<mosaic_0001>
module attributes {stable_mosaic.version = 11 : i64} {
  func.func @matmul_bias_act_kernel(%arg0: i32, %arg1: memref<1024x128xbf16, #tpu.memory_space<vmem>>, %arg2: memref<128x128xbf16, #tpu.memory_space<vmem>>, %arg3: memref<1x128xf32, #tpu.memory_space<vmem>>, %arg4: memref<1024x128xbf16, #tpu.memory_space<vmem>>) attributes {dimension_semantics = [#tpu.dimension_semantics<parallel>], iteration_bounds = array<i64: 1>, scalar_prefetch = 0 : i64, scratch_operands = 0 : i64, tpu.core_type = #tpu.core_type<tc>, window_params = [{transform_indices = @transform_0, window_bounds = array<i64: 1024, 128>}, {pipeline_mode = #tpu.pipeline_mode<synchronous>, transform_indices = @transform_1, window_bounds = array<i64: 128, 128>}, {pipeline_mode = #tpu.pipeline_mode<synchronous>, transform_indices = @transform_2, window_bounds = array<i64: 1, 128>}, {transform_indices = @transform_3, window_bounds = array<i64: 1024, 128>}]} {
    %c0 = arith.constant 0 : index
    %c0_0 = arith.constant 0 : index
    %0 = vector.load %arg1[%c0, %c0_0] : memref<1024x128xbf16, #tpu.memory_space<vmem>>, vector<1024x128xbf16>
    %c0_1 = arith.constant 0 : index
    %c0_2 = arith.constant 0 : index
    %1 = vector.load %arg2[%c0_1, %c0_2] : memref<128x128xbf16, #tpu.memory_space<vmem>>, vector<128x128xbf16>
    %cst = arith.constant dense<0.000000e+00> : vector<1024x128xf32>
    %2 = tpu.matmul %0, %1, %cst {dimension_numbers = #tpu.dot_dimension_numbers<[1], [0], [0], [1], [0, 0, 1, 1], [], []>} : vector<1024x128xbf16>, vector<128x128xbf16>, vector<1024x128xf32> -> vector<1024x128xf32>
    %c0_3 = arith.constant 0 : index
    %c0_4 = arith.constant 0 : index
    %3 = vector.load %arg3[%c0_3, %c0_4] : memref<1x128xf32, #tpu.memory_space<vmem>>, vector<1x128xf32>
    %4 = vector.broadcast %3 : vector<1x128xf32> to vector<1024x128xf32>
    %5 = arith.addf %2, %4 : vector<1024x128xf32>
    %cst_5 = arith.constant 0.000000e+00 : f32
    %6 = vector.broadcast %cst_5 : f32 to vector<1024x128xf32>
    %7 = arith.maximumf %5, %6 : vector<1024x128xf32>
    %8 = arith.truncf %7 : vector<1024x128xf32> to vector<1024x128xbf16>
    %c0_6 = arith.constant 0 : index
    %c0_7 = arith.constant 0 : index
    %9 = vector.load %arg4[%c0_6, %c0_7] : memref<1024x128xbf16, #tpu.memory_space<vmem>>, vector<1024x128xbf16>
    tpu.vector_store %arg4[%c0_6, %c0_7], %8 {strides = array<i32>} : memref<1024x128xbf16, #tpu.memory_space<vmem>>, vector<1024x128xbf16>,
    return
  }
  func.func @transform_0(%arg0: i32) -> (i32, i32) {
    %c0_i32 = arith.constant 0 : i32
    %c0_i32_0 = arith.constant 0 : i32
    return %arg0, %c0_i32 : i32, i32
  }
  func.func @transform_1(%arg0: i32) -> (i32, i32) {
    %c0_i32 = arith.constant 0 : i32
    %c0_i32_0 = arith.constant 0 : i32
    %c0_i32_1 = arith.constant 0 : i32
    return %c0_i32, %c0_i32_0 : i32, i32
  }
  func.func @transform_2(%arg0: i32) -> (i32, i32) {
    %c0_i32 = arith.constant 0 : i32
    %c0_i32_0 = arith.constant 0 : i32
    %c0_i32_1 = arith.constant 0 : i32
    return %c0_i32, %c0_i32_0 : i32, i32
  }
  func.func @transform_3(%arg0: i32) -> (i32, i32) {
    %c0_i32 = arith.constant 0 : i32
    %c0_i32_0 = arith.constant 0 : i32
    return %arg0, %c0_i32 : i32, i32
  }
}

module attributes {stable_mosaic.version = 11 : i64} {
  func.func @matmul_bias_act_kernel(%arg0: i32, %arg1: memref<128x512xbf16, #tpu.memory_space<vmem>>, %arg2: memref<512x128xbf16, #tpu.memory_space<vmem>>, %arg3: memref<1x128xf32, #tpu.memory_space<vmem>>, %arg4: memref<128x128xbf16, #tpu.memory_space<vmem>>) attributes {dimension_semantics = [#tpu.dimension_semantics<parallel>], iteration_bounds = array<i64: 1>, scalar_prefetch = 0 : i64, scratch_operands = 0 : i64, tpu.core_type = #tpu.core_type<tc>, window_params = [{transform_indices = @transform_0, window_bounds = array<i64: 128, 512>}, {pipeline_mode = #tpu.pipeline_mode<synchronous>, transform_indices = @transform_1, window_bounds = array<i64: 512, 128>}, {pipeline_mode = #tpu.pipeline_mode<synchronous>, transform_indices = @transform_2, window_bounds = array<i64: 1, 128>}, {transform_indices = @transform_3, window_bounds = array<i64: 128, 128>}]} {
    %c0 = arith.constant 0 : index
    %c0_0 = arith.constant 0 : index
    %0 = vector.load %arg1[%c0, %c0_0] : memref<128x512xbf16, #tpu.memory_space<vmem>>, vector<128x512xbf16>
    %c0_1 = arith.constant 0 : index
    %c0_2 = arith.constant 0 : index
    %1 = vector.load %arg2[%c0_1, %c0_2] : memref<512x128xbf16, #tpu.memory_space<vmem>>, vector<512x128xbf16>
    %cst = arith.constant dense<0.000000e+00> : vector<128x128xf32>
    %2 = tpu.matmul %0, %1, %cst {dimension_numbers = #tpu.dot_dimension_numbers<[1], [0], [0], [1], [0, 0, 1, 1], [], []>} : vector<128x512xbf16>, vector<512x128xbf16>, vector<128x128xf32> -> vector<128x128xf32>
    %c0_3 = arith.constant 0 : index
    %c0_4 = arith.constant 0 : index
    %3 = vector.load %arg3[%c0_3, %c0_4] : memref<1x128xf32, #tpu.memory_space<vmem>>, vector<1x128xf32>
    %4 = vector.broadcast %3 : vector<1x128xf32> to vector<128x128xf32>
    %5 = arith.addf %2, %4 : vector<128x128xf32>
    %cst_5 = arith.constant 0.000000e+00 : f32
    %6 = vector.broadcast %cst_5 : f32 to vector<128x128xf32>
    %7 = arith.maximumf %5, %6 : vector<128x128xf32>
    %8 = arith.truncf %7 : vector<128x128xf32> to vector<128x128xbf16>
    %c0_6 = arith.constant 0 : index
    %c0_7 = arith.constant 0 : index
    %9 = vector.load %arg4[%c0_6, %c0_7] : memref<128x128xbf16, #tpu.memory_space<vmem>>, vector<128x128xbf16>
    tpu.vector_store %arg4[%c0_6, %c0_7], %8 {strides = array<i32>} : memref<128x128xbf16, #tpu.memory_space<vmem>>, vector<128x128xbf16>,
    return
  }
  func.func @transform_0(%arg0: i32) -> (i32, i32) {
    %c0_i32 = arith.constant 0 : i32
    %c0_i32_0 = arith.constant 0 : i32
    return %arg0, %c0_i32 : i32, i32
  }
  func.func @transform_1(%arg0: i32) -> (i32, i32) {
    %c0_i32 = arith.constant 0 : i32
    %c0_i32_0 = arith.constant 0 : i32
    %c0_i32_1 = arith.constant 0 : i32
    return %c0_i32, %c0_i32_0 : i32, i32
  }
  func.func @transform_2(%arg0: i32) -> (i32, i32) {
    %c0_i32 = arith.constant 0 : i32
    %c0_i32_0 = arith.constant 0 : i32
    %c0_i32_1 = arith.constant 0 : i32
    return %c0_i32, %c0_i32_0 : i32, i32
  }
  func.func @transform_3(%arg0: i32) -> (i32, i32) {
    %c0_i32 = arith.constant 0 : i32
    %c0_i32_0 = arith.constant 0 : i32
    return %arg0, %c0_i32 : i32, i32
  }
}

module attributes {stable_mosaic.version = 11 : i64} {
  func.func @matmul_bias_act_kernel(%arg0: i32, %arg1: memref<128x896xbf16, #tpu.memory_space<vmem>>, %arg2: memref<896x128xbf16, #tpu.memory_space<vmem>>, %arg3: memref<1x128xf32, #tpu.memory_space<vmem>>, %arg4: memref<128x128xbf16, #tpu.memory_space<vmem>>) attributes {dimension_semantics = [#tpu.dimension_semantics<parallel>], iteration_bounds = array<i64: 1>, scalar_prefetch = 0 : i64, scratch_operands = 0 : i64, tpu.core_type = #tpu.core_type<tc>, window_params = [{transform_indices = @transform_0, window_bounds = array<i64: 128, 896>}, {pipeline_mode = #tpu.pipeline_mode<synchronous>, transform_indices = @transform_1, window_bounds = array<i64: 896, 128>}, {pipeline_mode = #tpu.pipeline_mode<synchronous>, transform_indices = @transform_2, window_bounds = array<i64: 1, 128>}, {transform_indices = @transform_3, window_bounds = array<i64: 128, 128>}]} {
    %c0 = arith.constant 0 : index
    %c0_0 = arith.constant 0 : index
    %0 = vector.load %arg1[%c0, %c0_0] : memref<128x896xbf16, #tpu.memory_space<vmem>>, vector<128x896xbf16>
    %c0_1 = arith.constant 0 : index
    %c0_2 = arith.constant 0 : index
    %1 = vector.load %arg2[%c0_1, %c0_2] : memref<896x128xbf16, #tpu.memory_space<vmem>>, vector<896x128xbf16>
    %cst = arith.constant dense<0.000000e+00> : vector<128x128xf32>
    %2 = tpu.matmul %0, %1, %cst {dimension_numbers = #tpu.dot_dimension_numbers<[1], [0], [0], [1], [0, 0, 1, 1], [], []>} : vector<128x896xbf16>, vector<896x128xbf16>, vector<128x128xf32> -> vector<128x128xf32>
    %c0_3 = arith.constant 0 : index
    %c0_4 = arith.constant 0 : index
    %3 = vector.load %arg3[%c0_3, %c0_4] : memref<1x128xf32, #tpu.memory_space<vmem>>, vector<1x128xf32>
    %4 = vector.broadcast %3 : vector<1x128xf32> to vector<128x128xf32>
    %5 = arith.addf %2, %4 : vector<128x128xf32>
    %cst_5 = arith.constant 0.000000e+00 : f32
    %6 = vector.broadcast %cst_5 : f32 to vector<128x128xf32>
    %7 = arith.maximumf %5, %6 : vector<128x128xf32>
    %8 = arith.truncf %7 : vector<128x128xf32> to vector<128x128xbf16>
    %c0_6 = arith.constant 0 : index
    %c0_7 = arith.constant 0 : index
    %9 = vector.load %arg4[%c0_6, %c0_7] : memref<128x128xbf16, #tpu.memory_space<vmem>>, vector<128x128xbf16>
    tpu.vector_store %arg4[%c0_6, %c0_7], %8 {strides = array<i32>} : memref<128x128xbf16, #tpu.memory_space<vmem>>, vector<128x128xbf16>,
    return
  }
  func.func @transform_0(%arg0: i32) -> (i32, i32) {
    %c0_i32 = arith.constant 0 : i32
    %c0_i32_0 = arith.constant 0 : i32
    return %arg0, %c0_i32 : i32, i32
  }
  func.func @transform_1(%arg0: i32) -> (i32, i32) {
    %c0_i32 = arith.constant 0 : i32
    %c0_i32_0 = arith.constant 0 : i32
    %c0_i32_1 = arith.constant 0 : i32
    return %c0_i32, %c0_i32_0 : i32, i32
  }
  func.func @transform_2(%arg0: i32) -> (i32, i32) {
    %c0_i32 = arith.constant 0 : i32
    %c0_i32_0 = arith.constant 0 : i32
    %c0_i32_1 = arith.constant 0 : i32
    return %c0_i32, %c0_i32_0 : i32, i32
  }
  func.func @transform_3(%arg0: i32) -> (i32, i32) {
    %c0_i32 = arith.constant 0 : i32
    %c0_i32_0 = arith.constant 0 : i32
    return %arg0, %c0_i32 : i32, i32
  }
}

module attributes {stable_mosaic.version = 11 : i64} {
  func.func @matmul_bias_act_kernel(%arg0: i32, %arg1: memref<128x896xbf16, #tpu.memory_space<vmem>>, %arg2: memref<896x128xbf16, #tpu.memory_space<vmem>>, %arg3: memref<1x128xf32, #tpu.memory_space<vmem>>, %arg4: memref<128x128xf32, #tpu.memory_space<vmem>>) attributes {dimension_semantics = [#tpu.dimension_semantics<parallel>], iteration_bounds = array<i64: 1>, scalar_prefetch = 0 : i64, scratch_operands = 0 : i64, tpu.core_type = #tpu.core_type<tc>, window_params = [{transform_indices = @transform_0, window_bounds = array<i64: 128, 896>}, {pipeline_mode = #tpu.pipeline_mode<synchronous>, transform_indices = @transform_1, window_bounds = array<i64: 896, 128>}, {pipeline_mode = #tpu.pipeline_mode<synchronous>, transform_indices = @transform_2, window_bounds = array<i64: 1, 128>}, {transform_indices = @transform_3, window_bounds = array<i64: 128, 128>}]} {
    %c0 = arith.constant 0 : index
    %c0_0 = arith.constant 0 : index
    %0 = vector.load %arg1[%c0, %c0_0] : memref<128x896xbf16, #tpu.memory_space<vmem>>, vector<128x896xbf16>
    %c0_1 = arith.constant 0 : index
    %c0_2 = arith.constant 0 : index
    %1 = vector.load %arg2[%c0_1, %c0_2] : memref<896x128xbf16, #tpu.memory_space<vmem>>, vector<896x128xbf16>
    %cst = arith.constant dense<0.000000e+00> : vector<128x128xf32>
    %2 = tpu.matmul %0, %1, %cst {dimension_numbers = #tpu.dot_dimension_numbers<[1], [0], [0], [1], [0, 0, 1, 1], [], []>} : vector<128x896xbf16>, vector<896x128xbf16>, vector<128x128xf32> -> vector<128x128xf32>
    %c0_3 = arith.constant 0 : index
    %c0_4 = arith.constant 0 : index
    %3 = vector.load %arg3[%c0_3, %c0_4] : memref<1x128xf32, #tpu.memory_space<vmem>>, vector<1x128xf32>
    %4 = vector.broadcast %3 : vector<1x128xf32> to vector<128x128xf32>
    %5 = arith.addf %2, %4 : vector<128x128xf32>
    %c0_5 = arith.constant 0 : index
    %c0_6 = arith.constant 0 : index
    %6 = vector.load %arg4[%c0_5, %c0_6] : memref<128x128xf32, #tpu.memory_space<vmem>>, vector<128x128xf32>
    tpu.vector_store %arg4[%c0_5, %c0_6], %5 {strides = array<i32>} : memref<128x128xf32, #tpu.memory_space<vmem>>, vector<128x128xf32>,
    return
  }
  func.func @transform_0(%arg0: i32) -> (i32, i32) {
    %c0_i32 = arith.constant 0 : i32
    %c0_i32_0 = arith.constant 0 : i32
    return %arg0, %c0_i32 : i32, i32
  }
  func.func @transform_1(%arg0: i32) -> (i32, i32) {
    %c0_i32 = arith.constant 0 : i32
    %c0_i32_0 = arith.constant 0 : i32
    %c0_i32_1 = arith.constant 0 : i32
    return %c0_i32, %c0_i32_0 : i32, i32
  }
  func.func @transform_2(%arg0: i32) -> (i32, i32) {
    %c0_i32 = arith.constant 0 : i32
    %c0_i32_0 = arith.constant 0 : i32
    %c0_i32_1 = arith.constant 0 : i32
    return %c0_i32, %c0_i32_0 : i32, i32
  }
  func.func @transform_3(%arg0: i32) -> (i32, i32) {
    %c0_i32 = arith.constant 0 : i32
    %c0_i32_0 = arith.constant 0 : i32
    return %arg0, %c0_i32 : i32, i32
  }
}

</mosaic_0001>

<bundles_post_ra>
// kernel: frames_convolution3d_forward.4
= control target key start
LH: loop header
LB: loop body
LE: loop exit
PB: predicated region body
PF: predicated region fallthrough
CT: control target
= control target key end

     0   :  { %s3492_s1 = inlined_call_operand.vmem [shape: bf16[128,128], index: 1, kind: input, shape index: {}]   ;;  %s3493_s0 = inlined_call_operand.vmem [shape: bf16[1024,128], index: 0, kind: input, shape index: {}]   ;;  %s3494_s2 = inlined_call_operand.vmem [shape: f32[1,128], index: 2, kind: input, shape index: {}]   ;;  %s3495_s3 = inlined_call_operand.vmem [shape: bf16[1024,128], index: 3, kind: output, shape index: {}]  }
   0x1   :  { %v2859_v0 = vld [vmem:[%s3492_s1] sm:$0xff]   ;;  %v2860_v1 = vld [vmem:[%s3492_s1 + $0x8] sm:$0xff]   ;;  %v2861_v2 = vld [vmem:[%s3492_s1 + $0x10] sm:$0xff]  }
   0x2   :  { %2699 = vmatprep.subr.bf16.mxu0 %v2859_v0  ;;  %2843 = vmatprep.subr.bf16.mxu1 %v2859_v0  ;;  %v2862_v3 = vld [vmem:[%s3492_s1 + $0x18] sm:$0xff]   ;;  %v2867_v4 = vld [vmem:[%s3493_s0] sm:$0xff]   ;;  %v2864_v7 = vld [vmem:[%s3492_s1 + $0x28] sm:$0xff]  }
   0x3   :  { %2700 = vmatpush3.bf16.msra.mxu0 %v2859_v0  ;;  %2851 = vmatpush3.bf16.msra.mxu1 %v2859_v0  ;;  %v2868_v5 = vld [vmem:[%s3493_s0 + $0x100] sm:$0xff]   ;;  %v2865_v8 = vld [vmem:[%s3492_s1 + $0x30] sm:$0xff]   ;;  %v2866_v9 = vld [vmem:[%s3492_s1 + $0x38] sm:$0xff]  }
   0x4   :  { %2701 = vmatprep.subr.bf16.mxu0 %v2860_v1  ;;  %2844 = vmatprep.subr.bf16.mxu1 %v2860_v1  ;;  %v2863_v6 = vld [vmem:[%s3492_s1 + $0x20] sm:$0xff]   ;;  %v2869_v10 = vld [vmem:[%s3493_s0 + $0x8] sm:$0xff]   ;;  %v2871_v12 = vld [vmem:[%s3493_s0 + $0x10] sm:$0xff]  }
   0x5   :  { %2715 = vmatprep.mubr.bf16.mxu0 %v2867_v4  ;;  %2779 = vmatprep.mubr.bf16.mxu1 %v2868_v5  ;;  %v2870_v11 = vld [vmem:[%s3493_s0 + $0x108] sm:$0xff]   ;;  %v2872_v13 = vld [vmem:[%s3493_s0 + $0x110] sm:$0xff]   ;;  %v2873_v14 = vld [vmem:[%s3493_s0 + $0x18] sm:$0xff]  }
   0x6   :  { %v2874_v15 = vld [vmem:[%s3493_s0 + $0x118] sm:$0xff]   ;;  %v2875_v16 = vld [vmem:[%s3493_s0 + $0x20] sm:$0xff]   ;;  %v2877_v18 = vld [vmem:[%s3493_s0 + $0x28] sm:$0xff]  }
   0x7   :  { %2702 = vmatpush3.bf16.msra.mxu0 %v2860_v1  ;;  %2852 = vmatpush3.bf16.msra.mxu1 %v2860_v1  ;;  %v2876_v17 = vld [vmem:[%s3493_s0 + $0x120] sm:$0xff]   ;;  %v2878_v19 = vld [vmem:[%s3493_s0 + $0x128] sm:$0xff]   ;;  %v2879_v20 = vld [vmem:[%s3493_s0 + $0x30] sm:$0xff]  }
   0x8   :  { %2703 = vmatprep.subr.bf16.mxu0 %v2861_v2  ;;  %2845 = vmatprep.subr.bf16.mxu1 %v2861_v2  ;;  %v2880_v21 = vld [vmem:[%s3493_s0 + $0x130] sm:$0xff]   ;;  %v2881_v22 = vld [vmem:[%s3493_s0 + $0x38] sm:$0xff]   ;;  %v2883_v24 = vld [vmem:[%s3493_s0 + $0x40] sm:$0xff]  }
   0x9   :  { %v2882_v23 = vld [vmem:[%s3493_s0 + $0x138] sm:$0xff]   ;;  %v2884_v25 = vld [vmem:[%s3493_s0 + $0x140] sm:$0xff]   ;;  %v2885_v26 = vld [vmem:[%s3493_s0 + $0x48] sm:$0xff]  }
   0xa   :  { %v2886_v27 = vld [vmem:[%s3493_s0 + $0x148] sm:$0xff]   ;;  %v2887_v28 = vld [vmem:[%s3493_s0 + $0x50] sm:$0xff]   ;;  %v2889_v30 = vld [vmem:[%s3493_s0 + $0x58] sm:$0xff]  }
   0xb   :  { %2704 = vmatpush3.bf16.msra.mxu0 %v2861_v2  ;;  %2853 = vmatpush3.bf16.msra.mxu1 %v2861_v2  ;;  %v2888_v29 = vld [vmem:[%s3493_s0 + $0x150] sm:$0xff]   ;;  %v2890_v31 = vld [vmem:[%s3493_s0 + $0x158] sm:$0xff]   ;;  %v2891_v32 = vld [vmem:[%s3493_s0 + $0x60] sm:$0xff]  }
   0xc   :  { %2705 = vmatprep.subr.bf16.mxu0 %v2862_v3  ;;  %2846 = vmatprep.subr.bf16.mxu1 %v2862_v3  ;;  %v2892_v33 = vld [vmem:[%s3493_s0 + $0x160] sm:$0xff]   ;;  %v2893_v34 = vld [vmem:[%s3493_s0 + $0x68] sm:$0xff]   ;;  %v2895_v36 = vld [vmem:[%s3493_s0 + $0x70] sm:$0xff]  }
   0xd   :  { %v2894_v35 = vld [vmem:[%s3493_s0 + $0x168] sm:$0xff]   ;;  %v2896_v37 = vld [vmem:[%s3493_s0 + $0x170] sm:$0xff]   ;;  %v2897_v38 = vld [vmem:[%s3493_s0 + $0x78] sm:$0xff]  }
   0xe   :  { %v2898_v39 = vld [vmem:[%s3493_s0 + $0x178] sm:$0xff]   ;;  %v2899_v40 = vld [vmem:[%s3493_s0 + $0x80] sm:$0xff]   ;;  %v2901_v42 = vld [vmem:[%s3493_s0 + $0x88] sm:$0xff]  }
   0xf   :  { %2706 = vmatpush3.bf16.msra.mxu0 %v2862_v3  ;;  %2854 = vmatpush3.bf16.msra.mxu1 %v2862_v3  ;;  %v2900_v41 = vld [vmem:[%s3493_s0 + $0x180] sm:$0xff]   ;;  %v2902_v43 = vld [vmem:[%s3493_s0 + $0x188] sm:$0xff]   ;;  %v2903_v44 = vld [vmem:[%s3493_s0 + $0x90] sm:$0xff]  }
  0x10   :  { %2707 = vmatprep.subr.bf16.mxu0 %v2863_v6  ;;  %2847 = vmatprep.subr.bf16.mxu1 %v2863_v6  ;;  %v2904_v45 = vld [vmem:[%s3493_s0 + $0x190] sm:$0xff]   ;;  %v2905_v46 = vld [vmem:[%s3493_s0 + $0x98] sm:$0xff]   ;;  %v2907_v48 = vld [vmem:[%s3493_s0 + $0xa0] sm:$0xff]  }
  0x11   :  { %v2906_v47 = vld [vmem:[%s3493_s0 + $0x198] sm:$0xff]   ;;  %v2908_v49 = vld [vmem:[%s3493_s0 + $0x1a0] sm:$0xff]   ;;  %v2909_v50 = vld [vmem:[%s3493_s0 + $0xa8] sm:$0xff]  }
  0x12   :  { %v2910_v51 = vld [vmem:[%s3493_s0 + $0x1a8] sm:$0xff]   ;;  %v2911_v52 = vld [vmem:[%s3493_s0 + $0xb0] sm:$0xff]   ;;  %v2913_v54 = vld [vmem:[%s3493_s0 + $0xb8] sm:$0xff]  }
  0x13   :  { %2708 = vmatpush3.bf16.msra.mxu0 %v2863_v6  ;;  %2855 = vmatpush3.bf16.msra.mxu1 %v2863_v6  ;;  %v2912_v53 = vld [vmem:[%s3493_s0 + $0x1b0] sm:$0xff]   ;;  %v2914_v55 = vld [vmem:[%s3493_s0 + $0x1b8] sm:$0xff]   ;;  %v2915_v56 = vld [vmem:[%s3493_s0 + $0xc0] sm:$0xff]  }
  0x14   :  { %2709 = vmatprep.subr.bf16.mxu0 %v2864_v7  ;;  %2848 = vmatprep.subr.bf16.mxu1 %v2864_v7  ;;  %v2916_v57 = vld [vmem:[%s3493_s0 + $0x1c0] sm:$0xff]   ;;  %v2917_v58 = vld [vmem:[%s3493_s0 + $0xc8] sm:$0xff]   ;;  %v2919_v60 = vld [vmem:[%s3493_s0 + $0xd0] sm:$0xff]  }
  0x15   :  { %v2918_v59 = vld [vmem:[%s3493_s0 + $0x1c8] sm:$0xff]   ;;  %v2920_v61 = vld [vmem:[%s3493_s0 + $0x1d0] sm:$0xff]   ;;  %v2921_v62 = vld [vmem:[%s3493_s0 + $0xd8] sm:$0xff]  }
  0x16   :  { %v2922_v63 = vld [vmem:[%s3493_s0 + $0x1d8] sm:$0xff]   ;;  %v2923_v0 = vld [vmem:[%s3493_s0 + $0xe0] sm:$0xff]   ;;  %v2925_v2 = vld [vmem:[%s3493_s0 + $0xe8] sm:$0xff]  }
  0x17   :  { %2710 = vmatpush3.bf16.msra.mxu0 %v2864_v7  ;;  %2856 = vmatpush3.bf16.msra.mxu1 %v2864_v7  ;;  %v2924_v1 = vld [vmem:[%s3493_s0 + $0x1e0] sm:$0xff]   ;;  %v2926_v3 = vld [vmem:[%s3493_s0 + $0x1e8] sm:$0xff]   ;;  %v2927_v4 = vld [vmem:[%s3493_s0 + $0xf0] sm:$0xff]  }
  0x18   :  { %2711 = vmatprep.subr.bf16.mxu0 %v2865_v8  ;;  %2849 = vmatprep.subr.bf16.mxu1 %v2865_v8  ;;  %v2928_v5 = vld [vmem:[%s3493_s0 + $0x1f0] sm:$0xff]   ;;  %v2929_v6 = vld [vmem:[%s3493_s0 + $0xf8] sm:$0xff]  }
  0x19   :  { %v2930_v7 = vld [vmem:[%s3493_s0 + $0x1f8] sm:$0xff]  }
  0x1b   :  { %2712 = vmatpush3.bf16.msra.mxu0 %v2865_v8  ;;  %2857 = vmatpush3.bf16.msra.mxu1 %v2865_v8  ;;  %v3170_v8 = vld [vmem:[%s3494_s2] ss:$0 sm:$0xff] }
  0x1c   :  { %2713 = vmatprep.subr.bf16.mxu0 %v2866_v9  ;;  %2850 = vmatprep.subr.bf16.mxu1 %v2866_v9 }
  0x1f   :  { %2714 = vmatpush3.bf16.msra.mxu0 %v2866_v9  ;;  %2858 = vmatpush3.bf16.msra.mxu1 %v2866_v9 }
  0x22   :  { %2716 = vmatmul.mubr.bf16.vlgmr.msra.gmra.mrb[0].mxu0 %v2869_v10  ;;  %2780 = vmatmul.mubr.bf16.vlgmr.msra.gmra.mrb[0].mxu1 %v2870_v11 }
  0x23   :  { %2719 = vmatprep.mubr.bf16.mxu0 %v2871_v12  ;;  %2783 = vmatprep.mubr.bf16.mxu1 %v2872_v13 }
  0x2a   :  { %2720 = vmatmul.mubr.bf16.gmra.mrb[4].mxu0 %v2873_v14  ;;  %2784 = vmatmul.mubr.bf16.gmra.mrb[4].mxu1 %v2874_v15 }
  0x2b   :  { %2723 = vmatprep.mubr.bf16.mxu0 %v2875_v16  ;;  %2787 = vmatprep.mubr.bf16.mxu1 %v2876_v17 }
  0x32   :  { %2724 = vmatmul.mubr.bf16.gmra.mrb[8].mxu0 %v2877_v18  ;;  %2788 = vmatmul.mubr.bf16.gmra.mrb[8].mxu1 %v2878_v19 }
  0x33   :  { %2727 = vmatprep.mubr.bf16.mxu0 %v2879_v20  ;;  %2791 = vmatprep.mubr.bf16.mxu1 %v2880_v21 }
  0x3a   :  { %2728 = vmatmul.mubr.bf16.gmra.mrb[12].mxu0 %v2881_v22  ;;  %2792 = vmatmul.mubr.bf16.gmra.mrb[12].mxu1 %v2882_v23 }
  0x3b   :  { %2731 = vmatprep.mubr.bf16.mxu0 %v2883_v24  ;;  %2795 = vmatprep.mubr.bf16.mxu1 %v2884_v25 }
  0x42   :  { %2732 = vmatmul.mubr.bf16.gmra.mrb[16].mxu0 %v2885_v26  ;;  %2796 = vmatmul.mubr.bf16.gmra.mrb[16].mxu1 %v2886_v27 }
  0x43   :  { %2735 = vmatprep.mubr.bf16.mxu0 %v2887_v28  ;;  %2799 = vmatprep.mubr.bf16.mxu1 %v2888_v29 }
  0x4a   :  { %2736 = vmatmul.mubr.bf16.gmra.mrb[20].mxu0 %v2889_v30  ;;  %2800 = vmatmul.mubr.bf16.gmra.mrb[20].mxu1 %v2890_v31 }
  0x4b   :  { %2739 = vmatprep.mubr.bf16.mxu0 %v2891_v32  ;;  %2803 = vmatprep.mubr.bf16.mxu1 %v2892_v33 }
  0x52   :  { %2740 = vmatmul.mubr.bf16.gmra.mrb[24].mxu0 %v2893_v34  ;;  %2804 = vmatmul.mubr.bf16.gmra.mrb[24].mxu1 %v2894_v35 }
  0x53   :  { %2743 = vmatprep.mubr.bf16.mxu0 %v2895_v36  ;;  %2807 = vmatprep.mubr.bf16.mxu1 %v2896_v37 }
  0x5a   :  { %2744 = vmatmul.mubr.bf16.gmra.mrb[28].mxu0 %v2897_v38  ;;  %2808 = vmatmul.mubr.bf16.gmra.mrb[28].mxu1 %v2898_v39 }
  0x5b   :  { %2747 = vmatprep.mubr.bf16.mxu0 %v2899_v40  ;;  %2811 = vmatprep.mubr.bf16.mxu1 %v2900_v41 }
  0x62   :  { %2748 = vmatmul.mubr.bf16.gmra.mrb[32].mxu0 %v2901_v42  ;;  %2812 = vmatmul.mubr.bf16.gmra.mrb[32].mxu1 %v2902_v43 }
  0x63   :  { %2751 = vmatprep.mubr.bf16.mxu0 %v2903_v44  ;;  %2815 = vmatprep.mubr.bf16.mxu1 %v2904_v45 }
  0x6a   :  { %2752 = vmatmul.mubr.bf16.gmra.mrb[36].mxu0 %v2905_v46  ;;  %2816 = vmatmul.mubr.bf16.gmra.mrb[36].mxu1 %v2906_v47 }
  0x6b   :  { %2755 = vmatprep.mubr.bf16.mxu0 %v2907_v48  ;;  %2819 = vmatprep.mubr.bf16.mxu1 %v2908_v49 }
  0x72   :  { %2756 = vmatmul.mubr.bf16.gmra.mrb[40].mxu0 %v2909_v50  ;;  %2820 = vmatmul.mubr.bf16.gmra.mrb[40].mxu1 %v2910_v51 }
  0x73   :  { %2759 = vmatprep.mubr.bf16.mxu0 %v2911_v52  ;;  %2823 = vmatprep.mubr.bf16.mxu1 %v2912_v53 }
  0x7a   :  { %2760 = vmatmul.mubr.bf16.gmra.mrb[44].mxu0 %v2913_v54  ;;  %2824 = vmatmul.mubr.bf16.gmra.mrb[44].mxu1 %v2914_v55 }
  0x7b   :  { %2763 = vmatprep.mubr.bf16.mxu0 %v2915_v56  ;;  %2827 = vmatprep.mubr.bf16.mxu1 %v2916_v57 }
  0x82   :  { %2764 = vmatmul.mubr.bf16.gmra.mrb[48].mxu0 %v2917_v58  ;;  %2828 = vmatmul.mubr.bf16.gmra.mrb[48].mxu1 %v2918_v59 }
  0x83   :  { %2767 = vmatprep.mubr.bf16.mxu0 %v2919_v60  ;;  %2831 = vmatprep.mubr.bf16.mxu1 %v2920_v61 }
  0x8a   :  { %2768 = vmatmul.mubr.bf16.gmra.mrb[52].mxu0 %v2921_v62  ;;  %2832 = vmatmul.mubr.bf16.gmra.mrb[52].mxu1 %v2922_v63 }
  0x8b   :  { %2771 = vmatprep.mubr.bf16.mxu0 %v2923_v0  ;;  %2835 = vmatprep.mubr.bf16.mxu1 %v2924_v1 }
  0x92   :  { %2772 = vmatmul.mubr.bf16.gmra.mrb[56].mxu0 %v2925_v2  ;;  %2836 = vmatmul.mubr.bf16.gmra.mrb[56].mxu1 %v2926_v3 }
  0x93   :  { %2775 = vmatprep.mubr.bf16.mxu0 %v2927_v4  ;;  %2839 = vmatprep.mubr.bf16.mxu1 %v2928_v5 }
  0x9a   :  { %2776 = vmatmul.mubr.bf16.gmra.mrb[60].mxu0 %v2929_v6  ;;  %2840 = vmatmul.mubr.bf16.gmra.mrb[60].mxu1 %v2930_v7 }
  0xf5   :  { %v2717_v9 = vpop.f32.mrb[0].mxu0  ;;  %v2781_v10 = vpop.f32.mrb[0].mxu1 }
  0xf6   :  { %v641_v11 = vadd.f32 %v2717_v9, %v3170_v8  ;;  %v897_v12 = vadd.f32 %v2781_v10, %v3170_v8  ;;  %v632_v13 = vpop.f32.mrb[1].mxu0  ;;  %v888_v14 = vpop.f32.mrb[1].mxu1 }
  0xf7   :  { %v633_v15 = vadd.f32 %v3170_v8, %v632_v13  ;;  %v889_v16 = vadd.f32 %v3170_v8, %v888_v14  ;;  %v2718_v17 = vpop.f32.mrb[2].mxu0  ;;  %v2782_v18 = vpop.f32.mrb[2].mxu1 }
  0xf8   :  { %v644_v19 = vadd.f32 %v2718_v17, %v3170_v8  ;;  %v900_v20 = vadd.f32 %v2782_v18, %v3170_v8  ;;  %v635_v21 = vpop.f32.mrb[3].mxu0  ;;  %v891_v22 = vpop.f32.mrb[3].mxu1  ;;  %v1145_v25 = vmax.f32 %v641_v11, 0.0  ;;  %v1209_v26 = vmax.f32 %v897_v12, 0.0 }
  0xf9   :  { %v636_v23 = vadd.f32 %v3170_v8, %v635_v21  ;;  %v892_v24 = vadd.f32 %v3170_v8, %v891_v22  ;;  %v1143_v29 = vmax.f32 %v633_v15, 0.0  ;;  %v1207_v30 = vmax.f32 %v889_v16, 0.0 }
  0xfa   :  { %v1146_v27 = vmax.f32 %v644_v19, 0.0  ;;  %v1210_v28 = vmax.f32 %v900_v20, 0.0 }
  0xfb   :  { %v1144_v31 = vmax.f32 %v636_v23, 0.0  ;;  %v1208_v32 = vmax.f32 %v892_v24, 0.0 }
  0xfc   :  { %v2252_v33 = vpack.c.bf16 %v1146_v27, %v1145_v25  ;;  %v2412_v34 = vpack.c.bf16 %v1210_v28, %v1209_v26 }
  0xfd   :  { %v2247_v35 = vpack.c.bf16 %v1144_v31, %v1143_v29  ;;  %v2407_v36 = vpack.c.bf16 %v1208_v32, %v1207_v30  ;;  %v2721_v37 = vpop.f32.mrb[4].mxu0  ;;  %v2785_v38 = vpop.f32.mrb[4].mxu1 }
  0xfe   :  { %2564 = vst [vmem:[%s3495_s3 + $0x8] sm:$0xff] %v2252_v33   ;;  %2596 = vst [vmem:[%s3495_s3 + $0x108] sm:$0xff] %v2412_v34   ;;  %v657_v39 = vadd.f32 %v2721_v37, %v3170_v8  ;;  %v913_v40 = vadd.f32 %v2785_v38, %v3170_v8  ;;  %v648_v41 = vpop.f32.mrb[5].mxu0  ;;  %v904_v42 = vpop.f32.mrb[5].mxu1 }
  0xff   :  { %2248 = vst [vmem:[%s3495_s3] sm:$0xff] %v2247_v35   ;;  %2595 = vst [vmem:[%s3495_s3 + $0x100] sm:$0xff] %v2407_v36   ;;  %v649_v43 = vadd.f32 %v3170_v8, %v648_v41  ;;  %v905_v44 = vadd.f32 %v3170_v8, %v904_v42  ;;  %v2722_v45 = vpop.f32.mrb[6].mxu0  ;;  %v2786_v46 = vpop.f32.mrb[6].mxu1 }
 0x100   :  { %v660_v47 = vadd.f32 %v2722_v45, %v3170_v8  ;;  %v916_v48 = vadd.f32 %v2786_v46, %v3170_v8  ;;  %v651_v49 = vpop.f32.mrb[7].mxu0  ;;  %v907_v50 = vpop.f32.mrb[7].mxu1  ;;  %v1149_v53 = vmax.f32 %v657_v39, 0.0  ;;  %v1213_v54 = vmax.f32 %v913_v40, 0.0 }
 0x101   :  { %v652_v51 = vadd.f32 %v3170_v8, %v651_v49  ;;  %v908_v52 = vadd.f32 %v3170_v8, %v907_v50  ;;  %v1147_v57 = vmax.f32 %v649_v43, 0.0  ;;  %v1211_v58 = vmax.f32 %v905_v44, 0.0 }
 0x102   :  { %v1150_v55 = vmax.f32 %v660_v47, 0.0  ;;  %v1214_v56 = vmax.f32 %v916_v48, 0.0 }
 0x103   :  { %v1148_v59 = vmax.f32 %v652_v51, 0.0  ;;  %v1212_v60 = vmax.f32 %v908_v52, 0.0 }
 0x104   :  { %v2262_v61 = vpack.c.bf16 %v1150_v55, %v1149_v53  ;;  %v2422_v62 = vpack.c.bf16 %v1214_v56, %v1213_v54 }
 0x105   :  { %v2257_v63 = vpack.c.bf16 %v1148_v59, %v1147_v57  ;;  %v2417_v0 = vpack.c.bf16 %v1212_v60, %v1211_v58  ;;  %v2725_v1 = vpop.f32.mrb[8].mxu0  ;;  %v2789_v2 = vpop.f32.mrb[8].mxu1 }
 0x106   :  { %2566 = vst [vmem:[%s3495_s3 + $0x18] sm:$0xff] %v2262_v61   ;;  %2598 = vst [vmem:[%s3495_s3 + $0x118] sm:$0xff] %v2422_v62   ;;  %v673_v3 = vadd.f32 %v2725_v1, %v3170_v8  ;;  %v929_v4 = vadd.f32 %v2789_v2, %v3170_v8  ;;  %v664_v5 = vpop.f32.mrb[9].mxu0  ;;  %v920_v6 = vpop.f32.mrb[9].mxu1 }
 0x107   :  { %2565 = vst [vmem:[%s3495_s3 + $0x10] sm:$0xff] %v2257_v63   ;;  %2597 = vst [vmem:[%s3495_s3 + $0x110] sm:$0xff] %v2417_v0   ;;  %v665_v7 = vadd.f32 %v3170_v8, %v664_v5  ;;  %v921_v9 = vadd.f32 %v3170_v8, %v920_v6  ;;  %v2726_v10 = vpop.f32.mrb[10].mxu0  ;;  %v2790_v11 = vpop.f32.mrb[10].mxu1 }
 0x108   :  { %v676_v12 = vadd.f32 %v2726_v10, %v3170_v8  ;;  %v932_v13 = vadd.f32 %v2790_v11, %v3170_v8  ;;  %v667_v14 = vpop.f32.mrb[11].mxu0  ;;  %v923_v15 = vpop.f32.mrb[11].mxu1  ;;  %v1153_v18 = vmax.f32 %v673_v3, 0.0  ;;  %v1217_v19 = vmax.f32 %v929_v4, 0.0 }
 0x109   :  { %v668_v16 = vadd.f32 %v3170_v8, %v667_v14  ;;  %v924_v17 = vadd.f32 %v3170_v8, %v923_v15  ;;  %v1151_v22 = vmax.f32 %v665_v7, 0.0  ;;  %v1215_v23 = vmax.f32 %v921_v9, 0.0 }
 0x10a   :  { %v1154_v20 = vmax.f32 %v676_v12, 0.0  ;;  %v1218_v21 = vmax.f32 %v932_v13, 0.0 }
 0x10b   :  { %v1152_v24 = vmax.f32 %v668_v16, 0.0  ;;  %v1216_v25 = vmax.f32 %v924_v17, 0.0 }
 0x10c   :  { %v2272_v26 = vpack.c.bf16 %v1154_v20, %v1153_v18  ;;  %v2432_v27 = vpack.c.bf16 %v1218_v21, %v1217_v19 }
 0x10d   :  { %v2267_v28 = vpack.c.bf16 %v1152_v24, %v1151_v22  ;;  %v2427_v29 = vpack.c.bf16 %v1216_v25, %v1215_v23  ;;  %v2729_v30 = vpop.f32.mrb[12].mxu0  ;;  %v2793_v31 = vpop.f32.mrb[12].mxu1 }
 0x10e   :  { %2568 = vst [vmem:[%s3495_s3 + $0x28] sm:$0xff] %v2272_v26   ;;  %2600 = vst [vmem:[%s3495_s3 + $0x128] sm:$0xff] %v2432_v27   ;;  %v689_v32 = vadd.f32 %v2729_v30, %v3170_v8  ;;  %v945_v33 = vadd.f32 %v2793_v31, %v3170_v8  ;;  %v680_v34 = vpop.f32.mrb[13].mxu0  ;;  %v936_v35 = vpop.f32.mrb[13].mxu1 }
 0x10f   :  { %2567 = vst [vmem:[%s3495_s3 + $0x20] sm:$0xff] %v2267_v28   ;;  %2599 = vst [vmem:[%s3495_s3 + $0x120] sm:$0xff] %v2427_v29   ;;  %v681_v36 = vadd.f32 %v3170_v8, %v680_v34  ;;  %v937_v37 = vadd.f32 %v3170_v8, %v936_v35  ;;  %v2730_v38 = vpop.f32.mrb[14].mxu0  ;;  %v2794_v39 = vpop.f32.mrb[14].mxu1 }
 0x110   :  { %v692_v40 = vadd.f32 %v2730_v38, %v3170_v8  ;;  %v948_v41 = vadd.f32 %v2794_v39, %v3170_v8  ;;  %v683_v42 = vpop.f32.mrb[15].mxu0  ;;  %v939_v43 = vpop.f32.mrb[15].mxu1  ;;  %v1157_v46 = vmax.f32 %v689_v32, 0.0  ;;  %v1221_v47 = vmax.f32 %v945_v33, 0.0 }
 0x111   :  { %v684_v44 = vadd.f32 %v3170_v8, %v683_v42  ;;  %v940_v45 = vadd.f32 %v3170_v8, %v939_v43  ;;  %v1155_v50 = vmax.f32 %v681_v36, 0.0  ;;  %v1219_v51 = vmax.f32 %v937_v37, 0.0 }
 0x112   :  { %v1158_v48 = vmax.f32 %v692_v40, 0.0  ;;  %v1222_v49 = vmax.f32 %v948_v41, 0.0 }
 0x113   :  { %v1156_v52 = vmax.f32 %v684_v44, 0.0  ;;  %v1220_v53 = vmax.f32 %v940_v45, 0.0 }
 0x114   :  { %v2282_v54 = vpack.c.bf16 %v1158_v48, %v1157_v46  ;;  %v2442_v55 = vpack.c.bf16 %v1222_v49, %v1221_v47 }
 0x115   :  { %v2277_v56 = vpack.c.bf16 %v1156_v52, %v1155_v50  ;;  %v2437_v57 = vpack.c.bf16 %v1220_v53, %v1219_v51  ;;  %v2733_v58 = vpop.f32.mrb[16].mxu0  ;;  %v2797_v59 = vpop.f32.mrb[16].mxu1 }
 0x116   :  { %2570 = vst [vmem:[%s3495_s3 + $0x38] sm:$0xff] %v2282_v54   ;;  %2602 = vst [vmem:[%s3495_s3 + $0x138] sm:$0xff] %v2442_v55   ;;  %v705_v60 = vadd.f32 %v2733_v58, %v3170_v8  ;;  %v961_v61 = vadd.f32 %v2797_v59, %v3170_v8  ;;  %v696_v62 = vpop.f32.mrb[17].mxu0  ;;  %v952_v63 = vpop.f32.mrb[17].mxu1 }
 0x117   :  { %2569 = vst [vmem:[%s3495_s3 + $0x30] sm:$0xff] %v2277_v56   ;;  %2601 = vst [vmem:[%s3495_s3 + $0x130] sm:$0xff] %v2437_v57   ;;  %v697_v0 = vadd.f32 %v3170_v8, %v696_v62  ;;  %v953_v1 = vadd.f32 %v3170_v8, %v952_v63  ;;  %v2734_v2 = vpop.f32.mrb[18].mxu0  ;;  %v2798_v3 = vpop.f32.mrb[18].mxu1 }
 0x118   :  { %v708_v4 = vadd.f32 %v2734_v2, %v3170_v8  ;;  %v964_v5 = vadd.f32 %v2798_v3, %v3170_v8  ;;  %v699_v6 = vpop.f32.mrb[19].mxu0  ;;  %v955_v7 = vpop.f32.mrb[19].mxu1  ;;  %v1161_v11 = vmax.f32 %v705_v60, 0.0  ;;  %v1225_v12 = vmax.f32 %v961_v61, 0.0 }
 0x119   :  { %v700_v9 = vadd.f32 %v3170_v8, %v699_v6  ;;  %v956_v10 = vadd.f32 %v3170_v8, %v955_v7  ;;  %v1159_v15 = vmax.f32 %v697_v0, 0.0  ;;  %v1223_v16 = vmax.f32 %v953_v1, 0.0 }
 0x11a   :  { %v1162_v13 = vmax.f32 %v708_v4, 0.0  ;;  %v1226_v14 = vmax.f32 %v964_v5, 0.0 }
 0x11b   :  { %v1160_v17 = vmax.f32 %v700_v9, 0.0  ;;  %v1224_v18 = vmax.f32 %v956_v10, 0.0 }
 0x11c   :  { %v2292_v19 = vpack.c.bf16 %v1162_v13, %v1161_v11  ;;  %v2452_v20 = vpack.c.bf16 %v1226_v14, %v1225_v12 }
 0x11d   :  { %v2287_v21 = vpack.c.bf16 %v1160_v17, %v1159_v15  ;;  %v2447_v22 = vpack.c.bf16 %v1224_v18, %v1223_v16  ;;  %v2737_v23 = vpop.f32.mrb[20].mxu0  ;;  %v2801_v24 = vpop.f32.mrb[20].mxu1 }
 0x11e   :  { %2572 = vst [vmem:[%s3495_s3 + $0x48] sm:$0xff] %v2292_v19   ;;  %2604 = vst [vmem:[%s3495_s3 + $0x148] sm:$0xff] %v2452_v20   ;;  %v721_v25 = vadd.f32 %v2737_v23, %v3170_v8  ;;  %v977_v26 = vadd.f32 %v2801_v24, %v3170_v8  ;;  %v712_v27 = vpop.f32.mrb[21].mxu0  ;;  %v968_v28 = vpop.f32.mrb[21].mxu1 }
 0x11f   :  { %2571 = vst [vmem:[%s3495_s3 + $0x40] sm:$0xff] %v2287_v21   ;;  %2603 = vst [vmem:[%s3495_s3 + $0x140] sm:$0xff] %v2447_v22   ;;  %v713_v29 = vadd.f32 %v3170_v8, %v712_v27  ;;  %v969_v30 = vadd.f32 %v3170_v8, %v968_v28  ;;  %v2738_v31 = vpop.f32.mrb[22].mxu0  ;;  %v2802_v32 = vpop.f32.mrb[22].mxu1 }
 0x120   :  { %v724_v33 = vadd.f32 %v2738_v31, %v3170_v8  ;;  %v980_v34 = vadd.f32 %v2802_v32, %v3170_v8  ;;  %v715_v35 = vpop.f32.mrb[23].mxu0  ;;  %v971_v36 = vpop.f32.mrb[23].mxu1  ;;  %v1165_v39 = vmax.f32 %v721_v25, 0.0  ;;  %v1229_v40 = vmax.f32 %v977_v26, 0.0 }
 0x121   :  { %v716_v37 = vadd.f32 %v3170_v8, %v715_v35  ;;  %v972_v38 = vadd.f32 %v3170_v8, %v971_v36  ;;  %v1163_v43 = vmax.f32 %v713_v29, 0.0  ;;  %v1227_v44 = vmax.f32 %v969_v30, 0.0 }
 0x122   :  { %v1166_v41 = vmax.f32 %v724_v33, 0.0  ;;  %v1230_v42 = vmax.f32 %v980_v34, 0.0 }
 0x123   :  { %v1164_v45 = vmax.f32 %v716_v37, 0.0  ;;  %v1228_v46 = vmax.f32 %v972_v38, 0.0 }
 0x124   :  { %v2302_v47 = vpack.c.bf16 %v1166_v41, %v1165_v39  ;;  %v2462_v48 = vpack.c.bf16 %v1230_v42, %v1229_v40 }
 0x125   :  { %v2297_v49 = vpack.c.bf16 %v1164_v45, %v1163_v43  ;;  %v2457_v50 = vpack.c.bf16 %v1228_v46, %v1227_v44  ;;  %v2741_v51 = vpop.f32.mrb[24].mxu0  ;;  %v2805_v52 = vpop.f32.mrb[24].mxu1 }
 0x126   :  { %2574 = vst [vmem:[%s3495_s3 + $0x58] sm:$0xff] %v2302_v47   ;;  %2606 = vst [vmem:[%s3495_s3 + $0x158] sm:$0xff] %v2462_v48   ;;  %v737_v53 = vadd.f32 %v2741_v51, %v3170_v8  ;;  %v993_v54 = vadd.f32 %v2805_v52, %v3170_v8  ;;  %v728_v55 = vpop.f32.mrb[25].mxu0  ;;  %v984_v56 = vpop.f32.mrb[25].mxu1 }
 0x127   :  { %2573 = vst [vmem:[%s3495_s3 + $0x50] sm:$0xff] %v2297_v49   ;;  %2605 = vst [vmem:[%s3495_s3 + $0x150] sm:$0xff] %v2457_v50   ;;  %v729_v57 = vadd.f32 %v3170_v8, %v728_v55  ;;  %v985_v58 = vadd.f32 %v3170_v8, %v984_v56  ;;  %v2742_v59 = vpop.f32.mrb[26].mxu0  ;;  %v2806_v60 = vpop.f32.mrb[26].mxu1 }
 0x128   :  { %v740_v61 = vadd.f32 %v2742_v59, %v3170_v8  ;;  %v996_v62 = vadd.f32 %v2806_v60, %v3170_v8  ;;  %v731_v63 = vpop.f32.mrb[27].mxu0  ;;  %v987_v0 = vpop.f32.mrb[27].mxu1  ;;  %v1169_v3 = vmax.f32 %v737_v53, 0.0  ;;  %v1233_v4 = vmax.f32 %v993_v54, 0.0 }
 0x129   :  { %v732_v1 = vadd.f32 %v3170_v8, %v731_v63  ;;  %v988_v2 = vadd.f32 %v3170_v8, %v987_v0  ;;  %v1167_v7 = vmax.f32 %v729_v57, 0.0  ;;  %v1231_v9 = vmax.f32 %v985_v58, 0.0 }
 0x12a   :  { %v1170_v5 = vmax.f32 %v740_v61, 0.0  ;;  %v1234_v6 = vmax.f32 %v996_v62, 0.0 }
 0x12b   :  { %v1168_v10 = vmax.f32 %v732_v1, 0.0  ;;  %v1232_v11 = vmax.f32 %v988_v2, 0.0 }
 0x12c   :  { %v2312_v12 = vpack.c.bf16 %v1170_v5, %v1169_v3  ;;  %v2472_v13 = vpack.c.bf16 %v1234_v6, %v1233_v4 }
 0x12d   :  { %v2307_v14 = vpack.c.bf16 %v1168_v10, %v1167_v7  ;;  %v2467_v15 = vpack.c.bf16 %v1232_v11, %v1231_v9  ;;  %v2745_v16 = vpop.f32.mrb[28].mxu0  ;;  %v2809_v17 = vpop.f32.mrb[28].mxu1 }
 0x12e   :  { %2576 = vst [vmem:[%s3495_s3 + $0x68] sm:$0xff] %v2312_v12   ;;  %2608 = vst [vmem:[%s3495_s3 + $0x168] sm:$0xff] %v2472_v13   ;;  %v753_v18 = vadd.f32 %v2745_v16, %v3170_v8  ;;  %v1009_v19 = vadd.f32 %v2809_v17, %v3170_v8  ;;  %v744_v20 = vpop.f32.mrb[29].mxu0  ;;  %v1000_v21 = vpop.f32.mrb[29].mxu1 }
 0x12f   :  { %2575 = vst [vmem:[%s3495_s3 + $0x60] sm:$0xff] %v2307_v14   ;;  %2607 = vst [vmem:[%s3495_s3 + $0x160] sm:$0xff] %v2467_v15   ;;  %v745_v22 = vadd.f32 %v3170_v8, %v744_v20  ;;  %v1001_v23 = vadd.f32 %v3170_v8, %v1000_v21  ;;  %v2746_v24 = vpop.f32.mrb[30].mxu0  ;;  %v2810_v25 = vpop.f32.mrb[30].mxu1 }
 0x130   :  { %v756_v26 = vadd.f32 %v2746_v24, %v3170_v8  ;;  %v1012_v27 = vadd.f32 %v2810_v25, %v3170_v8  ;;  %v747_v28 = vpop.f32.mrb[31].mxu0  ;;  %v1003_v29 = vpop.f32.mrb[31].mxu1  ;;  %v1173_v32 = vmax.f32 %v753_v18, 0.0  ;;  %v1237_v33 = vmax.f32 %v1009_v19, 0.0 }
 0x131   :  { %v748_v30 = vadd.f32 %v3170_v8, %v747_v28  ;;  %v1004_v31 = vadd.f32 %v3170_v8, %v1003_v29  ;;  %v1171_v36 = vmax.f32 %v745_v22, 0.0  ;;  %v1235_v37 = vmax.f32 %v1001_v23, 0.0 }
 0x132   :  { %v1174_v34 = vmax.f32 %v756_v26, 0.0  ;;  %v1238_v35 = vmax.f32 %v1012_v27, 0.0 }
 0x133   :  { %v1172_v38 = vmax.f32 %v748_v30, 0.0  ;;  %v1236_v39 = vmax.f32 %v1004_v31, 0.0 }
 0x134   :  { %v2322_v40 = vpack.c.bf16 %v1174_v34, %v1173_v32  ;;  %v2482_v41 = vpack.c.bf16 %v1238_v35, %v1237_v33 }
 0x135   :  { %v2317_v42 = vpack.c.bf16 %v1172_v38, %v1171_v36  ;;  %v2477_v43 = vpack.c.bf16 %v1236_v39, %v1235_v37  ;;  %v2749_v44 = vpop.f32.mrb[32].mxu0  ;;  %v2813_v45 = vpop.f32.mrb[32].mxu1 }
 0x136   :  { %2578 = vst [vmem:[%s3495_s3 + $0x78] sm:$0xff] %v2322_v40   ;;  %2610 = vst [vmem:[%s3495_s3 + $0x178] sm:$0xff] %v2482_v41   ;;  %v769_v46 = vadd.f32 %v2749_v44, %v3170_v8  ;;  %v1025_v47 = vadd.f32 %v2813_v45, %v3170_v8  ;;  %v760_v48 = vpop.f32.mrb[33].mxu0  ;;  %v1016_v49 = vpop.f32.mrb[33].mxu1 }
 0x137   :  { %2577 = vst [vmem:[%s3495_s3 + $0x70] sm:$0xff] %v2317_v42   ;;  %2609 = vst [vmem:[%s3495_s3 + $0x170] sm:$0xff] %v2477_v43   ;;  %v761_v50 = vadd.f32 %v3170_v8, %v760_v48  ;;  %v1017_v51 = vadd.f32 %v3170_v8, %v1016_v49  ;;  %v2750_v52 = vpop.f32.mrb[34].mxu0  ;;  %v2814_v53 = vpop.f32.mrb[34].mxu1 }
 0x138   :  { %v772_v54 = vadd.f32 %v2750_v52, %v3170_v8  ;;  %v1028_v55 = vadd.f32 %v2814_v53, %v3170_v8  ;;  %v763_v56 = vpop.f32.mrb[35].mxu0  ;;  %v1019_v57 = vpop.f32.mrb[35].mxu1  ;;  %v1177_v60 = vmax.f32 %v769_v46, 0.0  ;;  %v1241_v61 = vmax.f32 %v1025_v47, 0.0 }
 0x139   :  { %v764_v58 = vadd.f32 %v3170_v8, %v763_v56  ;;  %v1020_v59 = vadd.f32 %v3170_v8, %v1019_v57  ;;  %v1175_v0 = vmax.f32 %v761_v50, 0.0  ;;  %v1239_v1 = vmax.f32 %v1017_v51, 0.0 }
 0x13a   :  { %v1178_v62 = vmax.f32 %v772_v54, 0.0  ;;  %v1242_v63 = vmax.f32 %v1028_v55, 0.0 }
 0x13b   :  { %v1176_v2 = vmax.f32 %v764_v58, 0.0  ;;  %v1240_v3 = vmax.f32 %v1020_v59, 0.0 }
 0x13c   :  { %v2332_v4 = vpack.c.bf16 %v1178_v62, %v1177_v60  ;;  %v2492_v5 = vpack.c.bf16 %v1242_v63, %v1241_v61 }
 0x13d   :  { %v2327_v6 = vpack.c.bf16 %v1176_v2, %v1175_v0  ;;  %v2487_v7 = vpack.c.bf16 %v1240_v3, %v1239_v1  ;;  %v2753_v9 = vpop.f32.mrb[36].mxu0  ;;  %v2817_v10 = vpop.f32.mrb[36].mxu1 }
 0x13e   :  { %2580 = vst [vmem:[%s3495_s3 + $0x88] sm:$0xff] %v2332_v4   ;;  %2612 = vst [vmem:[%s3495_s3 + $0x188] sm:$0xff] %v2492_v5   ;;  %v785_v11 = vadd.f32 %v2753_v9, %v3170_v8  ;;  %v1041_v12 = vadd.f32 %v2817_v10, %v3170_v8  ;;  %v776_v13 = vpop.f32.mrb[37].mxu0  ;;  %v1032_v14 = vpop.f32.mrb[37].mxu1 }
 0x13f   :  { %2579 = vst [vmem:[%s3495_s3 + $0x80] sm:$0xff] %v2327_v6   ;;  %2611 = vst [vmem:[%s3495_s3 + $0x180] sm:$0xff] %v2487_v7   ;;  %v777_v15 = vadd.f32 %v3170_v8, %v776_v13  ;;  %v1033_v16 = vadd.f32 %v3170_v8, %v1032_v14  ;;  %v2754_v17 = vpop.f32.mrb[38].mxu0  ;;  %v2818_v18 = vpop.f32.mrb[38].mxu1 }
 0x140   :  { %v788_v19 = vadd.f32 %v2754_v17, %v3170_v8  ;;  %v1044_v20 = vadd.f32 %v2818_v18, %v3170_v8  ;;  %v779_v21 = vpop.f32.mrb[39].mxu0  ;;  %v1035_v22 = vpop.f32.mrb[39].mxu1  ;;  %v1181_v25 = vmax.f32 %v785_v11, 0.0  ;;  %v1245_v26 = vmax.f32 %v1041_v12, 0.0 }
 0x141   :  { %v780_v23 = vadd.f32 %v3170_v8, %v779_v21  ;;  %v1036_v24 = vadd.f32 %v3170_v8, %v1035_v22  ;;  %v1179_v29 = vmax.f32 %v777_v15, 0.0  ;;  %v1243_v30 = vmax.f32 %v1033_v16, 0.0 }
 0x142   :  { %v1182_v27 = vmax.f32 %v788_v19, 0.0  ;;  %v1246_v28 = vmax.f32 %v1044_v20, 0.0 }
 0x143   :  { %v1180_v31 = vmax.f32 %v780_v23, 0.0  ;;  %v1244_v32 = vmax.f32 %v1036_v24, 0.0 }
 0x144   :  { %v2342_v33 = vpack.c.bf16 %v1182_v27, %v1181_v25  ;;  %v2502_v34 = vpack.c.bf16 %v1246_v28, %v1245_v26 }
 0x145   :  { %v2337_v35 = vpack.c.bf16 %v1180_v31, %v1179_v29  ;;  %v2497_v36 = vpack.c.bf16 %v1244_v32, %v1243_v30  ;;  %v2757_v37 = vpop.f32.mrb[40].mxu0  ;;  %v2821_v38 = vpop.f32.mrb[40].mxu1 }
 0x146   :  { %2582 = vst [vmem:[%s3495_s3 + $0x98] sm:$0xff] %v2342_v33   ;;  %2614 = vst [vmem:[%s3495_s3 + $0x198] sm:$0xff] %v2502_v34   ;;  %v801_v39 = vadd.f32 %v2757_v37, %v3170_v8  ;;  %v1057_v40 = vadd.f32 %v2821_v38, %v3170_v8  ;;  %v792_v41 = vpop.f32.mrb[41].mxu0  ;;  %v1048_v42 = vpop.f32.mrb[41].mxu1 }
 0x147   :  { %2581 = vst [vmem:[%s3495_s3 + $0x90] sm:$0xff] %v2337_v35   ;;  %2613 = vst [vmem:[%s3495_s3 + $0x190] sm:$0xff] %v2497_v36   ;;  %v793_v43 = vadd.f32 %v3170_v8, %v792_v41  ;;  %v1049_v44 = vadd.f32 %v3170_v8, %v1048_v42  ;;  %v2758_v45 = vpop.f32.mrb[42].mxu0  ;;  %v2822_v46 = vpop.f32.mrb[42].mxu1 }
 0x148   :  { %v804_v47 = vadd.f32 %v2758_v45, %v3170_v8  ;;  %v1060_v48 = vadd.f32 %v2822_v46, %v3170_v8  ;;  %v795_v49 = vpop.f32.mrb[43].mxu0  ;;  %v1051_v50 = vpop.f32.mrb[43].mxu1  ;;  %v1185_v53 = vmax.f32 %v801_v39, 0.0  ;;  %v1249_v54 = vmax.f32 %v1057_v40, 0.0 }
 0x149   :  { %v796_v51 = vadd.f32 %v3170_v8, %v795_v49  ;;  %v1052_v52 = vadd.f32 %v3170_v8, %v1051_v50  ;;  %v1183_v57 = vmax.f32 %v793_v43, 0.0  ;;  %v1247_v58 = vmax.f32 %v1049_v44, 0.0 }
 0x14a   :  { %v1186_v55 = vmax.f32 %v804_v47, 0.0  ;;  %v1250_v56 = vmax.f32 %v1060_v48, 0.0 }
 0x14b   :  { %v1184_v59 = vmax.f32 %v796_v51, 0.0  ;;  %v1248_v60 = vmax.f32 %v1052_v52, 0.0 }
 0x14c   :  { %v2352_v61 = vpack.c.bf16 %v1186_v55, %v1185_v53  ;;  %v2512_v62 = vpack.c.bf16 %v1250_v56, %v1249_v54 }
 0x14d   :  { %v2347_v63 = vpack.c.bf16 %v1184_v59, %v1183_v57  ;;  %v2507_v0 = vpack.c.bf16 %v1248_v60, %v1247_v58  ;;  %v2761_v1 = vpop.f32.mrb[44].mxu0  ;;  %v2825_v2 = vpop.f32.mrb[44].mxu1 }
 0x14e   :  { %2584 = vst [vmem:[%s3495_s3 + $0xa8] sm:$0xff] %v2352_v61   ;;  %2616 = vst [vmem:[%s3495_s3 + $0x1a8] sm:$0xff] %v2512_v62   ;;  %v817_v3 = vadd.f32 %v2761_v1, %v3170_v8  ;;  %v1073_v4 = vadd.f32 %v2825_v2, %v3170_v8  ;;  %v808_v5 = vpop.f32.mrb[45].mxu0  ;;  %v1064_v6 = vpop.f32.mrb[45].mxu1 }
 0x14f   :  { %2583 = vst [vmem:[%s3495_s3 + $0xa0] sm:$0xff] %v2347_v63   ;;  %2615 = vst [vmem:[%s3495_s3 + $0x1a0] sm:$0xff] %v2507_v0   ;;  %v809_v7 = vadd.f32 %v3170_v8, %v808_v5  ;;  %v1065_v9 = vadd.f32 %v3170_v8, %v1064_v6  ;;  %v2762_v10 = vpop.f32.mrb[46].mxu0  ;;  %v2826_v11 = vpop.f32.mrb[46].mxu1 }
 0x150   :  { %v820_v12 = vadd.f32 %v2762_v10, %v3170_v8  ;;  %v1076_v13 = vadd.f32 %v2826_v11, %v3170_v8  ;;  %v811_v14 = vpop.f32.mrb[47].mxu0  ;;  %v1067_v15 = vpop.f32.mrb[47].mxu1  ;;  %v1189_v18 = vmax.f32 %v817_v3, 0.0  ;;  %v1253_v19 = vmax.f32 %v1073_v4, 0.0 }
 0x151   :  { %v812_v16 = vadd.f32 %v3170_v8, %v811_v14  ;;  %v1068_v17 = vadd.f32 %v3170_v8, %v1067_v15  ;;  %v1187_v22 = vmax.f32 %v809_v7, 0.0  ;;  %v1251_v23 = vmax.f32 %v1065_v9, 0.0 }
 0x152   :  { %v1190_v20 = vmax.f32 %v820_v12, 0.0  ;;  %v1254_v21 = vmax.f32 %v1076_v13, 0.0 }
 0x153   :  { %v1188_v24 = vmax.f32 %v812_v16, 0.0  ;;  %v1252_v25 = vmax.f32 %v1068_v17, 0.0 }
 0x154   :  { %v2362_v26 = vpack.c.bf16 %v1190_v20, %v1189_v18  ;;  %v2522_v27 = vpack.c.bf16 %v1254_v21, %v1253_v19 }
 0x155   :  { %v2357_v28 = vpack.c.bf16 %v1188_v24, %v1187_v22  ;;  %v2517_v29 = vpack.c.bf16 %v1252_v25, %v1251_v23  ;;  %v2765_v30 = vpop.f32.mrb[48].mxu0  ;;  %v2829_v31 = vpop.f32.mrb[48].mxu1 }
 0x156   :  { %2586 = vst [vmem:[%s3495_s3 + $0xb8] sm:$0xff] %v2362_v26   ;;  %2618 = vst [vmem:[%s3495_s3 + $0x1b8] sm:$0xff] %v2522_v27   ;;  %v833_v32 = vadd.f32 %v2765_v30, %v3170_v8  ;;  %v1089_v33 = vadd.f32 %v2829_v31, %v3170_v8  ;;  %v824_v34 = vpop.f32.mrb[49].mxu0  ;;  %v1080_v35 = vpop.f32.mrb[49].mxu1 }
 0x157   :  { %2585 = vst [vmem:[%s3495_s3 + $0xb0] sm:$0xff] %v2357_v28   ;;  %2617 = vst [vmem:[%s3495_s3 + $0x1b0] sm:$0xff] %v2517_v29   ;;  %v825_v36 = vadd.f32 %v3170_v8, %v824_v34  ;;  %v1081_v37 = vadd.f32 %v3170_v8, %v1080_v35  ;;  %v2766_v38 = vpop.f32.mrb[50].mxu0  ;;  %v2830_v39 = vpop.f32.mrb[50].mxu1 }
 0x158   :  { %v836_v40 = vadd.f32 %v2766_v38, %v3170_v8  ;;  %v1092_v41 = vadd.f32 %v2830_v39, %v3170_v8  ;;  %v827_v42 = vpop.f32.mrb[51].mxu0  ;;  %v1083_v43 = vpop.f32.mrb[51].mxu1  ;;  %v1193_v46 = vmax.f32 %v833_v32, 0.0  ;;  %v1257_v47 = vmax.f32 %v1089_v33, 0.0 }
 0x159   :  { %v828_v44 = vadd.f32 %v3170_v8, %v827_v42  ;;  %v1084_v45 = vadd.f32 %v3170_v8, %v1083_v43  ;;  %v1191_v50 = vmax.f32 %v825_v36, 0.0  ;;  %v1255_v51 = vmax.f32 %v1081_v37, 0.0 }
 0x15a   :  { %v1194_v48 = vmax.f32 %v836_v40, 0.0  ;;  %v1258_v49 = vmax.f32 %v1092_v41, 0.0 }
 0x15b   :  { %v1192_v52 = vmax.f32 %v828_v44, 0.0  ;;  %v1256_v53 = vmax.f32 %v1084_v45, 0.0 }
 0x15c   :  { %v2372_v54 = vpack.c.bf16 %v1194_v48, %v1193_v46  ;;  %v2532_v55 = vpack.c.bf16 %v1258_v49, %v1257_v47 }
 0x15d   :  { %v2367_v56 = vpack.c.bf16 %v1192_v52, %v1191_v50  ;;  %v2527_v57 = vpack.c.bf16 %v1256_v53, %v1255_v51  ;;  %v2769_v58 = vpop.f32.mrb[52].mxu0  ;;  %v2833_v59 = vpop.f32.mrb[52].mxu1 }
 0x15e   :  { %2588 = vst [vmem:[%s3495_s3 + $0xc8] sm:$0xff] %v2372_v54   ;;  %2620 = vst [vmem:[%s3495_s3 + $0x1c8] sm:$0xff] %v2532_v55   ;;  %v849_v60 = vadd.f32 %v2769_v58, %v3170_v8  ;;  %v1105_v61 = vadd.f32 %v2833_v59, %v3170_v8  ;;  %v840_v62 = vpop.f32.mrb[53].mxu0  ;;  %v1096_v63 = vpop.f32.mrb[53].mxu1 }
 0x15f   :  { %2587 = vst [vmem:[%s3495_s3 + $0xc0] sm:$0xff] %v2367_v56   ;;  %2619 = vst [vmem:[%s3495_s3 + $0x1c0] sm:$0xff] %v2527_v57   ;;  %v841_v0 = vadd.f32 %v3170_v8, %v840_v62  ;;  %v1097_v1 = vadd.f32 %v3170_v8, %v1096_v63  ;;  %v2770_v2 = vpop.f32.mrb[54].mxu0  ;;  %v2834_v3 = vpop.f32.mrb[54].mxu1 }
 0x160   :  { %v852_v4 = vadd.f32 %v2770_v2, %v3170_v8  ;;  %v1108_v5 = vadd.f32 %v2834_v3, %v3170_v8  ;;  %v843_v6 = vpop.f32.mrb[55].mxu0  ;;  %v1099_v7 = vpop.f32.mrb[55].mxu1  ;;  %v1197_v11 = vmax.f32 %v849_v60, 0.0  ;;  %v1261_v12 = vmax.f32 %v1105_v61, 0.0 }
 0x161   :  { %v844_v9 = vadd.f32 %v3170_v8, %v843_v6  ;;  %v1100_v10 = vadd.f32 %v3170_v8, %v1099_v7  ;;  %v1195_v15 = vmax.f32 %v841_v0, 0.0  ;;  %v1259_v16 = vmax.f32 %v1097_v1, 0.0 }
 0x162   :  { %v1198_v13 = vmax.f32 %v852_v4, 0.0  ;;  %v1262_v14 = vmax.f32 %v1108_v5, 0.0 }
 0x163   :  { %v1196_v17 = vmax.f32 %v844_v9, 0.0  ;;  %v1260_v18 = vmax.f32 %v1100_v10, 0.0 }
 0x164   :  { %v2382_v19 = vpack.c.bf16 %v1198_v13, %v1197_v11  ;;  %v2542_v20 = vpack.c.bf16 %v1262_v14, %v1261_v12 }
 0x165   :  { %v2377_v21 = vpack.c.bf16 %v1196_v17, %v1195_v15  ;;  %v2537_v22 = vpack.c.bf16 %v1260_v18, %v1259_v16  ;;  %v2773_v23 = vpop.f32.mrb[56].mxu0  ;;  %v2837_v24 = vpop.f32.mrb[56].mxu1 }
 0x166   :  { %2590 = vst [vmem:[%s3495_s3 + $0xd8] sm:$0xff] %v2382_v19   ;;  %2622 = vst [vmem:[%s3495_s3 + $0x1d8] sm:$0xff] %v2542_v20   ;;  %v865_v25 = vadd.f32 %v2773_v23, %v3170_v8  ;;  %v1121_v26 = vadd.f32 %v2837_v24, %v3170_v8  ;;  %v856_v27 = vpop.f32.mrb[57].mxu0  ;;  %v1112_v28 = vpop.f32.mrb[57].mxu1 }
 0x167   :  { %2589 = vst [vmem:[%s3495_s3 + $0xd0] sm:$0xff] %v2377_v21   ;;  %2621 = vst [vmem:[%s3495_s3 + $0x1d0] sm:$0xff] %v2537_v22   ;;  %v857_v29 = vadd.f32 %v3170_v8, %v856_v27  ;;  %v1113_v30 = vadd.f32 %v3170_v8, %v1112_v28  ;;  %v2774_v31 = vpop.f32.mrb[58].mxu0  ;;  %v2838_v32 = vpop.f32.mrb[58].mxu1 }
 0x168   :  { %v868_v33 = vadd.f32 %v2774_v31, %v3170_v8  ;;  %v1124_v34 = vadd.f32 %v2838_v32, %v3170_v8  ;;  %v859_v35 = vpop.f32.mrb[59].mxu0  ;;  %v1115_v36 = vpop.f32.mrb[59].mxu1  ;;  %v1201_v39 = vmax.f32 %v865_v25, 0.0  ;;  %v1265_v40 = vmax.f32 %v1121_v26, 0.0 }
 0x169   :  { %v860_v37 = vadd.f32 %v3170_v8, %v859_v35  ;;  %v1116_v38 = vadd.f32 %v3170_v8, %v1115_v36  ;;  %v1199_v43 = vmax.f32 %v857_v29, 0.0  ;;  %v1263_v44 = vmax.f32 %v1113_v30, 0.0 }
 0x16a   :  { %v1202_v41 = vmax.f32 %v868_v33, 0.0  ;;  %v1266_v42 = vmax.f32 %v1124_v34, 0.0 }
 0x16b   :  { %v1200_v45 = vmax.f32 %v860_v37, 0.0  ;;  %v1264_v46 = vmax.f32 %v1116_v38, 0.0 }
 0x16c   :  { %v2392_v47 = vpack.c.bf16 %v1202_v41, %v1201_v39  ;;  %v2552_v48 = vpack.c.bf16 %v1266_v42, %v1265_v40 }
 0x16d   :  { %v2387_v49 = vpack.c.bf16 %v1200_v45, %v1199_v43  ;;  %v2547_v50 = vpack.c.bf16 %v1264_v46, %v1263_v44  ;;  %v2777_v51 = vpop.f32.mrb[60].mxu0  ;;  %v2841_v52 = vpop.f32.mrb[60].mxu1 }
 0x16e   :  { %2592 = vst [vmem:[%s3495_s3 + $0xe8] sm:$0xff] %v2392_v47   ;;  %2624 = vst [vmem:[%s3495_s3 + $0x1e8] sm:$0xff] %v2552_v48   ;;  %v881_v53 = vadd.f32 %v2777_v51, %v3170_v8  ;;  %v1137_v54 = vadd.f32 %v2841_v52, %v3170_v8  ;;  %v872_v55 = vpop.f32.mrb[61].mxu0  ;;  %v1128_v56 = vpop.f32.mrb[61].mxu1 }
 0x16f   :  { %2591 = vst [vmem:[%s3495_s3 + $0xe0] sm:$0xff] %v2387_v49   ;;  %2623 = vst [vmem:[%s3495_s3 + $0x1e0] sm:$0xff] %v2547_v50   ;;  %v873_v57 = vadd.f32 %v3170_v8, %v872_v55  ;;  %v1129_v58 = vadd.f32 %v3170_v8, %v1128_v56  ;;  %v2778_v59 = vpop.f32.mrb[62].mxu0  ;;  %v2842_v60 = vpop.f32.mrb[62].mxu1 }
 0x170   :  { %v884_v61 = vadd.f32 %v2778_v59, %v3170_v8  ;;  %v1140_v62 = vadd.f32 %v2842_v60, %v3170_v8  ;;  %v875_v63 = vpop.f32.mrb[63].mxu0  ;;  %v1131_v0 = vpop.f32.mrb[63].mxu1  ;;  %v1205_v3 = vmax.f32 %v881_v53, 0.0  ;;  %v1269_v4 = vmax.f32 %v1137_v54, 0.0 }
 0x171   :  { %v876_v1 = vadd.f32 %v3170_v8, %v875_v63  ;;  %v1132_v2 = vadd.f32 %v3170_v8, %v1131_v0  ;;  %v1203_v7 = vmax.f32 %v873_v57, 0.0  ;;  %v1267_v9 = vmax.f32 %v1129_v58, 0.0 }
 0x172   :  { %v1206_v5 = vmax.f32 %v884_v61, 0.0  ;;  %v1270_v6 = vmax.f32 %v1140_v62, 0.0 }
 0x173   :  { %v1204_v10 = vmax.f32 %v876_v1, 0.0  ;;  %v1268_v11 = vmax.f32 %v1132_v2, 0.0 }
 0x174   :  { %v2402_v12 = vpack.c.bf16 %v1206_v5, %v1205_v3  ;;  %v2562_v13 = vpack.c.bf16 %v1270_v6, %v1269_v4 }
 0x175   :  { %v2397_v14 = vpack.c.bf16 %v1204_v10, %v1203_v7  ;;  %v2557_v15 = vpack.c.bf16 %v1268_v11, %v1267_v9 }
 0x176   :  { %2594 = vst [vmem:[%s3495_s3 + $0xf8] sm:$0xff] %v2402_v12   ;;  %2626 = vst [vmem:[%s3495_s3 + $0x1f8] sm:$0xff] %v2562_v13  }
 0x177   :  { %2593 = vst [vmem:[%s3495_s3 + $0xf0] sm:$0xff] %v2397_v14   ;;  %2625 = vst [vmem:[%s3495_s3 + $0x1f0] sm:$0xff] %v2557_v15  }

// kernel: frames_convolution3d_forward.5
= control target key start
LH: loop header
LB: loop body
LE: loop exit
PB: predicated region body
PF: predicated region fallthrough
CT: control target
= control target key end

     0   :  { %s1373_s1 = inlined_call_operand.vmem [shape: bf16[512,128], index: 1, kind: input, shape index: {}]   ;;  %s1374_s0 = inlined_call_operand.vmem [shape: bf16[128,512], index: 0, kind: input, shape index: {}]   ;;  %s1375_s2 = inlined_call_operand.vmem [shape: f32[1,128], index: 2, kind: input, shape index: {}]   ;;  %s1376_s3 = inlined_call_operand.vmem [shape: bf16[128,128], index: 3, kind: output, shape index: {}]  }
   0x1   :  { %v1036_v0 = vld [vmem:[%s1373_s1 + $0x40] sm:$0xff]   ;;  %v1040_v4 = vld [vmem:[%s1373_s1 + $0x48] sm:$0xff]   ;;  %v1044_v8 = vld [vmem:[%s1373_s1 + $0x50] sm:$0xff]  }
   0x2   :  { %v1037_v1 = vld [vmem:[%s1373_s1 + $0xc0] sm:$0xff]   ;;  %908 = vmatprep.subr.bf16.mxu0 %v1036_v0  ;;  %v1041_v5 = vld [vmem:[%s1373_s1 + $0xc8] sm:$0xff]   ;;  %v1045_v9 = vld [vmem:[%s1373_s1 + $0xd0] sm:$0xff]  }
   0x3   :  { %v1038_v2 = vld [vmem:[%s1373_s1] sm:$0xff]   ;;  %972 = vmatprep.subr.bf16.mxu1 %v1037_v1  ;;  %v1042_v6 = vld [vmem:[%s1373_s1 + $0x8] sm:$0xff]   ;;  %v1046_v10 = vld [vmem:[%s1373_s1 + $0x10] sm:$0xff]  }
   0x4   :  { %v1039_v3 = vld [vmem:[%s1373_s1 + $0x80] sm:$0xff]   ;;  %909 = vmatpush3.bf16.msra.mxu0 %v1038_v2  ;;  %v1043_v7 = vld [vmem:[%s1373_s1 + $0x88] sm:$0xff]   ;;  %v1047_v11 = vld [vmem:[%s1373_s1 + $0x90] sm:$0xff]  }
   0x5   :  { %973 = vmatpush3.bf16.msra.mxu1 %v1039_v3  ;;  %910 = vmatprep.subr.bf16.mxu0 %v1040_v4  ;;  %v1048_v12 = vld [vmem:[%s1373_s1 + $0x58] sm:$0xff]   ;;  %v1052_v16 = vld [vmem:[%s1373_s1 + $0x60] sm:$0xff]   ;;  %v1056_v20 = vld [vmem:[%s1373_s1 + $0x68] sm:$0xff]  }
   0x6   :  { %974 = vmatprep.subr.bf16.mxu1 %v1041_v5  ;;  %v1049_v13 = vld [vmem:[%s1373_s1 + $0xd8] sm:$0xff]   ;;  %v1053_v17 = vld [vmem:[%s1373_s1 + $0xe0] sm:$0xff]   ;;  %v1057_v21 = vld [vmem:[%s1373_s1 + $0xe8] sm:$0xff]  }
   0x7   :  { %v1050_v14 = vld [vmem:[%s1373_s1 + $0x18] sm:$0xff]   ;;  %v1054_v18 = vld [vmem:[%s1373_s1 + $0x20] sm:$0xff]   ;;  %v1058_v22 = vld [vmem:[%s1373_s1 + $0x28] sm:$0xff]  }
   0x8   :  { %911 = vmatpush3.bf16.msra.mxu0 %v1042_v6  ;;  %v1051_v15 = vld [vmem:[%s1373_s1 + $0x98] sm:$0xff]   ;;  %v1055_v19 = vld [vmem:[%s1373_s1 + $0xa0] sm:$0xff]   ;;  %v1059_v23 = vld [vmem:[%s1373_s1 + $0xa8] sm:$0xff]  }
   0x9   :  { %975 = vmatpush3.bf16.msra.mxu1 %v1043_v7  ;;  %912 = vmatprep.subr.bf16.mxu0 %v1044_v8  ;;  %v1060_v24 = vld [vmem:[%s1373_s1 + $0x70] sm:$0xff]   ;;  %v1064_v28 = vld [vmem:[%s1373_s1 + $0x78] sm:$0xff]   ;;  %v1331_v2 = vld [vmem:[%s1375_s2] ss:$0 sm:$0xff] }
   0xa   :  { %976 = vmatprep.subr.bf16.mxu1 %v1045_v9  ;;  %v1061_v25 = vld [vmem:[%s1373_s1 + $0xf0] sm:$0xff]   ;;  %v1065_v29 = vld [vmem:[%s1373_s1 + $0xf8] sm:$0xff]  }
   0xb   :  { %v1062_v26 = vld [vmem:[%s1373_s1 + $0x30] sm:$0xff]   ;;  %v1066_v30 = vld [vmem:[%s1373_s1 + $0x38] sm:$0xff]  }
   0xc   :  { %913 = vmatpush3.bf16.msra.mxu0 %v1046_v10  ;;  %v1063_v27 = vld [vmem:[%s1373_s1 + $0xb0] sm:$0xff]   ;;  %v1067_v31 = vld [vmem:[%s1373_s1 + $0xb8] sm:$0xff]  }
   0xd   :  { %977 = vmatpush3.bf16.msra.mxu1 %v1047_v11  ;;  %914 = vmatprep.subr.bf16.mxu0 %v1048_v12  ;;  %v1068_v32 = vld [vmem:[%s1374_s0] ss:$16 sps:$4 sm:$0xff]   ;;  %v1070_v33 = vld [vmem:[%s1374_s0 + $0x4] ss:$16 sps:$4 sm:$0xff]   ;;  %v1071_v34 = vld [vmem:[%s1374_s0 + $0x8] ss:$16 sps:$4 sm:$0xff]  }
   0xe   :  { %978 = vmatprep.subr.bf16.mxu1 %v1049_v13  ;;  %v1073_v35 = vld [vmem:[%s1374_s0 + $0xc] ss:$16 sps:$4 sm:$0xff]   ;;  %502 = vmatprep.mubr.bf16.mxu0 %v1070_v33  ;;  %v1074_v36 = vld [vmem:[%s1374_s0 + $0x24] ss:$16 sps:$4 sm:$0xff]   ;;  %v1078_v38 = vld [vmem:[%s1374_s0 + $0x20] ss:$16 sps:$4 sm:$0xff]  }
   0xf   :  { %599 = vmatprep.mubr.bf16.mxu1 %v1073_v35  ;;  %v1076_v37 = vld [vmem:[%s1374_s0 + $0x2c] ss:$16 sps:$4 sm:$0xff]   ;;  %v1079_v39 = vld [vmem:[%s1374_s0 + $0x28] ss:$16 sps:$4 sm:$0xff]   ;;  %v1080_v40 = vld [vmem:[%s1374_s0 + $0x44] ss:$16 sps:$4 sm:$0xff]  }
  0x10   :  { %915 = vmatpush3.bf16.msra.mxu0 %v1050_v14  ;;  %v1082_v41 = vld [vmem:[%s1374_s0 + $0x4c] ss:$16 sps:$4 sm:$0xff]   ;;  %v1084_v42 = vld [vmem:[%s1374_s0 + $0x40] ss:$16 sps:$4 sm:$0xff]   ;;  %v1085_v43 = vld [vmem:[%s1374_s0 + $0x48] ss:$16 sps:$4 sm:$0xff]  }
  0x11   :  { %979 = vmatpush3.bf16.msra.mxu1 %v1051_v15  ;;  %916 = vmatprep.subr.bf16.mxu0 %v1052_v16  ;;  %v1086_v44 = vld [vmem:[%s1374_s0 + $0x64] ss:$16 sps:$4 sm:$0xff]   ;;  %v1088_v45 = vld [vmem:[%s1374_s0 + $0x6c] ss:$16 sps:$4 sm:$0xff]   ;;  %v1090_v46 = vld [vmem:[%s1374_s0 + $0x60] ss:$16 sps:$4 sm:$0xff]  }
  0x12   :  { %980 = vmatprep.subr.bf16.mxu1 %v1053_v17  ;;  %v1091_v47 = vld [vmem:[%s1374_s0 + $0x68] ss:$16 sps:$4 sm:$0xff]   ;;  %v1092_v48 = vld [vmem:[%s1374_s0 + $0x84] ss:$16 sps:$4 sm:$0xff]   ;;  %v1094_v49 = vld [vmem:[%s1374_s0 + $0x8c] ss:$16 sps:$4 sm:$0xff]  }
  0x13   :  { %v1096_v50 = vld [vmem:[%s1374_s0 + $0x80] ss:$16 sps:$4 sm:$0xff]   ;;  %v1097_v51 = vld [vmem:[%s1374_s0 + $0x88] ss:$16 sps:$4 sm:$0xff]   ;;  %v1098_v52 = vld [vmem:[%s1374_s0 + $0xa4] ss:$16 sps:$4 sm:$0xff]  }
  0x14   :  { %917 = vmatpush3.bf16.msra.mxu0 %v1054_v18  ;;  %v1100_v53 = vld [vmem:[%s1374_s0 + $0xac] ss:$16 sps:$4 sm:$0xff]   ;;  %v1102_v54 = vld [vmem:[%s1374_s0 + $0xa0] ss:$16 sps:$4 sm:$0xff]   ;;  %v1103_v55 = vld [vmem:[%s1374_s0 + $0xa8] ss:$16 sps:$4 sm:$0xff]  }
  0x15   :  { %981 = vmatpush3.bf16.msra.mxu1 %v1055_v19  ;;  %918 = vmatprep.subr.bf16.mxu0 %v1056_v20  ;;  %v1104_v56 = vld [vmem:[%s1374_s0 + $0xc4] ss:$16 sps:$4 sm:$0xff]   ;;  %v1106_v57 = vld [vmem:[%s1374_s0 + $0xcc] ss:$16 sps:$4 sm:$0xff]   ;;  %v1108_v58 = vld [vmem:[%s1374_s0 + $0xc0] ss:$16 sps:$4 sm:$0xff]  }
  0x16   :  { %982 = vmatprep.subr.bf16.mxu1 %v1057_v21  ;;  %v1109_v59 = vld [vmem:[%s1374_s0 + $0xc8] ss:$16 sps:$4 sm:$0xff]   ;;  %v1110_v60 = vld [vmem:[%s1374_s0 + $0xe4] ss:$16 sps:$4 sm:$0xff]   ;;  %v1112_v61 = vld [vmem:[%s1374_s0 + $0xec] ss:$16 sps:$4 sm:$0xff]  }
  0x17   :  { %v1114_v62 = vld [vmem:[%s1374_s0 + $0xe0] ss:$16 sps:$4 sm:$0xff]   ;;  %v1115_v63 = vld [vmem:[%s1374_s0 + $0xe8] ss:$16 sps:$4 sm:$0xff]  }
  0x18   :  { %919 = vmatpush3.bf16.msra.mxu0 %v1058_v22 }
  0x19   :  { %983 = vmatpush3.bf16.msra.mxu1 %v1059_v23  ;;  %920 = vmatprep.subr.bf16.mxu0 %v1060_v24 }
  0x1a   :  { %984 = vmatprep.subr.bf16.mxu1 %v1061_v25 }
  0x1c   :  { %921 = vmatpush3.bf16.msra.mxu0 %v1062_v26 }
  0x1d   :  { %985 = vmatpush3.bf16.msra.mxu1 %v1063_v27  ;;  %922 = vmatprep.subr.bf16.mxu0 %v1064_v28 }
  0x1e   :  { %986 = vmatprep.subr.bf16.mxu1 %v1065_v29 }
  0x20   :  { %923 = vmatpush3.bf16.msra.mxu0 %v1066_v30 }
  0x21   :  { %987 = vmatpush3.bf16.msra.mxu1 %v1067_v31 }
  0x23   :  { %503 = vmatmul.mubr.bf16.vlgmr.msra.gmra.mrb[0].mxu0 %v1068_v32 }
  0x24   :  { %600 = vmatmul.mubr.bf16.vlgmr.msra.gmra.mrb[0].mxu1 %v1071_v34  ;;  %510 = vmatprep.mubr.bf16.mxu0 %v1074_v36 }
  0x25   :  { %607 = vmatprep.mubr.bf16.mxu1 %v1076_v37 }
  0x2b   :  { %511 = vmatmul.mubr.bf16.gmra.mrb[4].mxu0 %v1078_v38 }
  0x2c   :  { %608 = vmatmul.mubr.bf16.gmra.mrb[4].mxu1 %v1079_v39  ;;  %518 = vmatprep.mubr.bf16.mxu0 %v1080_v40 }
  0x2d   :  { %615 = vmatprep.mubr.bf16.mxu1 %v1082_v41 }
  0x33   :  { %519 = vmatmul.mubr.bf16.gmra.mrb[8].mxu0 %v1084_v42 }
  0x34   :  { %616 = vmatmul.mubr.bf16.gmra.mrb[8].mxu1 %v1085_v43  ;;  %526 = vmatprep.mubr.bf16.mxu0 %v1086_v44 }
  0x35   :  { %623 = vmatprep.mubr.bf16.mxu1 %v1088_v45 }
  0x3b   :  { %527 = vmatmul.mubr.bf16.gmra.mrb[12].mxu0 %v1090_v46 }
  0x3c   :  { %624 = vmatmul.mubr.bf16.gmra.mrb[12].mxu1 %v1091_v47  ;;  %534 = vmatprep.mubr.bf16.mxu0 %v1092_v48 }
  0x3d   :  { %631 = vmatprep.mubr.bf16.mxu1 %v1094_v49 }
  0x43   :  { %535 = vmatmul.mubr.bf16.gmra.mrb[16].mxu0 %v1096_v50 }
  0x44   :  { %632 = vmatmul.mubr.bf16.gmra.mrb[16].mxu1 %v1097_v51  ;;  %542 = vmatprep.mubr.bf16.mxu0 %v1098_v52 }
  0x45   :  { %639 = vmatprep.mubr.bf16.mxu1 %v1100_v53 }
  0x4b   :  { %543 = vmatmul.mubr.bf16.gmra.mrb[20].mxu0 %v1102_v54 }
  0x4c   :  { %640 = vmatmul.mubr.bf16.gmra.mrb[20].mxu1 %v1103_v55  ;;  %550 = vmatprep.mubr.bf16.mxu0 %v1104_v56 }
  0x4d   :  { %647 = vmatprep.mubr.bf16.mxu1 %v1106_v57 }
  0x53   :  { %551 = vmatmul.mubr.bf16.gmra.mrb[24].mxu0 %v1108_v58 }
  0x54   :  { %648 = vmatmul.mubr.bf16.gmra.mrb[24].mxu1 %v1109_v59  ;;  %558 = vmatprep.mubr.bf16.mxu0 %v1110_v60 }
  0x55   :  { %655 = vmatprep.mubr.bf16.mxu1 %v1112_v61 }
  0x5b   :  { %559 = vmatmul.mubr.bf16.gmra.mrb[28].mxu0 %v1114_v62 }
  0x5c   :  { %656 = vmatmul.mubr.bf16.gmra.mrb[28].mxu1 %v1115_v63 }
  0xf6   :  { %v924_v0 = vpop.f32.mrb[0].mxu0 }
  0xf7   :  { %v988_v1 = vpop.f32.mrb[0].mxu1  ;;  %v925_v3 = vpop.f32.mrb[1].mxu0 }
  0xf8   :  { %v926_v4 = vadd.f32 %v925_v3, %v924_v0  ;;  %v989_v5 = vpop.f32.mrb[1].mxu1  ;;  %v927_v6 = vpop.f32.mrb[2].mxu0 }
  0xf9   :  { %v990_v7 = vadd.f32 %v989_v5, %v988_v1  ;;  %v991_v8 = vpop.f32.mrb[2].mxu1  ;;  %v928_v9 = vpop.f32.mrb[3].mxu0 }
  0xfa   :  { %v505_v10 = vadd.f32 %v926_v4, %v1331_v2  ;;  %v929_v11 = vadd.f32 %v928_v9, %v927_v6  ;;  %v992_v12 = vpop.f32.mrb[3].mxu1 }
  0xfb   :  { %v993_v13 = vadd.f32 %v992_v12, %v991_v8 }
  0xfc   :  { %v602_v14 = vadd.f32 %v990_v7, %v505_v10  ;;  %v508_v15 = vadd.f32 %v929_v11, %v1331_v2 }
  0xfe   :  { %v605_v16 = vadd.f32 %v993_v13, %v508_v15  ;;  %v930_v17 = vpop.f32.mrb[4].mxu0  ;;  %v664_v20 = vmax.f32 %v602_v14, 0.0 }
  0xff   :  { %v994_v18 = vpop.f32.mrb[4].mxu1  ;;  %v931_v19 = vpop.f32.mrb[5].mxu0 }
 0x100   :  { %v665_v21 = vmax.f32 %v605_v16, 0.0  ;;  %v932_v22 = vadd.f32 %v931_v19, %v930_v17  ;;  %v995_v23 = vpop.f32.mrb[5].mxu1  ;;  %v933_v24 = vpop.f32.mrb[6].mxu0 }
 0x101   :  { %v996_v25 = vadd.f32 %v995_v23, %v994_v18  ;;  %v997_v26 = vpop.f32.mrb[6].mxu1  ;;  %v934_v27 = vpop.f32.mrb[7].mxu0 }
 0x102   :  { %v864_v28 = vpack.c.bf16 %v665_v21, %v664_v20  ;;  %v513_v29 = vadd.f32 %v932_v22, %v1331_v2  ;;  %v935_v30 = vadd.f32 %v934_v27, %v933_v24  ;;  %v998_v31 = vpop.f32.mrb[7].mxu1 }
 0x103   :  { %v999_v32 = vadd.f32 %v998_v31, %v997_v26 }
 0x104   :  { %865 = vst [vmem:[%s1376_s3] sm:$0xff] %v864_v28   ;;  %v610_v33 = vadd.f32 %v996_v25, %v513_v29  ;;  %v516_v34 = vadd.f32 %v935_v30, %v1331_v2 }
 0x106   :  { %v613_v35 = vadd.f32 %v999_v32, %v516_v34  ;;  %v936_v36 = vpop.f32.mrb[8].mxu0  ;;  %v666_v39 = vmax.f32 %v610_v33, 0.0 }
 0x107   :  { %v1000_v37 = vpop.f32.mrb[8].mxu1  ;;  %v937_v38 = vpop.f32.mrb[9].mxu0 }
 0x108   :  { %v667_v40 = vmax.f32 %v613_v35, 0.0  ;;  %v938_v41 = vadd.f32 %v937_v38, %v936_v36  ;;  %v1001_v42 = vpop.f32.mrb[9].mxu1  ;;  %v939_v43 = vpop.f32.mrb[10].mxu0 }
 0x109   :  { %v1002_v44 = vadd.f32 %v1001_v42, %v1000_v37  ;;  %v1003_v45 = vpop.f32.mrb[10].mxu1  ;;  %v940_v46 = vpop.f32.mrb[11].mxu0 }
 0x10a   :  { %v869_v47 = vpack.c.bf16 %v667_v40, %v666_v39  ;;  %v521_v48 = vadd.f32 %v938_v41, %v1331_v2  ;;  %v941_v49 = vadd.f32 %v940_v46, %v939_v43  ;;  %v1004_v50 = vpop.f32.mrb[11].mxu1 }
 0x10b   :  { %v1005_v51 = vadd.f32 %v1004_v50, %v1003_v45 }
 0x10c   :  { %901 = vst [vmem:[%s1376_s3 + $0x8] sm:$0xff] %v869_v47   ;;  %v618_v52 = vadd.f32 %v1002_v44, %v521_v48  ;;  %v524_v53 = vadd.f32 %v941_v49, %v1331_v2 }
 0x10e   :  { %v621_v54 = vadd.f32 %v1005_v51, %v524_v53  ;;  %v942_v55 = vpop.f32.mrb[12].mxu0  ;;  %v668_v58 = vmax.f32 %v618_v52, 0.0 }
 0x10f   :  { %v1006_v56 = vpop.f32.mrb[12].mxu1  ;;  %v943_v57 = vpop.f32.mrb[13].mxu0 }
 0x110   :  { %v669_v59 = vmax.f32 %v621_v54, 0.0  ;;  %v944_v60 = vadd.f32 %v943_v57, %v942_v55  ;;  %v1007_v61 = vpop.f32.mrb[13].mxu1  ;;  %v945_v62 = vpop.f32.mrb[14].mxu0 }
 0x111   :  { %v1008_v63 = vadd.f32 %v1007_v61, %v1006_v56  ;;  %v1009_v0 = vpop.f32.mrb[14].mxu1  ;;  %v946_v1 = vpop.f32.mrb[15].mxu0 }
 0x112   :  { %v874_v3 = vpack.c.bf16 %v669_v59, %v668_v58  ;;  %v529_v4 = vadd.f32 %v944_v60, %v1331_v2  ;;  %v947_v5 = vadd.f32 %v946_v1, %v945_v62  ;;  %v1010_v6 = vpop.f32.mrb[15].mxu1 }
 0x113   :  { %v1011_v7 = vadd.f32 %v1010_v6, %v1009_v0 }
 0x114   :  { %902 = vst [vmem:[%s1376_s3 + $0x10] sm:$0xff] %v874_v3   ;;  %v626_v8 = vadd.f32 %v1008_v63, %v529_v4  ;;  %v532_v9 = vadd.f32 %v947_v5, %v1331_v2 }
 0x116   :  { %v629_v10 = vadd.f32 %v1011_v7, %v532_v9  ;;  %v948_v11 = vpop.f32.mrb[16].mxu0  ;;  %v670_v14 = vmax.f32 %v626_v8, 0.0 }
 0x117   :  { %v1012_v12 = vpop.f32.mrb[16].mxu1  ;;  %v949_v13 = vpop.f32.mrb[17].mxu0 }
 0x118   :  { %v671_v15 = vmax.f32 %v629_v10, 0.0  ;;  %v950_v16 = vadd.f32 %v949_v13, %v948_v11  ;;  %v1013_v17 = vpop.f32.mrb[17].mxu1  ;;  %v951_v18 = vpop.f32.mrb[18].mxu0 }
 0x119   :  { %v1014_v19 = vadd.f32 %v1013_v17, %v1012_v12  ;;  %v1015_v20 = vpop.f32.mrb[18].mxu1  ;;  %v952_v21 = vpop.f32.mrb[19].mxu0 }
 0x11a   :  { %v879_v22 = vpack.c.bf16 %v671_v15, %v670_v14  ;;  %v537_v23 = vadd.f32 %v950_v16, %v1331_v2  ;;  %v953_v24 = vadd.f32 %v952_v21, %v951_v18  ;;  %v1016_v25 = vpop.f32.mrb[19].mxu1 }
 0x11b   :  { %v1017_v26 = vadd.f32 %v1016_v25, %v1015_v20 }
 0x11c   :  { %903 = vst [vmem:[%s1376_s3 + $0x18] sm:$0xff] %v879_v22   ;;  %v634_v27 = vadd.f32 %v1014_v19, %v537_v23  ;;  %v540_v28 = vadd.f32 %v953_v24, %v1331_v2 }
 0x11e   :  { %v637_v29 = vadd.f32 %v1017_v26, %v540_v28  ;;  %v954_v30 = vpop.f32.mrb[20].mxu0  ;;  %v672_v33 = vmax.f32 %v634_v27, 0.0 }
 0x11f   :  { %v1018_v31 = vpop.f32.mrb[20].mxu1  ;;  %v955_v32 = vpop.f32.mrb[21].mxu0 }
 0x120   :  { %v673_v34 = vmax.f32 %v637_v29, 0.0  ;;  %v956_v35 = vadd.f32 %v955_v32, %v954_v30  ;;  %v1019_v36 = vpop.f32.mrb[21].mxu1  ;;  %v957_v37 = vpop.f32.mrb[22].mxu0 }
 0x121   :  { %v1020_v38 = vadd.f32 %v1019_v36, %v1018_v31  ;;  %v1021_v39 = vpop.f32.mrb[22].mxu1  ;;  %v958_v40 = vpop.f32.mrb[23].mxu0 }
 0x122   :  { %v884_v41 = vpack.c.bf16 %v673_v34, %v672_v33  ;;  %v545_v42 = vadd.f32 %v956_v35, %v1331_v2  ;;  %v959_v43 = vadd.f32 %v958_v40, %v957_v37  ;;  %v1022_v44 = vpop.f32.mrb[23].mxu1 }
 0x123   :  { %v1023_v45 = vadd.f32 %v1022_v44, %v1021_v39 }
 0x124   :  { %904 = vst [vmem:[%s1376_s3 + $0x20] sm:$0xff] %v884_v41   ;;  %v642_v46 = vadd.f32 %v1020_v38, %v545_v42  ;;  %v548_v47 = vadd.f32 %v959_v43, %v1331_v2 }
 0x126   :  { %v645_v48 = vadd.f32 %v1023_v45, %v548_v47  ;;  %v960_v49 = vpop.f32.mrb[24].mxu0  ;;  %v674_v52 = vmax.f32 %v642_v46, 0.0 }
 0x127   :  { %v1024_v50 = vpop.f32.mrb[24].mxu1  ;;  %v961_v51 = vpop.f32.mrb[25].mxu0 }
 0x128   :  { %v675_v53 = vmax.f32 %v645_v48, 0.0  ;;  %v962_v54 = vadd.f32 %v961_v51, %v960_v49  ;;  %v1025_v55 = vpop.f32.mrb[25].mxu1  ;;  %v963_v56 = vpop.f32.mrb[26].mxu0 }
 0x129   :  { %v1026_v57 = vadd.f32 %v1025_v55, %v1024_v50  ;;  %v1027_v58 = vpop.f32.mrb[26].mxu1  ;;  %v964_v59 = vpop.f32.mrb[27].mxu0 }
 0x12a   :  { %v889_v60 = vpack.c.bf16 %v675_v53, %v674_v52  ;;  %v553_v61 = vadd.f32 %v962_v54, %v1331_v2  ;;  %v965_v62 = vadd.f32 %v964_v59, %v963_v56  ;;  %v1028_v63 = vpop.f32.mrb[27].mxu1 }
 0x12b   :  { %v1029_v0 = vadd.f32 %v1028_v63, %v1027_v58 }
 0x12c   :  { %905 = vst [vmem:[%s1376_s3 + $0x28] sm:$0xff] %v889_v60   ;;  %v650_v1 = vadd.f32 %v1026_v57, %v553_v61  ;;  %v556_v3 = vadd.f32 %v965_v62, %v1331_v2 }
 0x12e   :  { %v653_v4 = vadd.f32 %v1029_v0, %v556_v3  ;;  %v966_v5 = vpop.f32.mrb[28].mxu0  ;;  %v676_v8 = vmax.f32 %v650_v1, 0.0 }
 0x12f   :  { %v1030_v6 = vpop.f32.mrb[28].mxu1  ;;  %v967_v7 = vpop.f32.mrb[29].mxu0 }
 0x130   :  { %v677_v9 = vmax.f32 %v653_v4, 0.0  ;;  %v968_v10 = vadd.f32 %v967_v7, %v966_v5  ;;  %v1031_v11 = vpop.f32.mrb[29].mxu1  ;;  %v969_v12 = vpop.f32.mrb[30].mxu0 }
 0x131   :  { %v1032_v13 = vadd.f32 %v1031_v11, %v1030_v6  ;;  %v1033_v14 = vpop.f32.mrb[30].mxu1  ;;  %v970_v15 = vpop.f32.mrb[31].mxu0 }
 0x132   :  { %v894_v16 = vpack.c.bf16 %v677_v9, %v676_v8  ;;  %v561_v17 = vadd.f32 %v968_v10, %v1331_v2  ;;  %v971_v18 = vadd.f32 %v970_v15, %v969_v12  ;;  %v1034_v19 = vpop.f32.mrb[31].mxu1 }
 0x133   :  { %v1035_v20 = vadd.f32 %v1034_v19, %v1033_v14 }
 0x134   :  { %906 = vst [vmem:[%s1376_s3 + $0x30] sm:$0xff] %v894_v16   ;;  %v658_v21 = vadd.f32 %v1032_v13, %v561_v17  ;;  %v564_v22 = vadd.f32 %v971_v18, %v1331_v2 }
 0x136   :  { %v661_v23 = vadd.f32 %v1035_v20, %v564_v22  ;;  %v678_v24 = vmax.f32 %v658_v21, 0.0 }
 0x138   :  { %v679_v25 = vmax.f32 %v661_v23, 0.0 }
 0x13a   :  { %v899_v26 = vpack.c.bf16 %v679_v25, %v678_v24 }
 0x13c   :  { %907 = vst [vmem:[%s1376_s3 + $0x38] sm:$0xff] %v899_v26  }

// kernel: frames_convolution3d_forward.6
= control target key start
LH: loop header
LB: loop body
LE: loop exit
PB: predicated region body
PF: predicated region fallthrough
CT: control target
= control target key end

     0   :  { %s2330_s1 = inlined_call_operand.vmem [shape: bf16[896,128], index: 1, kind: input, shape index: {}]   ;;  %s2331_s0 = inlined_call_operand.vmem [shape: bf16[128,896], index: 0, kind: input, shape index: {}]   ;;  %s2332_s2 = inlined_call_operand.vmem [shape: f32[1,128], index: 2, kind: input, shape index: {}]   ;;  %s2333_s3 = inlined_call_operand.vmem [shape: bf16[128,128], index: 3, kind: output, shape index: {}]  }
   0x1   :  { %v1742_v0 = vld [vmem:[%s2330_s1 + $0x40] sm:$0xff]   ;;  %v1746_v4 = vld [vmem:[%s2330_s1 + $0x48] sm:$0xff]   ;;  %v1750_v8 = vld [vmem:[%s2330_s1 + $0x50] sm:$0xff]  }
   0x2   :  { %v1743_v1 = vld [vmem:[%s2330_s1] sm:$0xff]   ;;  %1502 = vmatprep.subr.bf16.mxu0 %v1742_v0  ;;  %v1747_v5 = vld [vmem:[%s2330_s1 + $0x8] sm:$0xff]   ;;  %v1751_v9 = vld [vmem:[%s2330_s1 + $0x10] sm:$0xff]  }
   0x3   :  { %v1744_v2 = vld [vmem:[%s2330_s1 + $0xc0] sm:$0xff]   ;;  %1503 = vmatpush3.bf16.msra.mxu0 %v1743_v1  ;;  %v1748_v6 = vld [vmem:[%s2330_s1 + $0xc8] sm:$0xff]   ;;  %v1752_v10 = vld [vmem:[%s2330_s1 + $0xd0] sm:$0xff]  }
   0x4   :  { %v1745_v3 = vld [vmem:[%s2330_s1 + $0x80] sm:$0xff]   ;;  %1566 = vmatprep.subr.bf16.mxu1 %v1744_v2  ;;  %1504 = vmatprep.subr.bf16.mxu0 %v1746_v4  ;;  %v1749_v7 = vld [vmem:[%s2330_s1 + $0x88] sm:$0xff]   ;;  %v1753_v11 = vld [vmem:[%s2330_s1 + $0x90] sm:$0xff]  }
   0x5   :  { %1567 = vmatpush3.bf16.msra.mxu1 %v1745_v3  ;;  %v1754_v12 = vld [vmem:[%s2330_s1 + $0x58] sm:$0xff]   ;;  %v1758_v16 = vld [vmem:[%s2330_s1 + $0x60] sm:$0xff]   ;;  %v1762_v20 = vld [vmem:[%s2330_s1 + $0x68] sm:$0xff]  }
   0x6   :  { %1568 = vmatprep.subr.bf16.mxu1 %v1748_v6  ;;  %v1755_v13 = vld [vmem:[%s2330_s1 + $0x18] sm:$0xff]   ;;  %v1759_v17 = vld [vmem:[%s2330_s1 + $0x20] sm:$0xff]   ;;  %v1763_v21 = vld [vmem:[%s2330_s1 + $0x28] sm:$0xff]  }
   0x7   :  { %1505 = vmatpush3.bf16.msra.mxu0 %v1747_v5  ;;  %v1756_v14 = vld [vmem:[%s2330_s1 + $0xd8] sm:$0xff]   ;;  %v1760_v18 = vld [vmem:[%s2330_s1 + $0xe0] sm:$0xff]   ;;  %v1764_v22 = vld [vmem:[%s2330_s1 + $0xe8] sm:$0xff]  }
   0x8   :  { %1506 = vmatprep.subr.bf16.mxu0 %v1750_v8  ;;  %v1757_v15 = vld [vmem:[%s2330_s1 + $0x98] sm:$0xff]   ;;  %v1761_v19 = vld [vmem:[%s2330_s1 + $0xa0] sm:$0xff]   ;;  %v1765_v23 = vld [vmem:[%s2330_s1 + $0xa8] sm:$0xff]  }
   0x9   :  { %1569 = vmatpush3.bf16.msra.mxu1 %v1749_v7  ;;  %v1766_v24 = vld [vmem:[%s2330_s1 + $0x70] sm:$0xff]   ;;  %v1770_v28 = vld [vmem:[%s2330_s1 + $0x78] sm:$0xff]   ;;  %v1775_v32 = vld [vmem:[%s2331_s0 + $0x4] ss:$28 sps:$4 sm:$0xff]  }
   0xa   :  { %1570 = vmatprep.subr.bf16.mxu1 %v1752_v10  ;;  %v1767_v25 = vld [vmem:[%s2330_s1 + $0x30] sm:$0xff]   ;;  %v1771_v29 = vld [vmem:[%s2330_s1 + $0x38] sm:$0xff]   ;;  %854 = vmatprep.mubr.bf16.mxu0 %v1775_v32  ;;  %v1777_v34 = vld [vmem:[%s2330_s1 + $0x140] sm:$0xff]  }
   0xb   :  { %1507 = vmatpush3.bf16.msra.mxu0 %v1751_v9  ;;  %v1768_v26 = vld [vmem:[%s2330_s1 + $0xf0] sm:$0xff]   ;;  %v1772_v30 = vld [vmem:[%s2330_s1 + $0xf8] sm:$0xff]   ;;  %v1778_v35 = vld [vmem:[%s2331_s0 + $0x8] ss:$28 sps:$4 sm:$0xff]  }
   0xc   :  { %1508 = vmatprep.subr.bf16.mxu0 %v1754_v12  ;;  %v1769_v27 = vld [vmem:[%s2330_s1 + $0xb0] sm:$0xff]   ;;  %v1773_v31 = vld [vmem:[%s2331_s0] ss:$28 sps:$4 sm:$0xff]   ;;  %v1780_v36 = vld [vmem:[%s2331_s0 + $0xc] ss:$28 sps:$4 sm:$0xff]  }
   0xd   :  { %1571 = vmatpush3.bf16.msra.mxu1 %v1753_v11  ;;  %v1776_v33 = vld [vmem:[%s2330_s1 + $0xb8] sm:$0xff]   ;;  %v1781_v37 = vld [vmem:[%s2330_s1 + $0x100] sm:$0xff]   ;;  %951 = vmatprep.mubr.bf16.mxu1 %v1780_v36  ;;  %v1785_v40 = vld [vmem:[%s2330_s1 + $0x148] sm:$0xff]  }
   0xe   :  { %1572 = vmatprep.subr.bf16.mxu1 %v1756_v14  ;;  %v1782_v38 = vld [vmem:[%s2331_s0 + $0x3c] ss:$28 sps:$4 sm:$0xff]   ;;  %v1786_v41 = vld [vmem:[%s2331_s0 + $0x44] ss:$28 sps:$4 sm:$0xff]   ;;  %v1788_v42 = vld [vmem:[%s2330_s1 + $0x108] sm:$0xff]  }
   0xf   :  { %1509 = vmatpush3.bf16.msra.mxu0 %v1755_v13  ;;  %v1784_v39 = vld [vmem:[%s2331_s0 + $0x38] ss:$28 sps:$4 sm:$0xff]   ;;  %v1789_v43 = vld [vmem:[%s2331_s0 + $0x40] ss:$28 sps:$4 sm:$0xff]   ;;  %v1792_v48 = vld [vmem:[%s2331_s0 + $0x70] ss:$28 sps:$4 sm:$0xff]  }
  0x10   :  { %1510 = vmatprep.subr.bf16.mxu0 %v1758_v16  ;;  %v1790_v44 = vld [vmem:[%s2331_s0 + $0x74] ss:$28 sps:$4 sm:$0xff]   ;;  %v1794_v46 = vld [vmem:[%s2331_s0 + $0x7c] ss:$28 sps:$4 sm:$0xff]   ;;  %v1798_v49 = vld [vmem:[%s2331_s0 + $0xac] ss:$28 sps:$4 sm:$0xff]  }
  0x11   :  { %1573 = vmatpush3.bf16.msra.mxu1 %v1757_v15  ;;  %v1793_v45 = vld [vmem:[%s2330_s1 + $0x150] sm:$0xff]   ;;  %v1801_v50 = vld [vmem:[%s2330_s1 + $0x158] sm:$0xff]   ;;  %v1809_v54 = vld [vmem:[%s2330_s1 + $0x160] sm:$0xff]  }
  0x12   :  { %1574 = vmatprep.subr.bf16.mxu1 %v1760_v18  ;;  %v1796_v47 = vld [vmem:[%s2330_s1 + $0x110] sm:$0xff]   ;;  %v1804_v52 = vld [vmem:[%s2330_s1 + $0x118] sm:$0xff]   ;;  %v1800_v55 = vld [vmem:[%s2331_s0 + $0xa8] ss:$28 sps:$4 sm:$0xff]  }
  0x13   :  { %1511 = vmatpush3.bf16.msra.mxu0 %v1759_v17  ;;  %v1797_v51 = vld [vmem:[%s2331_s0 + $0x78] ss:$28 sps:$4 sm:$0xff]   ;;  %v1812_v56 = vld [vmem:[%s2330_s1 + $0x120] sm:$0xff]   ;;  %v1805_v59 = vld [vmem:[%s2331_s0 + $0xb0] ss:$28 sps:$4 sm:$0xff]  }
  0x14   :  { %1512 = vmatprep.subr.bf16.mxu0 %v1762_v20  ;;  %v1802_v53 = vld [vmem:[%s2331_s0 + $0xb4] ss:$28 sps:$4 sm:$0xff]   ;;  %v1806_v57 = vld [vmem:[%s2331_s0 + $0xe4] ss:$28 sps:$4 sm:$0xff]   ;;  %v1810_v60 = vld [vmem:[%s2331_s0 + $0xec] ss:$28 sps:$4 sm:$0xff]  }
  0x15   :  { %1575 = vmatpush3.bf16.msra.mxu1 %v1761_v19  ;;  %v1814_v58 = vld [vmem:[%s2330_s1 + $0x180] sm:$0xff]   ;;  %v1818_v61 = vld [vmem:[%s2330_s1 + $0x168] sm:$0xff]   ;;  %v1824_v0 = vld [vmem:[%s2330_s1 + $0x190] sm:$0xff]  }
  0x16   :  { %1576 = vmatprep.subr.bf16.mxu1 %v1764_v22  ;;  %v1819_v62 = vld [vmem:[%s2330_s1 + $0x188] sm:$0xff]   ;;  %v1808_v1 = vld [vmem:[%s2331_s0 + $0xe0] ss:$28 sps:$4 sm:$0xff]   ;;  %v1828_v4 = vld [vmem:[%s2330_s1 + $0x170] sm:$0xff]  }
  0x17   :  { %1513 = vmatpush3.bf16.msra.mxu0 %v1763_v21  ;;  %v1822_v63 = vld [vmem:[%s2330_s1 + $0x128] sm:$0xff]   ;;  %v1815_v3 = vld [vmem:[%s2331_s0 + $0x11c] ss:$28 sps:$4 sm:$0xff]   ;;  %v1820_v6 = vld [vmem:[%s2331_s0 + $0x124] ss:$28 sps:$4 sm:$0xff]  }
  0x18   :  { %1514 = vmatprep.subr.bf16.mxu0 %v1766_v24  ;;  %v1813_v2 = vld [vmem:[%s2331_s0 + $0xe8] ss:$28 sps:$4 sm:$0xff]   ;;  %v1829_v5 = vld [vmem:[%s2330_s1 + $0x198] sm:$0xff]   ;;  %v1832_v7 = vld [vmem:[%s2330_s1 + $0x130] sm:$0xff]  }
  0x19   :  { %1577 = vmatpush3.bf16.msra.mxu1 %v1765_v23  ;;  %v1834_v8 = vld [vmem:[%s2330_s1 + $0x1a0] sm:$0xff]   ;;  %v1817_v9 = vld [vmem:[%s2331_s0 + $0x118] ss:$28 sps:$4 sm:$0xff]   ;;  %v1839_v13 = vld [vmem:[%s2330_s1 + $0x1a8] sm:$0xff]  }
  0x1a   :  { %1578 = vmatprep.subr.bf16.mxu1 %v1768_v26  ;;  %v1838_v10 = vld [vmem:[%s2330_s1 + $0x178] sm:$0xff]   ;;  %v1825_v12 = vld [vmem:[%s2331_s0 + $0x154] ss:$28 sps:$4 sm:$0xff]   ;;  %v1835_v18 = vld [vmem:[%s2331_s0 + $0x18c] ss:$28 sps:$4 sm:$0xff]  }
  0x1b   :  { %1515 = vmatpush3.bf16.msra.mxu0 %v1767_v25  ;;  %v1823_v11 = vld [vmem:[%s2331_s0 + $0x120] ss:$28 sps:$4 sm:$0xff]   ;;  %v1844_v16 = vld [vmem:[%s2330_s1 + $0x1b0] sm:$0xff]   ;;  %v1837_v22 = vld [vmem:[%s2331_s0 + $0x188] ss:$28 sps:$4 sm:$0xff]  }
  0x1c   :  { %1516 = vmatprep.subr.bf16.mxu0 %v1770_v28  ;;  %v1842_v14 = vld [vmem:[%s2330_s1 + $0x138] sm:$0xff]   ;;  %v1827_v17 = vld [vmem:[%s2331_s0 + $0x150] ss:$28 sps:$4 sm:$0xff]  }
  0x1d   :  { %1579 = vmatpush3.bf16.msra.mxu1 %v1769_v27  ;;  %v1830_v15 = vld [vmem:[%s2331_s0 + $0x15c] ss:$28 sps:$4 sm:$0xff]   ;;  %v1840_v21 = vld [vmem:[%s2331_s0 + $0x194] ss:$28 sps:$4 sm:$0xff]   ;;  %v1851_v27 = vld [vmem:[%s2331_s0 + $0x4c] ss:$28 sps:$4 sm:$0xff]  }
  0x1e   :  { %1580 = vmatprep.subr.bf16.mxu1 %v1772_v30  ;;  %v1848_v19 = vld [vmem:[%s2330_s1 + $0x1b8] sm:$0xff]   ;;  %v1847_v23 = vld [vmem:[%s2331_s0 + $0x14] ss:$28 sps:$4 sm:$0xff]   ;;  %v1853_v30 = vld [vmem:[%s2331_s0 + $0x48] ss:$28 sps:$4 sm:$0xff]  }
  0x1f   :  { %1517 = vmatpush3.bf16.msra.mxu0 %v1771_v29  ;;  %v1833_v20 = vld [vmem:[%s2331_s0 + $0x158] ss:$28 sps:$4 sm:$0xff]   ;;  %v1843_v24 = vld [vmem:[%s2331_s0 + $0x190] ss:$28 sps:$4 sm:$0xff]   ;;  %v1857_v29 = vld [vmem:[%s2331_s0 + $0x88] ss:$28 sps:$4 sm:$0xff]  }
  0x20   :  { %1630 = vmatprep.subr.bf16.mxu0 %v1777_v34  ;;  %v1849_v25 = vld [vmem:[%s2331_s0 + $0x18] ss:$28 sps:$4 sm:$0xff]   ;;  %v1845_v26 = vld [vmem:[%s2331_s0 + $0x10] ss:$28 sps:$4 sm:$0xff]   ;;  %v1858_v32 = vld [vmem:[%s2331_s0 + $0xc0] ss:$28 sps:$4 sm:$0xff]  }
  0x21   :  { %1581 = vmatpush3.bf16.msra.mxu1 %v1776_v33  ;;  %v1850_v28 = vld [vmem:[%s2331_s0 + $0x50] ss:$28 sps:$4 sm:$0xff]   ;;  %v1865_v33 = vld [vmem:[%s2331_s0 + $0xf8] ss:$28 sps:$4 sm:$0xff]   ;;  %v1856_v34 = vld [vmem:[%s2331_s0 + $0x80] ss:$28 sps:$4 sm:$0xff]  }
  0x22   :  { %855 = vmatmul.mubr.bf16.vlgmr.msra.gmra.mrb[0].mxu0 %v1773_v31  ;;  %1710 = vmatprep.subr.bf16.mxu1 %v1814_v58  ;;  %v1854_v31 = vld [vmem:[%s2331_s0 + $0x84] ss:$28 sps:$4 sm:$0xff]   ;;  %v1866_v36 = vld [vmem:[%s2331_s0 + $0x130] ss:$28 sps:$4 sm:$0xff]  }
  0x23   :  { %1631 = vmatpush3.bf16.msra.mxu0 %v1781_v37  ;;  %862 = vmatprep.mubr.bf16.mxu0 %v1782_v38  ;;  %v1873_v37 = vld [vmem:[%s2331_s0 + $0x168] ss:$28 sps:$4 sm:$0xff]   ;;  %v1861_v38 = vld [vmem:[%s2331_s0 + $0xb8] ss:$28 sps:$4 sm:$0xff]  }
  0x24   :  { %952 = vmatmul.mubr.bf16.vlgmr.msra.gmra.mrb[0].mxu1 %v1778_v35  ;;  %1632 = vmatprep.subr.bf16.mxu0 %v1785_v40  ;;  %v1859_v35 = vld [vmem:[%s2331_s0 + $0xbc] ss:$28 sps:$4 sm:$0xff]  }
  0x25   :  { %959 = vmatprep.mubr.bf16.mxu1 %v1786_v41  ;;  %1711 = vmatpush3.bf16.msra.mxu1 %v1814_v58  ;;  %v1874_v40 = vld [vmem:[%s2331_s0 + $0x1a0] ss:$28 sps:$4 sm:$0xff]   ;;  %v1864_v41 = vld [vmem:[%s2331_s0 + $0xf0] ss:$28 sps:$4 sm:$0xff]  }
  0x26   :  { %1712 = vmatprep.subr.bf16.mxu1 %v1819_v62 }
  0x27   :  { %1633 = vmatpush3.bf16.msra.mxu0 %v1788_v42  ;;  %v1867_v42 = vld [vmem:[%s2331_s0 + $0x12c] ss:$28 sps:$4 sm:$0xff]  }
  0x28   :  { %1634 = vmatprep.subr.bf16.mxu0 %v1793_v45  ;;  %v1872_v45 = vld [vmem:[%s2331_s0 + $0x160] ss:$28 sps:$4 sm:$0xff]  }
  0x29   :  { %1713 = vmatpush3.bf16.msra.mxu1 %v1819_v62 }
  0x2a   :  { %863 = vmatmul.mubr.bf16.gmra.mrb[4].mxu0 %v1784_v39  ;;  %1714 = vmatprep.subr.bf16.mxu1 %v1824_v0  ;;  %v1862_v39 = vld [vmem:[%s2331_s0 + $0xf4] ss:$28 sps:$4 sm:$0xff]  }
  0x2b   :  { %870 = vmatprep.mubr.bf16.mxu0 %v1790_v44  ;;  %1635 = vmatpush3.bf16.msra.mxu0 %v1796_v47  ;;  %v1870_v44 = vld [vmem:[%s2331_s0 + $0x164] ss:$28 sps:$4 sm:$0xff]   ;;  %v1877_v47 = vld [vmem:[%s2331_s0 + $0x198] ss:$28 sps:$4 sm:$0xff]  }
  0x2c   :  { %960 = vmatmul.mubr.bf16.gmra.mrb[4].mxu1 %v1789_v43  ;;  %1636 = vmatprep.subr.bf16.mxu0 %v1801_v50  ;;  %v1869_v43 = vld [vmem:[%s2331_s0 + $0x128] ss:$28 sps:$4 sm:$0xff]  }
  0x2d   :  { %967 = vmatprep.mubr.bf16.mxu1 %v1794_v46  ;;  %1715 = vmatpush3.bf16.msra.mxu1 %v1824_v0  ;;  %v1875_v46 = vld [vmem:[%s2331_s0 + $0x19c] ss:$28 sps:$4 sm:$0xff]  }
  0x2e   :  { %1716 = vmatprep.subr.bf16.mxu1 %v1829_v5 }
  0x2f   :  { %1637 = vmatpush3.bf16.msra.mxu0 %v1804_v52 }
  0x30   :  { %1638 = vmatprep.subr.bf16.mxu0 %v1809_v54 }
  0x31   :  { %1717 = vmatpush3.bf16.msra.mxu1 %v1829_v5 }
  0x32   :  { %871 = vmatmul.mubr.bf16.gmra.mrb[8].mxu0 %v1792_v48  ;;  %1718 = vmatprep.subr.bf16.mxu1 %v1834_v8 }
  0x33   :  { %878 = vmatprep.mubr.bf16.mxu0 %v1798_v49  ;;  %1639 = vmatpush3.bf16.msra.mxu0 %v1812_v56  ;;  %v2237_v49 = vld [vmem:[%s2332_s2] ss:$0 sm:$0xff] }
  0x34   :  { %968 = vmatmul.mubr.bf16.gmra.mrb[8].mxu1 %v1797_v51  ;;  %1640 = vmatprep.subr.bf16.mxu0 %v1818_v61 }
  0x35   :  { %975 = vmatprep.mubr.bf16.mxu1 %v1802_v53  ;;  %1719 = vmatpush3.bf16.msra.mxu1 %v1834_v8 }
  0x36   :  { %1720 = vmatprep.subr.bf16.mxu1 %v1839_v13 }
  0x37   :  { %1641 = vmatpush3.bf16.msra.mxu0 %v1822_v63 }
  0x38   :  { %1642 = vmatprep.subr.bf16.mxu0 %v1828_v4 }
  0x39   :  { %1721 = vmatpush3.bf16.msra.mxu1 %v1839_v13 }
  0x3a   :  { %879 = vmatmul.mubr.bf16.gmra.mrb[12].mxu0 %v1800_v55  ;;  %1722 = vmatprep.subr.bf16.mxu1 %v1844_v16 }
  0x3b   :  { %886 = vmatprep.mubr.bf16.mxu0 %v1806_v57  ;;  %1643 = vmatpush3.bf16.msra.mxu0 %v1832_v7 }
  0x3c   :  { %976 = vmatmul.mubr.bf16.gmra.mrb[12].mxu1 %v1805_v59  ;;  %1644 = vmatprep.subr.bf16.mxu0 %v1838_v10 }
  0x3d   :  { %983 = vmatprep.mubr.bf16.mxu1 %v1810_v60  ;;  %1723 = vmatpush3.bf16.msra.mxu1 %v1844_v16 }
  0x3e   :  { %1724 = vmatprep.subr.bf16.mxu1 %v1848_v19 }
  0x3f   :  { %1645 = vmatpush3.bf16.msra.mxu0 %v1842_v14 }
  0x41   :  { %1725 = vmatpush3.bf16.msra.mxu1 %v1848_v19 }
  0x42   :  { %887 = vmatmul.mubr.bf16.gmra.mrb[16].mxu0 %v1808_v1 }
  0x43   :  { %894 = vmatprep.mubr.bf16.mxu0 %v1815_v3 }
  0x44   :  { %984 = vmatmul.mubr.bf16.gmra.mrb[16].mxu1 %v1813_v2 }
  0x45   :  { %991 = vmatprep.mubr.bf16.mxu1 %v1820_v6 }
  0x4a   :  { %895 = vmatmul.mubr.bf16.gmra.mrb[20].mxu0 %v1817_v9 }
  0x4b   :  { %902 = vmatprep.mubr.bf16.mxu0 %v1825_v12 }
  0x4c   :  { %992 = vmatmul.mubr.bf16.gmra.mrb[20].mxu1 %v1823_v11 }
  0x4d   :  { %999 = vmatprep.mubr.bf16.mxu1 %v1830_v15 }
  0x52   :  { %903 = vmatmul.mubr.bf16.gmra.mrb[24].mxu0 %v1827_v17 }
  0x53   :  { %910 = vmatprep.mubr.bf16.mxu0 %v1835_v18 }
  0x54   :  { %1000 = vmatmul.mubr.bf16.gmra.mrb[24].mxu1 %v1833_v20 }
  0x55   :  { %1007 = vmatprep.mubr.bf16.mxu1 %v1840_v21 }
  0x5a   :  { %911 = vmatmul.mubr.bf16.gmra.mrb[28].mxu0 %v1837_v22 }
  0x5b   :  { %1048 = vmatprep.mubr.bf16.mxu0 %v1847_v23 }
  0x5c   :  { %1008 = vmatmul.mubr.bf16.gmra.mrb[28].mxu1 %v1843_v24 }
  0x5d   :  { %1726 = vmatprep.mubr.bf16.mxu1 %v1849_v25 }
  0x62   :  { %1049 = vmatmul.mubr.bf16.vlgmr.msra.gmra.mrb[32].mxu0 %v1845_v26 }
  0x63   :  { %1056 = vmatprep.mubr.bf16.mxu0 %v1851_v27 }
  0x64   :  { %1727 = vmatmul.mubr.bf16.vlgmr.msra.gmra.mrb[32].mxu1 %v1850_v28 }
  0x65   :  { %1730 = vmatprep.mubr.bf16.mxu1 %v1857_v29 }
  0x6a   :  { %1057 = vmatmul.mubr.bf16.gmra.mrb[36].mxu0 %v1853_v30 }
  0x6b   :  { %1064 = vmatprep.mubr.bf16.mxu0 %v1854_v31 }
  0x6c   :  { %1731 = vmatmul.mubr.bf16.gmra.mrb[36].mxu1 %v1858_v32 }
  0x6d   :  { %1734 = vmatprep.mubr.bf16.mxu1 %v1865_v33 }
  0x72   :  { %1065 = vmatmul.mubr.bf16.gmra.mrb[40].mxu0 %v1856_v34 }
  0x73   :  { %1072 = vmatprep.mubr.bf16.mxu0 %v1859_v35 }
  0x74   :  { %1735 = vmatmul.mubr.bf16.gmra.mrb[40].mxu1 %v1866_v36 }
  0x75   :  { %1738 = vmatprep.mubr.bf16.mxu1 %v1873_v37 }
  0x7a   :  { %1073 = vmatmul.mubr.bf16.gmra.mrb[44].mxu0 %v1861_v38 }
  0x7b   :  { %1080 = vmatprep.mubr.bf16.mxu0 %v1862_v39 }
  0x7c   :  { %1739 = vmatmul.mubr.bf16.gmra.mrb[44].mxu1 %v1874_v40 }
  0x82   :  { %1081 = vmatmul.mubr.bf16.gmra.mrb[48].mxu0 %v1864_v41 }
  0x83   :  { %1088 = vmatprep.mubr.bf16.mxu0 %v1867_v42 }
  0x8a   :  { %1089 = vmatmul.mubr.bf16.gmra.mrb[52].mxu0 %v1869_v43 }
  0x8b   :  { %1096 = vmatprep.mubr.bf16.mxu0 %v1870_v44 }
  0x92   :  { %1097 = vmatmul.mubr.bf16.gmra.mrb[56].mxu0 %v1872_v45 }
  0x93   :  { %1104 = vmatprep.mubr.bf16.mxu0 %v1875_v46 }
  0x9a   :  { %1105 = vmatmul.mubr.bf16.gmra.mrb[60].mxu0 %v1877_v47 }
  0xf5   :  { %v1518_v48 = vpop.f32.mrb[0].mxu0 }
  0xf6   :  { %v1519_v50 = vpop.f32.mrb[1].mxu0 }
  0xf7   :  { %v1520_v51 = vadd.f32 %v1519_v50, %v1518_v48  ;;  %v1521_v52 = vpop.f32.mrb[2].mxu0  ;;  %v1582_v53 = vpop.f32.mrb[0].mxu1 }
  0xf8   :  { %v1522_v54 = vpop.f32.mrb[3].mxu0  ;;  %v1583_v57 = vpop.f32.mrb[1].mxu1 }
  0xf9   :  { %v857_v55 = vadd.f32 %v1520_v51, %v2237_v49  ;;  %v1523_v56 = vadd.f32 %v1522_v54, %v1521_v52  ;;  %v1584_v58 = vadd.f32 %v1583_v57, %v1582_v53  ;;  %v1585_v59 = vpop.f32.mrb[2].mxu1 }
  0xfa   :  { %v1586_v61 = vpop.f32.mrb[3].mxu1 }
  0xfb   :  { %v860_v60 = vadd.f32 %v1523_v56, %v2237_v49  ;;  %v2241_v62 = vadd.f32 %v1584_v58, %v857_v55  ;;  %v1587_v63 = vadd.f32 %v1586_v61, %v1585_v59 }
  0xfd   :  { %v1524_v0 = vpop.f32.mrb[4].mxu0  ;;  %v2243_v1 = vadd.f32 %v1587_v63, %v860_v60 }
  0xfe   :  { %v1525_v2 = vpop.f32.mrb[5].mxu0 }
  0xff   :  { %v1526_v3 = vadd.f32 %v1525_v2, %v1524_v0  ;;  %v1527_v4 = vpop.f32.mrb[6].mxu0  ;;  %v1588_v5 = vpop.f32.mrb[4].mxu1 }
 0x100   :  { %v1528_v6 = vpop.f32.mrb[7].mxu0  ;;  %v1589_v9 = vpop.f32.mrb[5].mxu1 }
 0x101   :  { %v865_v7 = vadd.f32 %v1526_v3, %v2237_v49  ;;  %v1529_v8 = vadd.f32 %v1528_v6, %v1527_v4  ;;  %v1590_v10 = vadd.f32 %v1589_v9, %v1588_v5  ;;  %v1591_v11 = vpop.f32.mrb[6].mxu1 }
 0x102   :  { %v1592_v13 = vpop.f32.mrb[7].mxu1 }
 0x103   :  { %v868_v12 = vadd.f32 %v1529_v8, %v2237_v49  ;;  %v2247_v14 = vadd.f32 %v1590_v10, %v865_v7  ;;  %v1593_v15 = vadd.f32 %v1592_v13, %v1591_v11 }
 0x105   :  { %v1530_v16 = vpop.f32.mrb[8].mxu0  ;;  %v2249_v17 = vadd.f32 %v1593_v15, %v868_v12 }
 0x106   :  { %v1531_v18 = vpop.f32.mrb[9].mxu0 }
 0x107   :  { %v1532_v19 = vadd.f32 %v1531_v18, %v1530_v16  ;;  %v1533_v20 = vpop.f32.mrb[10].mxu0  ;;  %v1594_v21 = vpop.f32.mrb[8].mxu1 }
 0x108   :  { %v1534_v22 = vpop.f32.mrb[11].mxu0  ;;  %v1595_v25 = vpop.f32.mrb[9].mxu1 }
 0x109   :  { %v873_v23 = vadd.f32 %v1532_v19, %v2237_v49  ;;  %v1535_v24 = vadd.f32 %v1534_v22, %v1533_v20  ;;  %v1596_v26 = vadd.f32 %v1595_v25, %v1594_v21  ;;  %v1597_v27 = vpop.f32.mrb[10].mxu1 }
 0x10a   :  { %v1598_v29 = vpop.f32.mrb[11].mxu1 }
 0x10b   :  { %v876_v28 = vadd.f32 %v1535_v24, %v2237_v49  ;;  %v2253_v30 = vadd.f32 %v1596_v26, %v873_v23  ;;  %v1599_v31 = vadd.f32 %v1598_v29, %v1597_v27 }
 0x10d   :  { %v1536_v32 = vpop.f32.mrb[12].mxu0  ;;  %v2255_v33 = vadd.f32 %v1599_v31, %v876_v28 }
 0x10e   :  { %v1537_v34 = vpop.f32.mrb[13].mxu0 }
 0x10f   :  { %v1538_v35 = vadd.f32 %v1537_v34, %v1536_v32  ;;  %v1539_v36 = vpop.f32.mrb[14].mxu0  ;;  %v1600_v37 = vpop.f32.mrb[12].mxu1 }
 0x110   :  { %v1540_v38 = vpop.f32.mrb[15].mxu0  ;;  %v1601_v41 = vpop.f32.mrb[13].mxu1 }
 0x111   :  { %v881_v39 = vadd.f32 %v1538_v35, %v2237_v49  ;;  %v1541_v40 = vadd.f32 %v1540_v38, %v1539_v36  ;;  %v1602_v42 = vadd.f32 %v1601_v41, %v1600_v37  ;;  %v1603_v43 = vpop.f32.mrb[14].mxu1 }
 0x112   :  { %v1604_v45 = vpop.f32.mrb[15].mxu1 }
 0x113   :  { %v884_v44 = vadd.f32 %v1541_v40, %v2237_v49  ;;  %v2259_v46 = vadd.f32 %v1602_v42, %v881_v39  ;;  %v1605_v47 = vadd.f32 %v1604_v45, %v1603_v43 }
 0x115   :  { %v1542_v48 = vpop.f32.mrb[16].mxu0  ;;  %v2261_v50 = vadd.f32 %v1605_v47, %v884_v44 }
 0x116   :  { %v1543_v51 = vpop.f32.mrb[17].mxu0 }
 0x117   :  { %v1544_v52 = vadd.f32 %v1543_v51, %v1542_v48  ;;  %v1545_v53 = vpop.f32.mrb[18].mxu0  ;;  %v1606_v54 = vpop.f32.mrb[16].mxu1 }
 0x118   :  { %v1546_v55 = vpop.f32.mrb[19].mxu0  ;;  %v1607_v58 = vpop.f32.mrb[17].mxu1 }
 0x119   :  { %v889_v56 = vadd.f32 %v1544_v52, %v2237_v49  ;;  %v1547_v57 = vadd.f32 %v1546_v55, %v1545_v53  ;;  %v1608_v59 = vadd.f32 %v1607_v58, %v1606_v54  ;;  %v1609_v60 = vpop.f32.mrb[18].mxu1 }
 0x11a   :  { %v1610_v63 = vpop.f32.mrb[19].mxu1 }
 0x11b   :  { %v892_v61 = vadd.f32 %v1547_v57, %v2237_v49  ;;  %v2265_v0 = vadd.f32 %v1608_v59, %v889_v56  ;;  %v1611_v2 = vadd.f32 %v1610_v63, %v1609_v60 }
 0x11d   :  { %v1548_v3 = vpop.f32.mrb[20].mxu0  ;;  %v2267_v4 = vadd.f32 %v1611_v2, %v892_v61 }
 0x11e   :  { %v1549_v5 = vpop.f32.mrb[21].mxu0 }
 0x11f   :  { %v1550_v6 = vadd.f32 %v1549_v5, %v1548_v3  ;;  %v1551_v7 = vpop.f32.mrb[22].mxu0  ;;  %v1612_v8 = vpop.f32.mrb[20].mxu1 }
 0x120   :  { %v1552_v9 = vpop.f32.mrb[23].mxu0  ;;  %v1613_v12 = vpop.f32.mrb[21].mxu1 }
 0x121   :  { %v897_v10 = vadd.f32 %v1550_v6, %v2237_v49  ;;  %v1553_v11 = vadd.f32 %v1552_v9, %v1551_v7  ;;  %v1614_v13 = vadd.f32 %v1613_v12, %v1612_v8  ;;  %v1615_v15 = vpop.f32.mrb[22].mxu1 }
 0x122   :  { %v1616_v18 = vpop.f32.mrb[23].mxu1 }
 0x123   :  { %v900_v16 = vadd.f32 %v1553_v11, %v2237_v49  ;;  %v2271_v19 = vadd.f32 %v1614_v13, %v897_v10  ;;  %v1617_v20 = vadd.f32 %v1616_v18, %v1615_v15 }
 0x125   :  { %v1554_v21 = vpop.f32.mrb[24].mxu0  ;;  %v2273_v22 = vadd.f32 %v1617_v20, %v900_v16 }
 0x126   :  { %v1555_v23 = vpop.f32.mrb[25].mxu0 }
 0x127   :  { %v1556_v24 = vadd.f32 %v1555_v23, %v1554_v21  ;;  %v1557_v25 = vpop.f32.mrb[26].mxu0  ;;  %v1618_v26 = vpop.f32.mrb[24].mxu1 }
 0x128   :  { %v1558_v27 = vpop.f32.mrb[27].mxu0  ;;  %v1619_v31 = vpop.f32.mrb[25].mxu1 }
 0x129   :  { %v905_v28 = vadd.f32 %v1556_v24, %v2237_v49  ;;  %v1559_v29 = vadd.f32 %v1558_v27, %v1557_v25  ;;  %v1620_v32 = vadd.f32 %v1619_v31, %v1618_v26  ;;  %v1621_v34 = vpop.f32.mrb[26].mxu1 }
 0x12a   :  { %v1622_v36 = vpop.f32.mrb[27].mxu1 }
 0x12b   :  { %v908_v35 = vadd.f32 %v1559_v29, %v2237_v49  ;;  %v2277_v37 = vadd.f32 %v1620_v32, %v905_v28  ;;  %v1623_v38 = vadd.f32 %v1622_v36, %v1621_v34 }
 0x12d   :  { %v1560_v39 = vpop.f32.mrb[28].mxu0  ;;  %v2279_v40 = vadd.f32 %v1623_v38, %v908_v35 }
 0x12e   :  { %v1561_v41 = vpop.f32.mrb[29].mxu0 }
 0x12f   :  { %v1562_v42 = vadd.f32 %v1561_v41, %v1560_v39  ;;  %v1563_v43 = vpop.f32.mrb[30].mxu0  ;;  %v1624_v44 = vpop.f32.mrb[28].mxu1 }
 0x130   :  { %v1564_v45 = vpop.f32.mrb[31].mxu0  ;;  %v1625_v51 = vpop.f32.mrb[29].mxu1 }
 0x131   :  { %v913_v47 = vadd.f32 %v1562_v42, %v2237_v49  ;;  %v1565_v48 = vadd.f32 %v1564_v45, %v1563_v43  ;;  %v1626_v52 = vadd.f32 %v1625_v51, %v1624_v44  ;;  %v1627_v53 = vpop.f32.mrb[30].mxu1 }
 0x132   :  { %v1628_v55 = vpop.f32.mrb[31].mxu1 }
 0x133   :  { %v916_v54 = vadd.f32 %v1565_v48, %v2237_v49  ;;  %v2283_v56 = vadd.f32 %v1626_v52, %v913_v47  ;;  %v1629_v57 = vadd.f32 %v1628_v55, %v1627_v53 }
 0x135   :  { %v1646_v58 = vpop.f32.mrb[32].mxu0  ;;  %v2285_v59 = vadd.f32 %v1629_v57, %v916_v54 }
 0x136   :  { %v1647_v60 = vpop.f32.mrb[33].mxu0 }
 0x137   :  { %v1648_v61 = vadd.f32 %v1647_v60, %v1646_v58  ;;  %v1649_v63 = vpop.f32.mrb[34].mxu0  ;;  %v1728_v3 = vpop.f32.mrb[32].mxu1 }
 0x138   :  { %v1650_v2 = vpop.f32.mrb[35].mxu0  ;;  %v1147_v7 = vpop.f32.mrb[33].mxu1 }
 0x139   :  { %v1651_v5 = vadd.f32 %v1650_v2, %v1649_v63  ;;  %v1051_v6 = vadd.f32 %v1648_v61, %v2241_v62  ;;  %v1729_v8 = vpop.f32.mrb[34].mxu1 }
 0x13a   :  { %v1150_v10 = vpop.f32.mrb[35].mxu1 }
 0x13b   :  { %v1148_v9 = vadd.f32 %v1147_v7, %v1051_v6  ;;  %v1054_v49 = vadd.f32 %v1651_v5, %v2243_v1 }
 0x13d   :  { %v1151_v11 = vadd.f32 %v1150_v10, %v1054_v49  ;;  %v1652_v12 = vpop.f32.mrb[36].mxu0  ;;  %v1210_v15 = vmax.f32 %v1148_v9, 0.0 }
 0x13e   :  { %v1653_v13 = vpop.f32.mrb[37].mxu0 }
 0x13f   :  { %v1211_v16 = vmax.f32 %v1151_v11, 0.0  ;;  %v1654_v18 = vadd.f32 %v1653_v13, %v1652_v12  ;;  %v1655_v20 = vpop.f32.mrb[38].mxu0  ;;  %v1732_v23 = vpop.f32.mrb[36].mxu1 }
 0x140   :  { %v1656_v21 = vpop.f32.mrb[39].mxu0  ;;  %v1163_v62 = vpop.f32.mrb[37].mxu1 }
 0x141   :  { %v1458_v24 = vpack.c.bf16 %v1211_v16, %v1210_v15  ;;  %v1059_v25 = vadd.f32 %v1654_v18, %v2247_v14  ;;  %v1657_v26 = vadd.f32 %v1656_v21, %v1655_v20  ;;  %v1733_v27 = vpop.f32.mrb[38].mxu1 }
 0x142   :  { %v1166_v29 = vpop.f32.mrb[39].mxu1 }
 0x143   :  { %1459 = vst [vmem:[%s2333_s3] sm:$0xff] %v1458_v24   ;;  %v1156_v1 = vadd.f32 %v1728_v3, %v1059_v25  ;;  %v1062_v28 = vadd.f32 %v1657_v26, %v2249_v17 }
 0x145   :  { %v1159_v31 = vadd.f32 %v1729_v8, %v1062_v28  ;;  %v1658_v32 = vpop.f32.mrb[40].mxu0  ;;  %v1212_v35 = vmax.f32 %v1156_v1, 0.0 }
 0x146   :  { %v1659_v34 = vpop.f32.mrb[41].mxu0 }
 0x147   :  { %v1213_v36 = vmax.f32 %v1159_v31, 0.0  ;;  %v1660_v38 = vadd.f32 %v1659_v34, %v1658_v32  ;;  %v1661_v39 = vpop.f32.mrb[42].mxu0  ;;  %v1736_v14 = vpop.f32.mrb[40].mxu1 }
 0x148   :  { %v1662_v41 = vpop.f32.mrb[43].mxu0  ;;  %v1179_v45 = vpop.f32.mrb[41].mxu1 }
 0x149   :  { %v1463_v42 = vpack.c.bf16 %v1213_v36, %v1212_v35  ;;  %v1663_v43 = vadd.f32 %v1662_v41, %v1661_v39  ;;  %v1067_v44 = vadd.f32 %v1660_v38, %v2253_v30  ;;  %v1737_v47 = vpop.f32.mrb[42].mxu1 }
 0x14a   :  { %v1182_v51 = vpop.f32.mrb[43].mxu1 }
 0x14b   :  { %1495 = vst [vmem:[%s2333_s3 + $0x8] sm:$0xff] %v1463_v42   ;;  %v1164_v17 = vadd.f32 %v1163_v62, %v1067_v44  ;;  %v1070_v48 = vadd.f32 %v1663_v43, %v2255_v33 }
 0x14d   :  { %v1167_v52 = vadd.f32 %v1166_v29, %v1070_v48  ;;  %v1664_v53 = vpop.f32.mrb[44].mxu0  ;;  %v1214_v55 = vmax.f32 %v1164_v17, 0.0 }
 0x14e   :  { %v1665_v54 = vpop.f32.mrb[45].mxu0 }
 0x14f   :  { %v1215_v57 = vmax.f32 %v1167_v52, 0.0  ;;  %v1666_v58 = vadd.f32 %v1665_v54, %v1664_v53  ;;  %v1667_v60 = vpop.f32.mrb[46].mxu0  ;;  %v2299_v63 = vpop.f32.mrb[44].mxu1 }
 0x150   :  { %v1668_v61 = vpop.f32.mrb[47].mxu0  ;;  %v1195_v5 = vpop.f32.mrb[45].mxu1 }
 0x151   :  { %v1468_v30 = vpack.c.bf16 %v1215_v57, %v1214_v55  ;;  %v1075_v2 = vadd.f32 %v1666_v58, %v2259_v46  ;;  %v1669_v3 = vadd.f32 %v1668_v61, %v1667_v60  ;;  %v1741_v6 = vpop.f32.mrb[46].mxu1 }
 0x152   :  { %v1198_v8 = vpop.f32.mrb[47].mxu1 }
 0x153   :  { %1496 = vst [vmem:[%s2333_s3 + $0x10] sm:$0xff] %v1468_v30   ;;  %v1172_v33 = vadd.f32 %v1732_v23, %v1075_v2  ;;  %v1078_v7 = vadd.f32 %v1669_v3, %v2261_v50 }
 0x155   :  { %v1175_v9 = vadd.f32 %v1733_v27, %v1078_v7  ;;  %v1670_v49 = vpop.f32.mrb[48].mxu0  ;;  %v1216_v11 = vmax.f32 %v1172_v33, 0.0 }
 0x156   :  { %v1671_v10 = vpop.f32.mrb[49].mxu0 }
 0x157   :  { %v1217_v12 = vmax.f32 %v1175_v9, 0.0  ;;  %v1672_v13 = vadd.f32 %v1671_v10, %v1670_v49  ;;  %v1673_v15 = vpop.f32.mrb[50].mxu0 }
 0x158   :  { %v1674_v16 = vpop.f32.mrb[51].mxu0 }
 0x159   :  { %v1473_v46 = vpack.c.bf16 %v1217_v12, %v1216_v11  ;;  %v1675_v18 = vadd.f32 %v1674_v16, %v1673_v15  ;;  %v1083_v20 = vadd.f32 %v1672_v13, %v2265_v0 }
 0x15b   :  { %1497 = vst [vmem:[%s2333_s3 + $0x18] sm:$0xff] %v1473_v46   ;;  %v1180_v21 = vadd.f32 %v1179_v45, %v1083_v20  ;;  %v1086_v50 = vadd.f32 %v1675_v18, %v2267_v4 }
 0x15d   :  { %v1183_v23 = vadd.f32 %v1182_v51, %v1086_v50  ;;  %v1676_v24 = vpop.f32.mrb[52].mxu0  ;;  %v1218_v26 = vmax.f32 %v1180_v21, 0.0 }
 0x15e   :  { %v1677_v25 = vpop.f32.mrb[53].mxu0 }
 0x15f   :  { %v1219_v62 = vmax.f32 %v1183_v23, 0.0  ;;  %v1678_v27 = vadd.f32 %v1677_v25, %v1676_v24  ;;  %v1679_v1 = vpop.f32.mrb[54].mxu0 }
 0x160   :  { %v1680_v28 = vpop.f32.mrb[55].mxu0 }
 0x161   :  { %v1478_v29 = vpack.c.bf16 %v1219_v62, %v1218_v26  ;;  %v1091_v31 = vadd.f32 %v1678_v27, %v2271_v19  ;;  %v1681_v32 = vadd.f32 %v1680_v28, %v1679_v1 }
 0x163   :  { %1498 = vst [vmem:[%s2333_s3 + $0x20] sm:$0xff] %v1478_v29   ;;  %v1188_v0 = vadd.f32 %v1736_v14, %v1091_v31  ;;  %v1094_v34 = vadd.f32 %v1681_v32, %v2273_v22 }
 0x165   :  { %v1191_v4 = vadd.f32 %v1737_v47, %v1094_v34  ;;  %v1682_v35 = vpop.f32.mrb[56].mxu0  ;;  %v1220_v38 = vmax.f32 %v1188_v0, 0.0 }
 0x166   :  { %v1683_v36 = vpop.f32.mrb[57].mxu0 }
 0x167   :  { %v1221_v39 = vmax.f32 %v1191_v4, 0.0  ;;  %v1684_v41 = vadd.f32 %v1683_v36, %v1682_v35  ;;  %v1685_v42 = vpop.f32.mrb[58].mxu0 }
 0x168   :  { %v1686_v43 = vpop.f32.mrb[59].mxu0 }
 0x169   :  { %v1483_v44 = vpack.c.bf16 %v1221_v39, %v1220_v38  ;;  %v1687_v45 = vadd.f32 %v1686_v43, %v1685_v42  ;;  %v1099_v19 = vadd.f32 %v1684_v41, %v2277_v37 }
 0x16b   :  { %1499 = vst [vmem:[%s2333_s3 + $0x28] sm:$0xff] %v1483_v44   ;;  %v1196_v17 = vadd.f32 %v1195_v5, %v1099_v19  ;;  %v1102_v14 = vadd.f32 %v1687_v45, %v2279_v40 }
 0x16d   :  { %v1199_v22 = vadd.f32 %v1198_v8, %v1102_v14  ;;  %v1688_v47 = vpop.f32.mrb[60].mxu0  ;;  %v1222_v51 = vmax.f32 %v1196_v17, 0.0 }
 0x16e   :  { %v1689_v48 = vpop.f32.mrb[61].mxu0 }
 0x16f   :  { %v1223_v52 = vmax.f32 %v1199_v22, 0.0  ;;  %v1690_v53 = vadd.f32 %v1689_v48, %v1688_v47  ;;  %v1691_v54 = vpop.f32.mrb[62].mxu0 }
 0x170   :  { %v1692_v55 = vpop.f32.mrb[63].mxu0 }
 0x171   :  { %v1488_v57 = vpack.c.bf16 %v1223_v52, %v1222_v51  ;;  %v1107_v58 = vadd.f32 %v1690_v53, %v2283_v56  ;;  %v1693_v60 = vadd.f32 %v1692_v55, %v1691_v54 }
 0x173   :  { %1500 = vst [vmem:[%s2333_s3 + $0x30] sm:$0xff] %v1488_v57   ;;  %v1204_v37 = vadd.f32 %v2299_v63, %v1107_v58  ;;  %v1110_v40 = vadd.f32 %v1693_v60, %v2285_v59 }
 0x175   :  { %v1207_v61 = vadd.f32 %v1741_v6, %v1110_v40  ;;  %v1224_v30 = vmax.f32 %v1204_v37, 0.0 }
 0x177   :  { %v1225_v2 = vmax.f32 %v1207_v61, 0.0 }
 0x179   :  { %v1493_v3 = vpack.c.bf16 %v1225_v2, %v1224_v30 }
 0x17b   :  { %1501 = vst [vmem:[%s2333_s3 + $0x38] sm:$0xff] %v1493_v3  }

// kernel: frames_convolution3d_forward.7
= control target key start
LH: loop header
LB: loop body
LE: loop exit
PB: predicated region body
PF: predicated region fallthrough
CT: control target
= control target key end

     0   :  { %s2192_s1 = inlined_call_operand.vmem [shape: bf16[896,128], index: 1, kind: input, shape index: {}]   ;;  %s2193_s0 = inlined_call_operand.vmem [shape: bf16[128,896], index: 0, kind: input, shape index: {}]   ;;  %s2194_s2 = inlined_call_operand.vmem [shape: f32[1,128], index: 2, kind: input, shape index: {}]   ;;  %s2195_s3 = inlined_call_operand.vmem [shape: f32[128,128], index: 3, kind: output, shape index: {}]  }
   0x1   :  { %v1583_v0 = vld [vmem:[%s2192_s1 + $0x40] sm:$0xff]   ;;  %v1587_v4 = vld [vmem:[%s2192_s1 + $0x48] sm:$0xff]   ;;  %v1591_v8 = vld [vmem:[%s2192_s1 + $0x50] sm:$0xff]  }
   0x2   :  { %v1584_v1 = vld [vmem:[%s2192_s1] sm:$0xff]   ;;  %1343 = vmatprep.subr.bf16.mxu0 %v1583_v0  ;;  %v1588_v5 = vld [vmem:[%s2192_s1 + $0x8] sm:$0xff]   ;;  %v1592_v9 = vld [vmem:[%s2192_s1 + $0x10] sm:$0xff]  }
   0x3   :  { %v1585_v2 = vld [vmem:[%s2192_s1 + $0xc0] sm:$0xff]   ;;  %1344 = vmatpush3.bf16.msra.mxu0 %v1584_v1  ;;  %v1589_v6 = vld [vmem:[%s2192_s1 + $0xc8] sm:$0xff]   ;;  %v1593_v10 = vld [vmem:[%s2192_s1 + $0xd0] sm:$0xff]  }
   0x4   :  { %v1586_v3 = vld [vmem:[%s2192_s1 + $0x80] sm:$0xff]   ;;  %1407 = vmatprep.subr.bf16.mxu1 %v1585_v2  ;;  %1345 = vmatprep.subr.bf16.mxu0 %v1587_v4  ;;  %v1590_v7 = vld [vmem:[%s2192_s1 + $0x88] sm:$0xff]   ;;  %v1594_v11 = vld [vmem:[%s2192_s1 + $0x90] sm:$0xff]  }
   0x5   :  { %1408 = vmatpush3.bf16.msra.mxu1 %v1586_v3  ;;  %v1595_v12 = vld [vmem:[%s2192_s1 + $0x58] sm:$0xff]   ;;  %v1599_v16 = vld [vmem:[%s2192_s1 + $0x60] sm:$0xff]   ;;  %v1603_v20 = vld [vmem:[%s2192_s1 + $0x68] sm:$0xff]  }
   0x6   :  { %1409 = vmatprep.subr.bf16.mxu1 %v1589_v6  ;;  %v1596_v13 = vld [vmem:[%s2192_s1 + $0x18] sm:$0xff]   ;;  %v1600_v17 = vld [vmem:[%s2192_s1 + $0x20] sm:$0xff]   ;;  %v1604_v21 = vld [vmem:[%s2192_s1 + $0x28] sm:$0xff]  }
   0x7   :  { %1346 = vmatpush3.bf16.msra.mxu0 %v1588_v5  ;;  %v1597_v14 = vld [vmem:[%s2192_s1 + $0xd8] sm:$0xff]   ;;  %v1601_v18 = vld [vmem:[%s2192_s1 + $0xe0] sm:$0xff]   ;;  %v1605_v22 = vld [vmem:[%s2192_s1 + $0xe8] sm:$0xff]  }
   0x8   :  { %1347 = vmatprep.subr.bf16.mxu0 %v1591_v8  ;;  %v1598_v15 = vld [vmem:[%s2192_s1 + $0x98] sm:$0xff]   ;;  %v1602_v19 = vld [vmem:[%s2192_s1 + $0xa0] sm:$0xff]   ;;  %v1606_v23 = vld [vmem:[%s2192_s1 + $0xa8] sm:$0xff]  }
   0x9   :  { %1410 = vmatpush3.bf16.msra.mxu1 %v1590_v7  ;;  %v1607_v24 = vld [vmem:[%s2192_s1 + $0x70] sm:$0xff]   ;;  %v1611_v28 = vld [vmem:[%s2192_s1 + $0x78] sm:$0xff]   ;;  %v1616_v32 = vld [vmem:[%s2193_s0 + $0x4] ss:$28 sps:$4 sm:$0xff]  }
   0xa   :  { %1411 = vmatprep.subr.bf16.mxu1 %v1593_v10  ;;  %v1608_v25 = vld [vmem:[%s2192_s1 + $0x30] sm:$0xff]   ;;  %v1612_v29 = vld [vmem:[%s2192_s1 + $0x38] sm:$0xff]   ;;  %854 = vmatprep.mubr.bf16.mxu0 %v1616_v32  ;;  %v1618_v34 = vld [vmem:[%s2192_s1 + $0x140] sm:$0xff]  }
   0xb   :  { %1348 = vmatpush3.bf16.msra.mxu0 %v1592_v9  ;;  %v1609_v26 = vld [vmem:[%s2192_s1 + $0xf0] sm:$0xff]   ;;  %v1613_v30 = vld [vmem:[%s2192_s1 + $0xf8] sm:$0xff]   ;;  %v1619_v35 = vld [vmem:[%s2193_s0 + $0x8] ss:$28 sps:$4 sm:$0xff]  }
   0xc   :  { %1349 = vmatprep.subr.bf16.mxu0 %v1595_v12  ;;  %v1610_v27 = vld [vmem:[%s2192_s1 + $0xb0] sm:$0xff]   ;;  %v1614_v31 = vld [vmem:[%s2193_s0] ss:$28 sps:$4 sm:$0xff]   ;;  %v1621_v36 = vld [vmem:[%s2193_s0 + $0xc] ss:$28 sps:$4 sm:$0xff]  }
   0xd   :  { %1412 = vmatpush3.bf16.msra.mxu1 %v1594_v11  ;;  %v1617_v33 = vld [vmem:[%s2192_s1 + $0xb8] sm:$0xff]   ;;  %v1622_v37 = vld [vmem:[%s2192_s1 + $0x100] sm:$0xff]   ;;  %951 = vmatprep.mubr.bf16.mxu1 %v1621_v36  ;;  %v1626_v40 = vld [vmem:[%s2192_s1 + $0x148] sm:$0xff]  }
   0xe   :  { %1413 = vmatprep.subr.bf16.mxu1 %v1597_v14  ;;  %v1623_v38 = vld [vmem:[%s2193_s0 + $0x3c] ss:$28 sps:$4 sm:$0xff]   ;;  %v1627_v41 = vld [vmem:[%s2193_s0 + $0x44] ss:$28 sps:$4 sm:$0xff]   ;;  %v1629_v42 = vld [vmem:[%s2192_s1 + $0x108] sm:$0xff]  }
   0xf   :  { %1350 = vmatpush3.bf16.msra.mxu0 %v1596_v13  ;;  %v1625_v39 = vld [vmem:[%s2193_s0 + $0x38] ss:$28 sps:$4 sm:$0xff]   ;;  %v1630_v43 = vld [vmem:[%s2193_s0 + $0x40] ss:$28 sps:$4 sm:$0xff]   ;;  %v1633_v48 = vld [vmem:[%s2193_s0 + $0x70] ss:$28 sps:$4 sm:$0xff]  }
  0x10   :  { %1351 = vmatprep.subr.bf16.mxu0 %v1599_v16  ;;  %v1631_v44 = vld [vmem:[%s2193_s0 + $0x74] ss:$28 sps:$4 sm:$0xff]   ;;  %v1635_v46 = vld [vmem:[%s2193_s0 + $0x7c] ss:$28 sps:$4 sm:$0xff]   ;;  %v1639_v49 = vld [vmem:[%s2193_s0 + $0xac] ss:$28 sps:$4 sm:$0xff]  }
  0x11   :  { %1414 = vmatpush3.bf16.msra.mxu1 %v1598_v15  ;;  %v1634_v45 = vld [vmem:[%s2192_s1 + $0x150] sm:$0xff]   ;;  %v1642_v50 = vld [vmem:[%s2192_s1 + $0x158] sm:$0xff]   ;;  %v1650_v54 = vld [vmem:[%s2192_s1 + $0x160] sm:$0xff]  }
  0x12   :  { %1415 = vmatprep.subr.bf16.mxu1 %v1601_v18  ;;  %v1637_v47 = vld [vmem:[%s2192_s1 + $0x110] sm:$0xff]   ;;  %v1645_v52 = vld [vmem:[%s2192_s1 + $0x118] sm:$0xff]   ;;  %v1641_v55 = vld [vmem:[%s2193_s0 + $0xa8] ss:$28 sps:$4 sm:$0xff]  }
  0x13   :  { %1352 = vmatpush3.bf16.msra.mxu0 %v1600_v17  ;;  %v1638_v51 = vld [vmem:[%s2193_s0 + $0x78] ss:$28 sps:$4 sm:$0xff]   ;;  %v1653_v56 = vld [vmem:[%s2192_s1 + $0x120] sm:$0xff]   ;;  %v1646_v59 = vld [vmem:[%s2193_s0 + $0xb0] ss:$28 sps:$4 sm:$0xff]  }
  0x14   :  { %1353 = vmatprep.subr.bf16.mxu0 %v1603_v20  ;;  %v1643_v53 = vld [vmem:[%s2193_s0 + $0xb4] ss:$28 sps:$4 sm:$0xff]   ;;  %v1647_v57 = vld [vmem:[%s2193_s0 + $0xe4] ss:$28 sps:$4 sm:$0xff]   ;;  %v1651_v60 = vld [vmem:[%s2193_s0 + $0xec] ss:$28 sps:$4 sm:$0xff]  }
  0x15   :  { %1416 = vmatpush3.bf16.msra.mxu1 %v1602_v19  ;;  %v1655_v58 = vld [vmem:[%s2192_s1 + $0x180] sm:$0xff]   ;;  %v1659_v61 = vld [vmem:[%s2192_s1 + $0x168] sm:$0xff]   ;;  %v1665_v0 = vld [vmem:[%s2192_s1 + $0x190] sm:$0xff]  }
  0x16   :  { %1417 = vmatprep.subr.bf16.mxu1 %v1605_v22  ;;  %v1660_v62 = vld [vmem:[%s2192_s1 + $0x188] sm:$0xff]   ;;  %v1649_v1 = vld [vmem:[%s2193_s0 + $0xe0] ss:$28 sps:$4 sm:$0xff]   ;;  %v1669_v4 = vld [vmem:[%s2192_s1 + $0x170] sm:$0xff]  }
  0x17   :  { %1354 = vmatpush3.bf16.msra.mxu0 %v1604_v21  ;;  %v1663_v63 = vld [vmem:[%s2192_s1 + $0x128] sm:$0xff]   ;;  %v1656_v3 = vld [vmem:[%s2193_s0 + $0x11c] ss:$28 sps:$4 sm:$0xff]   ;;  %v1661_v6 = vld [vmem:[%s2193_s0 + $0x124] ss:$28 sps:$4 sm:$0xff]  }
  0x18   :  { %1355 = vmatprep.subr.bf16.mxu0 %v1607_v24  ;;  %v1654_v2 = vld [vmem:[%s2193_s0 + $0xe8] ss:$28 sps:$4 sm:$0xff]   ;;  %v1670_v5 = vld [vmem:[%s2192_s1 + $0x198] sm:$0xff]   ;;  %v1673_v7 = vld [vmem:[%s2192_s1 + $0x130] sm:$0xff]  }
  0x19   :  { %1418 = vmatpush3.bf16.msra.mxu1 %v1606_v23  ;;  %v1675_v8 = vld [vmem:[%s2192_s1 + $0x1a0] sm:$0xff]   ;;  %v1658_v9 = vld [vmem:[%s2193_s0 + $0x118] ss:$28 sps:$4 sm:$0xff]   ;;  %v1680_v13 = vld [vmem:[%s2192_s1 + $0x1a8] sm:$0xff]  }
  0x1a   :  { %1419 = vmatprep.subr.bf16.mxu1 %v1609_v26  ;;  %v1679_v10 = vld [vmem:[%s2192_s1 + $0x178] sm:$0xff]   ;;  %v1666_v12 = vld [vmem:[%s2193_s0 + $0x154] ss:$28 sps:$4 sm:$0xff]   ;;  %v1676_v18 = vld [vmem:[%s2193_s0 + $0x18c] ss:$28 sps:$4 sm:$0xff]  }
  0x1b   :  { %1356 = vmatpush3.bf16.msra.mxu0 %v1608_v25  ;;  %v1664_v11 = vld [vmem:[%s2193_s0 + $0x120] ss:$28 sps:$4 sm:$0xff]   ;;  %v1685_v16 = vld [vmem:[%s2192_s1 + $0x1b0] sm:$0xff]   ;;  %v1678_v22 = vld [vmem:[%s2193_s0 + $0x188] ss:$28 sps:$4 sm:$0xff]  }
  0x1c   :  { %1357 = vmatprep.subr.bf16.mxu0 %v1611_v28  ;;  %v1683_v14 = vld [vmem:[%s2192_s1 + $0x138] sm:$0xff]   ;;  %v1668_v17 = vld [vmem:[%s2193_s0 + $0x150] ss:$28 sps:$4 sm:$0xff]  }
  0x1d   :  { %1420 = vmatpush3.bf16.msra.mxu1 %v1610_v27  ;;  %v1671_v15 = vld [vmem:[%s2193_s0 + $0x15c] ss:$28 sps:$4 sm:$0xff]   ;;  %v1681_v21 = vld [vmem:[%s2193_s0 + $0x194] ss:$28 sps:$4 sm:$0xff]   ;;  %v1692_v27 = vld [vmem:[%s2193_s0 + $0x4c] ss:$28 sps:$4 sm:$0xff]  }
  0x1e   :  { %1421 = vmatprep.subr.bf16.mxu1 %v1613_v30  ;;  %v1689_v19 = vld [vmem:[%s2192_s1 + $0x1b8] sm:$0xff]   ;;  %v1688_v23 = vld [vmem:[%s2193_s0 + $0x14] ss:$28 sps:$4 sm:$0xff]   ;;  %v1694_v30 = vld [vmem:[%s2193_s0 + $0x48] ss:$28 sps:$4 sm:$0xff]  }
  0x1f   :  { %1358 = vmatpush3.bf16.msra.mxu0 %v1612_v29  ;;  %v1674_v20 = vld [vmem:[%s2193_s0 + $0x158] ss:$28 sps:$4 sm:$0xff]   ;;  %v1684_v24 = vld [vmem:[%s2193_s0 + $0x190] ss:$28 sps:$4 sm:$0xff]   ;;  %v1698_v29 = vld [vmem:[%s2193_s0 + $0x88] ss:$28 sps:$4 sm:$0xff]  }
  0x20   :  { %1471 = vmatprep.subr.bf16.mxu0 %v1618_v34  ;;  %v1690_v25 = vld [vmem:[%s2193_s0 + $0x18] ss:$28 sps:$4 sm:$0xff]   ;;  %v1686_v26 = vld [vmem:[%s2193_s0 + $0x10] ss:$28 sps:$4 sm:$0xff]   ;;  %v1699_v32 = vld [vmem:[%s2193_s0 + $0xc0] ss:$28 sps:$4 sm:$0xff]  }
  0x21   :  { %1422 = vmatpush3.bf16.msra.mxu1 %v1617_v33  ;;  %v1691_v28 = vld [vmem:[%s2193_s0 + $0x50] ss:$28 sps:$4 sm:$0xff]   ;;  %v1706_v33 = vld [vmem:[%s2193_s0 + $0xf8] ss:$28 sps:$4 sm:$0xff]   ;;  %v1697_v34 = vld [vmem:[%s2193_s0 + $0x80] ss:$28 sps:$4 sm:$0xff]  }
  0x22   :  { %855 = vmatmul.mubr.bf16.vlgmr.msra.gmra.mrb[0].mxu0 %v1614_v31  ;;  %1551 = vmatprep.subr.bf16.mxu1 %v1655_v58  ;;  %v1695_v31 = vld [vmem:[%s2193_s0 + $0x84] ss:$28 sps:$4 sm:$0xff]   ;;  %v1707_v36 = vld [vmem:[%s2193_s0 + $0x130] ss:$28 sps:$4 sm:$0xff]  }
  0x23   :  { %1472 = vmatpush3.bf16.msra.mxu0 %v1622_v37  ;;  %862 = vmatprep.mubr.bf16.mxu0 %v1623_v38  ;;  %v1714_v37 = vld [vmem:[%s2193_s0 + $0x168] ss:$28 sps:$4 sm:$0xff]   ;;  %v1702_v38 = vld [vmem:[%s2193_s0 + $0xb8] ss:$28 sps:$4 sm:$0xff]  }
  0x24   :  { %952 = vmatmul.mubr.bf16.vlgmr.msra.gmra.mrb[0].mxu1 %v1619_v35  ;;  %1473 = vmatprep.subr.bf16.mxu0 %v1626_v40  ;;  %v1700_v35 = vld [vmem:[%s2193_s0 + $0xbc] ss:$28 sps:$4 sm:$0xff]  }
  0x25   :  { %959 = vmatprep.mubr.bf16.mxu1 %v1627_v41  ;;  %1552 = vmatpush3.bf16.msra.mxu1 %v1655_v58  ;;  %v1715_v40 = vld [vmem:[%s2193_s0 + $0x1a0] ss:$28 sps:$4 sm:$0xff]   ;;  %v1705_v41 = vld [vmem:[%s2193_s0 + $0xf0] ss:$28 sps:$4 sm:$0xff]  }
  0x26   :  { %1553 = vmatprep.subr.bf16.mxu1 %v1660_v62 }
  0x27   :  { %1474 = vmatpush3.bf16.msra.mxu0 %v1629_v42  ;;  %v1708_v42 = vld [vmem:[%s2193_s0 + $0x12c] ss:$28 sps:$4 sm:$0xff]  }
  0x28   :  { %1475 = vmatprep.subr.bf16.mxu0 %v1634_v45  ;;  %v1713_v45 = vld [vmem:[%s2193_s0 + $0x160] ss:$28 sps:$4 sm:$0xff]  }
  0x29   :  { %1554 = vmatpush3.bf16.msra.mxu1 %v1660_v62 }
  0x2a   :  { %863 = vmatmul.mubr.bf16.gmra.mrb[4].mxu0 %v1625_v39  ;;  %1555 = vmatprep.subr.bf16.mxu1 %v1665_v0  ;;  %v1703_v39 = vld [vmem:[%s2193_s0 + $0xf4] ss:$28 sps:$4 sm:$0xff]  }
  0x2b   :  { %870 = vmatprep.mubr.bf16.mxu0 %v1631_v44  ;;  %1476 = vmatpush3.bf16.msra.mxu0 %v1637_v47  ;;  %v1711_v44 = vld [vmem:[%s2193_s0 + $0x164] ss:$28 sps:$4 sm:$0xff]   ;;  %v1718_v47 = vld [vmem:[%s2193_s0 + $0x198] ss:$28 sps:$4 sm:$0xff]  }
  0x2c   :  { %960 = vmatmul.mubr.bf16.gmra.mrb[4].mxu1 %v1630_v43  ;;  %1477 = vmatprep.subr.bf16.mxu0 %v1642_v50  ;;  %v1710_v43 = vld [vmem:[%s2193_s0 + $0x128] ss:$28 sps:$4 sm:$0xff]  }
  0x2d   :  { %967 = vmatprep.mubr.bf16.mxu1 %v1635_v46  ;;  %1556 = vmatpush3.bf16.msra.mxu1 %v1665_v0  ;;  %v1716_v46 = vld [vmem:[%s2193_s0 + $0x19c] ss:$28 sps:$4 sm:$0xff]  }
  0x2e   :  { %1557 = vmatprep.subr.bf16.mxu1 %v1670_v5 }
  0x2f   :  { %1478 = vmatpush3.bf16.msra.mxu0 %v1645_v52 }
  0x30   :  { %1479 = vmatprep.subr.bf16.mxu0 %v1650_v54 }
  0x31   :  { %1558 = vmatpush3.bf16.msra.mxu1 %v1670_v5 }
  0x32   :  { %871 = vmatmul.mubr.bf16.gmra.mrb[8].mxu0 %v1633_v48  ;;  %1559 = vmatprep.subr.bf16.mxu1 %v1675_v8 }
  0x33   :  { %878 = vmatprep.mubr.bf16.mxu0 %v1639_v49  ;;  %1480 = vmatpush3.bf16.msra.mxu0 %v1653_v56  ;;  %v2078_v49 = vld [vmem:[%s2194_s2] ss:$0 sm:$0xff] }
  0x34   :  { %968 = vmatmul.mubr.bf16.gmra.mrb[8].mxu1 %v1638_v51  ;;  %1481 = vmatprep.subr.bf16.mxu0 %v1659_v61 }
  0x35   :  { %975 = vmatprep.mubr.bf16.mxu1 %v1643_v53  ;;  %1560 = vmatpush3.bf16.msra.mxu1 %v1675_v8 }
  0x36   :  { %1561 = vmatprep.subr.bf16.mxu1 %v1680_v13 }
  0x37   :  { %1482 = vmatpush3.bf16.msra.mxu0 %v1663_v63 }
  0x38   :  { %1483 = vmatprep.subr.bf16.mxu0 %v1669_v4 }
  0x39   :  { %1562 = vmatpush3.bf16.msra.mxu1 %v1680_v13 }
  0x3a   :  { %879 = vmatmul.mubr.bf16.gmra.mrb[12].mxu0 %v1641_v55  ;;  %1563 = vmatprep.subr.bf16.mxu1 %v1685_v16 }
  0x3b   :  { %886 = vmatprep.mubr.bf16.mxu0 %v1647_v57  ;;  %1484 = vmatpush3.bf16.msra.mxu0 %v1673_v7 }
  0x3c   :  { %976 = vmatmul.mubr.bf16.gmra.mrb[12].mxu1 %v1646_v59  ;;  %1485 = vmatprep.subr.bf16.mxu0 %v1679_v10 }
  0x3d   :  { %983 = vmatprep.mubr.bf16.mxu1 %v1651_v60  ;;  %1564 = vmatpush3.bf16.msra.mxu1 %v1685_v16 }
  0x3e   :  { %1565 = vmatprep.subr.bf16.mxu1 %v1689_v19 }
  0x3f   :  { %1486 = vmatpush3.bf16.msra.mxu0 %v1683_v14 }
  0x41   :  { %1566 = vmatpush3.bf16.msra.mxu1 %v1689_v19 }
  0x42   :  { %887 = vmatmul.mubr.bf16.gmra.mrb[16].mxu0 %v1649_v1 }
  0x43   :  { %894 = vmatprep.mubr.bf16.mxu0 %v1656_v3 }
  0x44   :  { %984 = vmatmul.mubr.bf16.gmra.mrb[16].mxu1 %v1654_v2 }
  0x45   :  { %991 = vmatprep.mubr.bf16.mxu1 %v1661_v6 }
  0x4a   :  { %895 = vmatmul.mubr.bf16.gmra.mrb[20].mxu0 %v1658_v9 }
  0x4b   :  { %902 = vmatprep.mubr.bf16.mxu0 %v1666_v12 }
  0x4c   :  { %992 = vmatmul.mubr.bf16.gmra.mrb[20].mxu1 %v1664_v11 }
  0x4d   :  { %999 = vmatprep.mubr.bf16.mxu1 %v1671_v15 }
  0x52   :  { %903 = vmatmul.mubr.bf16.gmra.mrb[24].mxu0 %v1668_v17 }
  0x53   :  { %910 = vmatprep.mubr.bf16.mxu0 %v1676_v18 }
  0x54   :  { %1000 = vmatmul.mubr.bf16.gmra.mrb[24].mxu1 %v1674_v20 }
  0x55   :  { %1007 = vmatprep.mubr.bf16.mxu1 %v1681_v21 }
  0x5a   :  { %911 = vmatmul.mubr.bf16.gmra.mrb[28].mxu0 %v1678_v22 }
  0x5b   :  { %1048 = vmatprep.mubr.bf16.mxu0 %v1688_v23 }
  0x5c   :  { %1008 = vmatmul.mubr.bf16.gmra.mrb[28].mxu1 %v1684_v24 }
  0x5d   :  { %1567 = vmatprep.mubr.bf16.mxu1 %v1690_v25 }
  0x62   :  { %1049 = vmatmul.mubr.bf16.vlgmr.msra.gmra.mrb[32].mxu0 %v1686_v26 }
  0x63   :  { %1056 = vmatprep.mubr.bf16.mxu0 %v1692_v27 }
  0x64   :  { %1568 = vmatmul.mubr.bf16.vlgmr.msra.gmra.mrb[32].mxu1 %v1691_v28 }
  0x65   :  { %1571 = vmatprep.mubr.bf16.mxu1 %v1698_v29 }
  0x6a   :  { %1057 = vmatmul.mubr.bf16.gmra.mrb[36].mxu0 %v1694_v30 }
  0x6b   :  { %1064 = vmatprep.mubr.bf16.mxu0 %v1695_v31 }
  0x6c   :  { %1572 = vmatmul.mubr.bf16.gmra.mrb[36].mxu1 %v1699_v32 }
  0x6d   :  { %1575 = vmatprep.mubr.bf16.mxu1 %v1706_v33 }
  0x72   :  { %1065 = vmatmul.mubr.bf16.gmra.mrb[40].mxu0 %v1697_v34 }
  0x73   :  { %1072 = vmatprep.mubr.bf16.mxu0 %v1700_v35 }
  0x74   :  { %1576 = vmatmul.mubr.bf16.gmra.mrb[40].mxu1 %v1707_v36 }
  0x75   :  { %1579 = vmatprep.mubr.bf16.mxu1 %v1714_v37 }
  0x7a   :  { %1073 = vmatmul.mubr.bf16.gmra.mrb[44].mxu0 %v1702_v38 }
  0x7b   :  { %1080 = vmatprep.mubr.bf16.mxu0 %v1703_v39 }
  0x7c   :  { %1580 = vmatmul.mubr.bf16.gmra.mrb[44].mxu1 %v1715_v40 }
  0x82   :  { %1081 = vmatmul.mubr.bf16.gmra.mrb[48].mxu0 %v1705_v41 }
  0x83   :  { %1088 = vmatprep.mubr.bf16.mxu0 %v1708_v42 }
  0x8a   :  { %1089 = vmatmul.mubr.bf16.gmra.mrb[52].mxu0 %v1710_v43 }
  0x8b   :  { %1096 = vmatprep.mubr.bf16.mxu0 %v1711_v44 }
  0x92   :  { %1097 = vmatmul.mubr.bf16.gmra.mrb[56].mxu0 %v1713_v45 }
  0x93   :  { %1104 = vmatprep.mubr.bf16.mxu0 %v1716_v46 }
  0x9a   :  { %1105 = vmatmul.mubr.bf16.gmra.mrb[60].mxu0 %v1718_v47 }
  0xf5   :  { %v1359_v48 = vpop.f32.mrb[0].mxu0 }
  0xf6   :  { %v1360_v50 = vpop.f32.mrb[1].mxu0 }
  0xf7   :  { %v1361_v51 = vadd.f32 %v1360_v50, %v1359_v48  ;;  %v1362_v52 = vpop.f32.mrb[2].mxu0  ;;  %v1423_v53 = vpop.f32.mrb[0].mxu1 }
  0xf8   :  { %v1363_v54 = vpop.f32.mrb[3].mxu0  ;;  %v1424_v57 = vpop.f32.mrb[1].mxu1 }
  0xf9   :  { %v857_v55 = vadd.f32 %v1361_v51, %v2078_v49  ;;  %v1364_v56 = vadd.f32 %v1363_v54, %v1362_v52  ;;  %v1425_v58 = vadd.f32 %v1424_v57, %v1423_v53  ;;  %v1426_v59 = vpop.f32.mrb[2].mxu1 }
  0xfa   :  { %v1427_v61 = vpop.f32.mrb[3].mxu1 }
  0xfb   :  { %v860_v60 = vadd.f32 %v1364_v56, %v2078_v49  ;;  %v2082_v62 = vadd.f32 %v1425_v58, %v857_v55  ;;  %v1428_v63 = vadd.f32 %v1427_v61, %v1426_v59 }
  0xfd   :  { %v1365_v0 = vpop.f32.mrb[4].mxu0  ;;  %v2084_v1 = vadd.f32 %v1428_v63, %v860_v60 }
  0xfe   :  { %v1366_v2 = vpop.f32.mrb[5].mxu0 }
  0xff   :  { %v1367_v3 = vadd.f32 %v1366_v2, %v1365_v0  ;;  %v1368_v4 = vpop.f32.mrb[6].mxu0  ;;  %v1429_v5 = vpop.f32.mrb[4].mxu1 }
 0x100   :  { %v1369_v6 = vpop.f32.mrb[7].mxu0  ;;  %v1430_v9 = vpop.f32.mrb[5].mxu1 }
 0x101   :  { %v865_v7 = vadd.f32 %v1367_v3, %v2078_v49  ;;  %v1370_v8 = vadd.f32 %v1369_v6, %v1368_v4  ;;  %v1431_v10 = vadd.f32 %v1430_v9, %v1429_v5  ;;  %v1432_v11 = vpop.f32.mrb[6].mxu1 }
 0x102   :  { %v1433_v13 = vpop.f32.mrb[7].mxu1 }
 0x103   :  { %v868_v12 = vadd.f32 %v1370_v8, %v2078_v49  ;;  %v2088_v14 = vadd.f32 %v1431_v10, %v865_v7  ;;  %v1434_v15 = vadd.f32 %v1433_v13, %v1432_v11 }
 0x105   :  { %v1371_v16 = vpop.f32.mrb[8].mxu0  ;;  %v2090_v17 = vadd.f32 %v1434_v15, %v868_v12 }
 0x106   :  { %v1372_v18 = vpop.f32.mrb[9].mxu0 }
 0x107   :  { %v1373_v19 = vadd.f32 %v1372_v18, %v1371_v16  ;;  %v1374_v20 = vpop.f32.mrb[10].mxu0  ;;  %v1435_v21 = vpop.f32.mrb[8].mxu1 }
 0x108   :  { %v1375_v22 = vpop.f32.mrb[11].mxu0  ;;  %v1436_v25 = vpop.f32.mrb[9].mxu1 }
 0x109   :  { %v873_v23 = vadd.f32 %v1373_v19, %v2078_v49  ;;  %v1376_v24 = vadd.f32 %v1375_v22, %v1374_v20  ;;  %v1437_v26 = vadd.f32 %v1436_v25, %v1435_v21  ;;  %v1438_v27 = vpop.f32.mrb[10].mxu1 }
 0x10a   :  { %v1439_v29 = vpop.f32.mrb[11].mxu1 }
 0x10b   :  { %v876_v28 = vadd.f32 %v1376_v24, %v2078_v49  ;;  %v2094_v30 = vadd.f32 %v1437_v26, %v873_v23  ;;  %v1440_v31 = vadd.f32 %v1439_v29, %v1438_v27 }
 0x10d   :  { %v1377_v32 = vpop.f32.mrb[12].mxu0  ;;  %v2096_v33 = vadd.f32 %v1440_v31, %v876_v28 }
 0x10e   :  { %v1378_v34 = vpop.f32.mrb[13].mxu0 }
 0x10f   :  { %v1379_v35 = vadd.f32 %v1378_v34, %v1377_v32  ;;  %v1380_v36 = vpop.f32.mrb[14].mxu0  ;;  %v1441_v37 = vpop.f32.mrb[12].mxu1 }
 0x110   :  { %v1381_v38 = vpop.f32.mrb[15].mxu0  ;;  %v1442_v41 = vpop.f32.mrb[13].mxu1 }
 0x111   :  { %v881_v39 = vadd.f32 %v1379_v35, %v2078_v49  ;;  %v1382_v40 = vadd.f32 %v1381_v38, %v1380_v36  ;;  %v1443_v42 = vadd.f32 %v1442_v41, %v1441_v37  ;;  %v1444_v43 = vpop.f32.mrb[14].mxu1 }
 0x112   :  { %v1445_v45 = vpop.f32.mrb[15].mxu1 }
 0x113   :  { %v884_v44 = vadd.f32 %v1382_v40, %v2078_v49  ;;  %v2100_v46 = vadd.f32 %v1443_v42, %v881_v39  ;;  %v1446_v47 = vadd.f32 %v1445_v45, %v1444_v43 }
 0x115   :  { %v1383_v48 = vpop.f32.mrb[16].mxu0  ;;  %v2102_v50 = vadd.f32 %v1446_v47, %v884_v44 }
 0x116   :  { %v1384_v51 = vpop.f32.mrb[17].mxu0 }
 0x117   :  { %v1385_v52 = vadd.f32 %v1384_v51, %v1383_v48  ;;  %v1386_v53 = vpop.f32.mrb[18].mxu0  ;;  %v1447_v54 = vpop.f32.mrb[16].mxu1 }
 0x118   :  { %v1387_v55 = vpop.f32.mrb[19].mxu0  ;;  %v1448_v58 = vpop.f32.mrb[17].mxu1 }
 0x119   :  { %v889_v56 = vadd.f32 %v1385_v52, %v2078_v49  ;;  %v1388_v57 = vadd.f32 %v1387_v55, %v1386_v53  ;;  %v1449_v59 = vadd.f32 %v1448_v58, %v1447_v54  ;;  %v1450_v60 = vpop.f32.mrb[18].mxu1 }
 0x11a   :  { %v1451_v63 = vpop.f32.mrb[19].mxu1 }
 0x11b   :  { %v892_v61 = vadd.f32 %v1388_v57, %v2078_v49  ;;  %v2106_v0 = vadd.f32 %v1449_v59, %v889_v56  ;;  %v1452_v2 = vadd.f32 %v1451_v63, %v1450_v60 }
 0x11d   :  { %v1389_v3 = vpop.f32.mrb[20].mxu0  ;;  %v2108_v4 = vadd.f32 %v1452_v2, %v892_v61 }
 0x11e   :  { %v1390_v5 = vpop.f32.mrb[21].mxu0 }
 0x11f   :  { %v1391_v6 = vadd.f32 %v1390_v5, %v1389_v3  ;;  %v1392_v7 = vpop.f32.mrb[22].mxu0  ;;  %v1453_v8 = vpop.f32.mrb[20].mxu1 }
 0x120   :  { %v1393_v9 = vpop.f32.mrb[23].mxu0  ;;  %v1454_v12 = vpop.f32.mrb[21].mxu1 }
 0x121   :  { %v897_v10 = vadd.f32 %v1391_v6, %v2078_v49  ;;  %v1394_v11 = vadd.f32 %v1393_v9, %v1392_v7  ;;  %v1455_v13 = vadd.f32 %v1454_v12, %v1453_v8  ;;  %v1456_v15 = vpop.f32.mrb[22].mxu1 }
 0x122   :  { %v1457_v18 = vpop.f32.mrb[23].mxu1 }
 0x123   :  { %v900_v16 = vadd.f32 %v1394_v11, %v2078_v49  ;;  %v2112_v19 = vadd.f32 %v1455_v13, %v897_v10  ;;  %v1458_v20 = vadd.f32 %v1457_v18, %v1456_v15 }
 0x125   :  { %v1395_v21 = vpop.f32.mrb[24].mxu0  ;;  %v2114_v22 = vadd.f32 %v1458_v20, %v900_v16 }
 0x126   :  { %v1396_v23 = vpop.f32.mrb[25].mxu0 }
 0x127   :  { %v1397_v24 = vadd.f32 %v1396_v23, %v1395_v21  ;;  %v1398_v25 = vpop.f32.mrb[26].mxu0  ;;  %v1459_v26 = vpop.f32.mrb[24].mxu1 }
 0x128   :  { %v1399_v27 = vpop.f32.mrb[27].mxu0  ;;  %v1460_v31 = vpop.f32.mrb[25].mxu1 }
 0x129   :  { %v905_v28 = vadd.f32 %v1397_v24, %v2078_v49  ;;  %v1400_v29 = vadd.f32 %v1399_v27, %v1398_v25  ;;  %v1461_v32 = vadd.f32 %v1460_v31, %v1459_v26  ;;  %v1462_v34 = vpop.f32.mrb[26].mxu1 }
 0x12a   :  { %v1463_v36 = vpop.f32.mrb[27].mxu1 }
 0x12b   :  { %v908_v35 = vadd.f32 %v1400_v29, %v2078_v49  ;;  %v2118_v37 = vadd.f32 %v1461_v32, %v905_v28  ;;  %v1464_v38 = vadd.f32 %v1463_v36, %v1462_v34 }
 0x12d   :  { %v1401_v39 = vpop.f32.mrb[28].mxu0  ;;  %v2120_v40 = vadd.f32 %v1464_v38, %v908_v35 }
 0x12e   :  { %v1402_v41 = vpop.f32.mrb[29].mxu0 }
 0x12f   :  { %v1403_v42 = vadd.f32 %v1402_v41, %v1401_v39  ;;  %v1404_v43 = vpop.f32.mrb[30].mxu0  ;;  %v1465_v44 = vpop.f32.mrb[28].mxu1 }
 0x130   :  { %v1405_v45 = vpop.f32.mrb[31].mxu0  ;;  %v1466_v51 = vpop.f32.mrb[29].mxu1 }
 0x131   :  { %v913_v47 = vadd.f32 %v1403_v42, %v2078_v49  ;;  %v1406_v48 = vadd.f32 %v1405_v45, %v1404_v43  ;;  %v1467_v52 = vadd.f32 %v1466_v51, %v1465_v44  ;;  %v1468_v53 = vpop.f32.mrb[30].mxu1 }
 0x132   :  { %v1469_v55 = vpop.f32.mrb[31].mxu1 }
 0x133   :  { %v916_v54 = vadd.f32 %v1406_v48, %v2078_v49  ;;  %v2124_v56 = vadd.f32 %v1467_v52, %v913_v47  ;;  %v1470_v57 = vadd.f32 %v1469_v55, %v1468_v53 }
 0x135   :  { %v1487_v58 = vpop.f32.mrb[32].mxu0  ;;  %v2126_v59 = vadd.f32 %v1470_v57, %v916_v54 }
 0x136   :  { %v1488_v60 = vpop.f32.mrb[33].mxu0 }
 0x137   :  { %v1489_v61 = vadd.f32 %v1488_v60, %v1487_v58  ;;  %v1490_v63 = vpop.f32.mrb[34].mxu0  ;;  %v1569_v3 = vpop.f32.mrb[32].mxu1 }
 0x138   :  { %v1491_v2 = vpop.f32.mrb[35].mxu0  ;;  %v1147_v7 = vpop.f32.mrb[33].mxu1 }
 0x139   :  { %v1492_v5 = vadd.f32 %v1491_v2, %v1490_v63  ;;  %v1051_v6 = vadd.f32 %v1489_v61, %v2082_v62  ;;  %v1570_v8 = vpop.f32.mrb[34].mxu1 }
 0x13a   :  { %v1150_v10 = vpop.f32.mrb[35].mxu1 }
 0x13b   :  { %v1148_v9 = vadd.f32 %v1147_v7, %v1051_v6  ;;  %v1054_v49 = vadd.f32 %v1492_v5, %v2084_v1 }
 0x13d   :  { %1210 = vst [vmem:[%s2195_s3] sm:$0xff] %v1148_v9  ;;  %v1151_v11 = vadd.f32 %v1150_v10, %v1054_v49  ;;  %v1493_v12 = vpop.f32.mrb[36].mxu0 }
 0x13e   :  { %v1494_v13 = vpop.f32.mrb[37].mxu0 }
 0x13f   :  { %1211 = vst [vmem:[%s2195_s3 + $0x8] sm:$0xff] %v1151_v11  ;;  %v1495_v15 = vadd.f32 %v1494_v13, %v1493_v12  ;;  %v1496_v16 = vpop.f32.mrb[38].mxu0  ;;  %v1573_v18 = vpop.f32.mrb[36].mxu1 }
 0x140   :  { %v1497_v62 = vpop.f32.mrb[39].mxu0  ;;  %v1163_v1 = vpop.f32.mrb[37].mxu1 }
 0x141   :  { %v1059_v20 = vadd.f32 %v1495_v15, %v2088_v14  ;;  %v1498_v21 = vadd.f32 %v1497_v62, %v1496_v16  ;;  %v1574_v23 = vpop.f32.mrb[38].mxu1 }
 0x142   :  { %v1166_v26 = vpop.f32.mrb[39].mxu1 }
 0x143   :  { %v1156_v24 = vadd.f32 %v1569_v3, %v1059_v20  ;;  %v1062_v25 = vadd.f32 %v1498_v21, %v2090_v17 }
 0x145   :  { %1212 = vst [vmem:[%s2195_s3 + $0x10] sm:$0xff] %v1156_v24  ;;  %v1159_v27 = vadd.f32 %v1570_v8, %v1062_v25  ;;  %v1499_v28 = vpop.f32.mrb[40].mxu0 }
 0x146   :  { %v1500_v29 = vpop.f32.mrb[41].mxu0 }
 0x147   :  { %1213 = vst [vmem:[%s2195_s3 + $0x18] sm:$0xff] %v1159_v27  ;;  %v1501_v31 = vadd.f32 %v1500_v29, %v1499_v28  ;;  %v1502_v14 = vpop.f32.mrb[42].mxu0  ;;  %v1577_v34 = vpop.f32.mrb[40].mxu1 }
 0x148   :  { %v1503_v32 = vpop.f32.mrb[43].mxu0  ;;  %v1179_v17 = vpop.f32.mrb[41].mxu1 }
 0x149   :  { %v1504_v35 = vadd.f32 %v1503_v32, %v1502_v14  ;;  %v1067_v36 = vadd.f32 %v1501_v31, %v2094_v30  ;;  %v1578_v38 = vpop.f32.mrb[42].mxu1 }
 0x14a   :  { %v1182_v42 = vpop.f32.mrb[43].mxu1 }
 0x14b   :  { %v1164_v39 = vadd.f32 %v1163_v1, %v1067_v36  ;;  %v1070_v41 = vadd.f32 %v1504_v35, %v2096_v33 }
 0x14d   :  { %1214 = vst [vmem:[%s2195_s3 + $0x20] sm:$0xff] %v1164_v39  ;;  %v1167_v43 = vadd.f32 %v1166_v26, %v1070_v41  ;;  %v1505_v44 = vpop.f32.mrb[44].mxu0 }
 0x14e   :  { %v1506_v45 = vpop.f32.mrb[45].mxu0 }
 0x14f   :  { %1215 = vst [vmem:[%s2195_s3 + $0x28] sm:$0xff] %v1167_v43  ;;  %v1507_v47 = vadd.f32 %v1506_v45, %v1505_v44  ;;  %v1508_v48 = vpop.f32.mrb[46].mxu0  ;;  %v1581_v51 = vpop.f32.mrb[44].mxu1 }
 0x150   :  { %v1509_v30 = vpop.f32.mrb[47].mxu0  ;;  %v1195_v33 = vpop.f32.mrb[45].mxu1 }
 0x151   :  { %v1075_v52 = vadd.f32 %v1507_v47, %v2100_v46  ;;  %v1510_v53 = vadd.f32 %v1509_v30, %v1508_v48  ;;  %v1582_v54 = vpop.f32.mrb[46].mxu1 }
 0x152   :  { %v1198_v58 = vpop.f32.mrb[47].mxu1 }
 0x153   :  { %v1172_v55 = vadd.f32 %v1573_v18, %v1075_v52  ;;  %v1078_v57 = vadd.f32 %v1510_v53, %v2102_v50 }
 0x155   :  { %1216 = vst [vmem:[%s2195_s3 + $0x30] sm:$0xff] %v1172_v55  ;;  %v1175_v60 = vadd.f32 %v1574_v23, %v1078_v57  ;;  %v1511_v61 = vpop.f32.mrb[48].mxu0 }
 0x156   :  { %v1512_v63 = vpop.f32.mrb[49].mxu0 }
 0x157   :  { %1217 = vst [vmem:[%s2195_s3 + $0x38] sm:$0xff] %v1175_v60  ;;  %v1513_v2 = vadd.f32 %v1512_v63, %v1511_v61  ;;  %v1514_v46 = vpop.f32.mrb[50].mxu0 }
 0x158   :  { %v1515_v3 = vpop.f32.mrb[51].mxu0 }
 0x159   :  { %v1516_v5 = vadd.f32 %v1515_v3, %v1514_v46  ;;  %v1083_v6 = vadd.f32 %v1513_v2, %v2106_v0 }
 0x15b   :  { %v1180_v7 = vadd.f32 %v1179_v17, %v1083_v6  ;;  %v1086_v50 = vadd.f32 %v1516_v5, %v2108_v4 }
 0x15d   :  { %1218 = vst [vmem:[%s2195_s3 + $0x40] sm:$0xff] %v1180_v7  ;;  %v1183_v8 = vadd.f32 %v1182_v42, %v1086_v50  ;;  %v1517_v9 = vpop.f32.mrb[52].mxu0 }
 0x15e   :  { %v1518_v49 = vpop.f32.mrb[53].mxu0 }
 0x15f   :  { %1219 = vst [vmem:[%s2195_s3 + $0x48] sm:$0xff] %v1183_v8  ;;  %v1519_v10 = vadd.f32 %v1518_v49, %v1517_v9  ;;  %v1520_v11 = vpop.f32.mrb[54].mxu0 }
 0x160   :  { %v1521_v12 = vpop.f32.mrb[55].mxu0 }
 0x161   :  { %v1091_v13 = vadd.f32 %v1519_v10, %v2112_v19  ;;  %v1522_v0 = vadd.f32 %v1521_v12, %v1520_v11 }
 0x163   :  { %v1188_v15 = vadd.f32 %v1577_v34, %v1091_v13  ;;  %v1094_v4 = vadd.f32 %v1522_v0, %v2114_v22 }
 0x165   :  { %1220 = vst [vmem:[%s2195_s3 + $0x50] sm:$0xff] %v1188_v15  ;;  %v1191_v16 = vadd.f32 %v1578_v38, %v1094_v4  ;;  %v1523_v62 = vpop.f32.mrb[56].mxu0 }
 0x166   :  { %v1524_v18 = vpop.f32.mrb[57].mxu0 }
 0x167   :  { %1221 = vst [vmem:[%s2195_s3 + $0x58] sm:$0xff] %v1191_v16  ;;  %v1525_v20 = vadd.f32 %v1524_v18, %v1523_v62  ;;  %v1526_v21 = vpop.f32.mrb[58].mxu0 }
 0x168   :  { %v1527_v1 = vpop.f32.mrb[59].mxu0 }
 0x169   :  { %v1528_v23 = vadd.f32 %v1527_v1, %v1526_v21  ;;  %v1099_v19 = vadd.f32 %v1525_v20, %v2118_v37 }
 0x16b   :  { %v1196_v24 = vadd.f32 %v1195_v33, %v1099_v19  ;;  %v1102_v22 = vadd.f32 %v1528_v23, %v2120_v40 }
 0x16d   :  { %1222 = vst [vmem:[%s2195_s3 + $0x60] sm:$0xff] %v1196_v24  ;;  %v1199_v25 = vadd.f32 %v1198_v58, %v1102_v22  ;;  %v1529_v26 = vpop.f32.mrb[60].mxu0 }
 0x16e   :  { %v1530_v27 = vpop.f32.mrb[61].mxu0 }
 0x16f   :  { %1223 = vst [vmem:[%s2195_s3 + $0x68] sm:$0xff] %v1199_v25  ;;  %v1531_v28 = vadd.f32 %v1530_v27, %v1529_v26  ;;  %v1532_v29 = vpop.f32.mrb[62].mxu0 }
 0x170   :  { %v1533_v31 = vpop.f32.mrb[63].mxu0 }
 0x171   :  { %v1107_v14 = vadd.f32 %v1531_v28, %v2124_v56  ;;  %v1534_v37 = vadd.f32 %v1533_v31, %v1532_v29 }
 0x173   :  { %v1204_v32 = vadd.f32 %v1581_v51, %v1107_v14  ;;  %v1110_v40 = vadd.f32 %v1534_v37, %v2126_v59 }
 0x175   :  { %1224 = vst [vmem:[%s2195_s3 + $0x70] sm:$0xff] %v1204_v32  ;;  %v1207_v34 = vadd.f32 %v1582_v54, %v1110_v40 }
 0x177   :  { %1225 = vst [vmem:[%s2195_s3 + $0x78] sm:$0xff] %v1207_v34 }

</bundles_post_ra>
